<compile_context>
chip_gen: v6e
topology: v6e:2x2x1
jax: 0.10.0
libtpu: 0.0.40
codegen_flags: <defaults>
</compile_context>

<pallas_src>
import functools

import jax
import jax.numpy as jnp
from jax.experimental import pallas as pl
from jax.experimental.pallas import tpu as pltpu


def _round_up(x, m):
    return (x + m - 1) // m * m


# ----------------------------------------------------------------------------
# Fused conv3x3(pad=1) + bias + ReLU + 2x2/2 maxpool Pallas kernel
# ----------------------------------------------------------------------------
def _conv_relu_pool_kernel(x_ref, w_ref, b_ref, o_ref):
    """One TB-batch block per grid step.

    x_ref : (4, TB*M, 9*Cin) bf16  pool-parity planes; plane p = dh*2+dw holds
            rows [b, ho, wo] with columns (kh*3+kw)*Cin+c equal to the padded
            input pixel xp[2*ho+dh+kh, 2*wo+dw+kw, c].
    w_ref : (9*Cin, Cout) bf16     conv taps stacked along the contraction dim
    b_ref : (1, Cout)     f32
    o_ref : (TB*M, Cout)  bf16     pooled output (row = b*M + ho*Wo + wo)
    """
    w = w_ref[...]
    mx = None
    for p in range(4):                              # 4 pool parities, unrolled
        d = jnp.dot(x_ref[p], w, preferred_element_type=jnp.float32)
        mx = d if mx is None else jnp.maximum(mx, d)
    # bias + ReLU once, after the max (both commute with the 2x2 max).
    o_ref[...] = jnp.maximum(mx + b_ref[...], 0.0).astype(o_ref.dtype)


def _pick_conv_tb(B, M, target_rows=512, max_rows=2048):
    """Batch elements per grid step: keep TB*M near `target_rows`, keep >=2
    parallel grid steps when B >= 2 (v7x has two TensorCores), and cap the
    per-step VMEM footprint."""
    best = 1
    for tb in range(1, B + 1):
        if B % tb:
            continue
        if B >= 2 and B // tb < 2:
            break
        if tb * M > max_rows:
            break
        best = tb
        if tb * M >= target_rows:
            break
    return best


def conv3x3_relu_pool2x2(x, w, b):
    """x: (B, H, W, Cin) bf16 NHWC; w: (9*Cin, Cout) bf16; b: (1, Cout) f32.
    Returns pooled (B, H//2, W//2, Cout) bf16."""
    B, H, W, Cin = x.shape
    assert H % 2 == 0 and W % 2 == 0
    Ho, Wo = H // 2, W // 2
    M = Ho * Wo
    K = 9 * Cin
    Cout = w.shape[-1]

    # pad=1 halo, then build the 4 pool-parity planes with the 9 taps
    # concatenated along channels (the only XLA-side glue; ~9x input bytes).
    xp = jnp.pad(x, ((0, 0), (1, 1), (1, 1), (0, 0)))
    planes = []
    for dh in range(2):
        for dw in range(2):
            taps = [
                xp[:, dh + kh: dh + kh + H: 2, dw + kw: dw + kw + W: 2, :]
                for kh in range(3) for kw in range(3)
            ]
            planes.append(jnp.concatenate(taps, axis=-1).reshape(B * M, K))
    xplanes = jnp.stack(planes, axis=0)             # (4, B*M, 9*Cin)

    tb = _pick_conv_tb(B, M)
    tm = tb * M                                     # rows per grid step (mult of 8)
    out = pl.pallas_call(
        _conv_relu_pool_kernel,
        out_shape=jax.ShapeDtypeStruct((B * M, Cout), jnp.bfloat16),
        grid=(B // tb,),
        in_specs=[
            pl.BlockSpec((4, tm, K), lambda i: (0, i, 0)),
            pl.BlockSpec((K, Cout), lambda i: (0, 0)),
            pl.BlockSpec((1, Cout), lambda i: (0, 0)),
        ],
        out_specs=pl.BlockSpec((tm, Cout), lambda i: (i, 0)),
        compiler_params=pltpu.CompilerParams(
            dimension_semantics=("parallel",),
            # Per-step footprint stays < ~6 MiB double-buffered by the
            # max_rows cap; 32 MiB is safe on v5e/v6e and v7x (64 MiB phys).
            vmem_limit_bytes=32 * 1024 * 1024),
    )(xplanes, w, b)
    return out.reshape(B, Ho, Wo, Cout)


# ----------------------------------------------------------------------------
# Fused fc1 + ReLU + (dropout = inference identity) + fc2 Pallas kernel
# ----------------------------------------------------------------------------
def _fc_fused_kernel(x_ref, w1_ref, b1_ref, w2_ref, b2_ref, o_ref):
    h = jnp.dot(x_ref[...], w1_ref[...], preferred_element_type=jnp.float32)
    h = jnp.maximum(h + b1_ref[...], 0.0)           # fc1 bias + ReLU (f32)
    # Dropout(p=0.5): inference-mode identity (no-op).
    out = jnp.dot(h.astype(jnp.bfloat16), w2_ref[...],
                  preferred_element_type=jnp.float32)
    o_ref[...] = out + b2_ref[...]


def _fc_blocking(B):
    """Row blocks must be multiples of 8 (sublane tiling); keep >=2 parallel
    grid steps so both v7x TensorCores get work."""
    tb = max(8, _round_up(B, 16) // 2)
    tb = _round_up(tb, 8)
    bp = max(_round_up(B, tb), 2 * tb)
    return bp, tb


def fc_fused(x, w1, b1, w2, b2):
    """x:(B,Kin) bf16; w1:(Kin,N1) bf16; w2:(N1,N2) bf16; biases f32 (1,N)."""
    B, Kin = x.shape
    N1 = w1.shape[1]
    N2 = w2.shape[1]
    bp, tb = _fc_blocking(B)
    xpad = jnp.pad(x, ((0, bp - B), (0, 0))) if bp != B else x
    out = pl.pallas_call(
        _fc_fused_kernel,
        out_shape=jax.ShapeDtypeStruct((bp, N2), jnp.float32),
        grid=(bp // tb,),
        in_specs=[
            pl.BlockSpec((tb, Kin), lambda i: (i, 0)),
            pl.BlockSpec((Kin, N1), lambda i: (0, 0)),   # resident (~2 MiB)
            pl.BlockSpec((1, N1), lambda i: (0, 0)),
            pl.BlockSpec((N1, N2), lambda i: (0, 0)),    # resident (~128 KiB)
            pl.BlockSpec((1, N2), lambda i: (0, 0)),
        ],
        out_specs=pl.BlockSpec((tb, N2), lambda i: (i, 0)),
        compiler_params=pltpu.CompilerParams(
            dimension_semantics=("parallel",),
            vmem_limit_bytes=32 * 1024 * 1024),
    )(xpad, w1, b1, w2, b2)
    return out[:B]


# ----------------------------------------------------------------------------
# Parameters: torch-layout init + one-time conversion to kernel layout
# ----------------------------------------------------------------------------
def init_params(num_classes=43):
    key = jax.random.PRNGKey(42)
    ks = jax.random.split(key, 10)

    def he(k, shape, fan_in):
        return jax.random.normal(k, shape, jnp.float32) * jnp.sqrt(2.0 / fan_in)

    return {
        "conv1_w": he(ks[0], (32, 1, 3, 3), 1 * 9),
        "conv1_b": 0.01 * jax.random.normal(ks[5], (32,), jnp.float32),
        "conv2_w": he(ks[1], (64, 32, 3, 3), 32 * 9),
        "conv2_b": 0.01 * jax.random.normal(ks[6], (64,), jnp.float32),
        "conv3_w": he(ks[2], (128, 64, 3, 3), 64 * 9),
        "conv3_b": 0.01 * jax.random.normal(ks[7], (128,), jnp.float32),
        "fc1_w": he(ks[3], (512, 128 * 4 * 4), 128 * 4 * 4),   # torch (out, in)
        "fc1_b": 0.01 * jax.random.normal(ks[8], (512,), jnp.float32),
        "fc2_w": he(ks[4], (num_classes, 512), 512),
        "fc2_b": 0.01 * jax.random.normal(ks[9], (num_classes,), jnp.float32),
    }


def prepare_params(p):
    """One-time conversion of torch-layout f32 params into kernel layout:
    bf16 matmul operands, conv weights as (9*Cin, Cout), pre-transposed FC
    weights (fc1 rows permuted to NHWC flatten order), fc2 padded to 128."""
    def conv_w(w):                       # (Cout, Cin, 3, 3) -> (9*Cin, Cout)
        cout, cin = w.shape[0], w.shape[1]
        return (jnp.transpose(w, (2, 3, 1, 0))      # (kh, kw, cin, cout)
                .reshape(9 * cin, cout).astype(jnp.bfloat16))

    nc = p["fc2_w"].shape[0]
    nc_pad = _round_up(nc, 128)

    # fc1: torch (512, 128*4*4) with input index ordered (c, h, w) -> permute
    # rows to (h, w, c) so the NHWC-flattened pooled activation can be used
    # directly (exactly reproduces torch's x.view(B, -1) on NCHW).
    fc1_w = (p["fc1_w"].reshape(512, 128, 4, 4)
             .transpose(2, 3, 1, 0).reshape(4 * 4 * 128, 512)
             .astype(jnp.bfloat16))
    fc2_w = jnp.pad(p["fc2_w"].T, ((0, 0), (0, nc_pad - nc))).astype(jnp.bfloat16)
    fc2_b = jnp.pad(p["fc2_b"], (0, nc_pad - nc))

    return {
        "conv1_w": conv_w(p["conv1_w"]), "conv1_b": p["conv1_b"].reshape(1, -1),
        "conv2_w": conv_w(p["conv2_w"]), "conv2_b": p["conv2_b"].reshape(1, -1),
        "conv3_w": conv_w(p["conv3_w"]), "conv3_b": p["conv3_b"].reshape(1, -1),
        "fc1_w": fc1_w, "fc1_b": p["fc1_b"].reshape(1, -1),
        "fc2_w": fc2_w, "fc2_b": fc2_b.reshape(1, -1),
    }


# ----------------------------------------------------------------------------
# Forward pass
# ----------------------------------------------------------------------------
@functools.partial(jax.jit, static_argnames=("num_classes",))
def traffic_sign_cnn_forward(x_nchw, params, *, num_classes=43):
    B = x_nchw.shape[0]
    # NCHW (torch) -> NHWC, bf16 activations end to end (f32 accumulation).
    x = jnp.transpose(x_nchw, (0, 2, 3, 1)).astype(jnp.bfloat16)

    x = conv3x3_relu_pool2x2(x, params["conv1_w"], params["conv1_b"])  # (B,16,16, 32)
    x = conv3x3_relu_pool2x2(x, params["conv2_w"], params["conv2_b"])  # (B, 8, 8, 64)
    x = conv3x3_relu_pool2x2(x, params["conv3_w"], params["conv3_b"])  # (B, 4, 4,128)

    # NHWC flatten (fc1_w rows pre-permuted to match torch's NCHW view(B, -1)).
    x = x.reshape(B, 4 * 4 * 128)                                      # (B, 2048)
    logits = fc_fused(x, params["fc1_w"], params["fc1_b"],
                      params["fc2_w"], params["fc2_b"])                # (B, 128) f32
    return logits[:, :num_classes]


if __name__ == "__main__":
    params = prepare_params(init_params(num_classes=43))
    key = jax.random.PRNGKey(0)
    # fc1 = Linear(128*4*4, ...) after three 2x2 pools implies 32x32 input.
    x = jax.random.normal(key, (2, 1, 32, 32), dtype=jnp.float32)

    out = traffic_sign_cnn_forward(x, params, num_classes=43)
    jax.block_until_ready(out)
    assert out.shape == (2, 43) and out.dtype == jnp.float32
    print("KERNEL_OK")
</pallas_src>

<mosaic_0001>
module attributes {stable_mosaic.version = 11 : i64} {
  func.func @_conv_relu_pool_kernel(%arg0: i32, %arg1: memref<4x256x9xbf16, #tpu.memory_space<vmem>>, %arg2: memref<9x32xbf16, #tpu.memory_space<vmem>>, %arg3: memref<1x32xf32, #tpu.memory_space<vmem>>, %arg4: memref<256x32xbf16, #tpu.memory_space<vmem>>) attributes {dimension_semantics = [#tpu.dimension_semantics<parallel>], iteration_bounds = array<i64: 2>, scalar_prefetch = 0 : i64, scratch_operands = 0 : i64, tpu.core_type = #tpu.core_type<tc>, window_params = [{transform_indices = @transform_0, window_bounds = array<i64: 4, 256, 9>}, {pipeline_mode = #tpu.pipeline_mode<synchronous>, transform_indices = @transform_1, window_bounds = array<i64: 9, 32>}, {pipeline_mode = #tpu.pipeline_mode<synchronous>, transform_indices = @transform_2, window_bounds = array<i64: 1, 32>}, {transform_indices = @transform_3, window_bounds = array<i64: 256, 32>}]} {
    %c0 = arith.constant 0 : index
    %c0_0 = arith.constant 0 : index
    %0 = vector.load %arg2[%c0, %c0_0] : memref<9x32xbf16, #tpu.memory_space<vmem>>, vector<9x32xbf16>
    %c0_1 = arith.constant 0 : index
    %c0_2 = arith.constant 0 : index
    %c0_3 = arith.constant 0 : index
    %1 = vector.load %arg1[%c0_1, %c0_2, %c0_3] : memref<4x256x9xbf16, #tpu.memory_space<vmem>>, vector<1x256x9xbf16>
    %2 = vector.shape_cast %1 : vector<1x256x9xbf16> to vector<256x9xbf16>
    %cst = arith.constant dense<0.000000e+00> : vector<256x32xf32>
    %3 = tpu.matmul %2, %0, %cst {dimension_numbers = #tpu.dot_dimension_numbers<[1], [0], [0], [1], [0, 0, 1, 1], [], []>} : vector<256x9xbf16>, vector<9x32xbf16>, vector<256x32xf32> -> vector<256x32xf32>
    %c1 = arith.constant 1 : index
    %c0_4 = arith.constant 0 : index
    %c0_5 = arith.constant 0 : index
    %4 = vector.load %arg1[%c1, %c0_4, %c0_5] : memref<4x256x9xbf16, #tpu.memory_space<vmem>>, vector<1x256x9xbf16>
    %5 = vector.shape_cast %4 : vector<1x256x9xbf16> to vector<256x9xbf16>
    %cst_6 = arith.constant dense<0.000000e+00> : vector<256x32xf32>
    %6 = tpu.matmul %5, %0, %cst_6 {dimension_numbers = #tpu.dot_dimension_numbers<[1], [0], [0], [1], [0, 0, 1, 1], [], []>} : vector<256x9xbf16>, vector<9x32xbf16>, vector<256x32xf32> -> vector<256x32xf32>
    %7 = arith.maximumf %3, %6 : vector<256x32xf32>
    %c2 = arith.constant 2 : index
    %c0_7 = arith.constant 0 : index
    %c0_8 = arith.constant 0 : index
    %8 = vector.load %arg1[%c2, %c0_7, %c0_8] : memref<4x256x9xbf16, #tpu.memory_space<vmem>>, vector<1x256x9xbf16>
    %9 = vector.shape_cast %8 : vector<1x256x9xbf16> to vector<256x9xbf16>
    %cst_9 = arith.constant dense<0.000000e+00> : vector<256x32xf32>
    %10 = tpu.matmul %9, %0, %cst_9 {dimension_numbers = #tpu.dot_dimension_numbers<[1], [0], [0], [1], [0, 0, 1, 1], [], []>} : vector<256x9xbf16>, vector<9x32xbf16>, vector<256x32xf32> -> vector<256x32xf32>
    %11 = arith.maximumf %7, %10 : vector<256x32xf32>
    %c3 = arith.constant 3 : index
    %c0_10 = arith.constant 0 : index
    %c0_11 = arith.constant 0 : index
    %12 = vector.load %arg1[%c3, %c0_10, %c0_11] : memref<4x256x9xbf16, #tpu.memory_space<vmem>>, vector<1x256x9xbf16>
    %13 = vector.shape_cast %12 : vector<1x256x9xbf16> to vector<256x9xbf16>
    %cst_12 = arith.constant dense<0.000000e+00> : vector<256x32xf32>
    %14 = tpu.matmul %13, %0, %cst_12 {dimension_numbers = #tpu.dot_dimension_numbers<[1], [0], [0], [1], [0, 0, 1, 1], [], []>} : vector<256x9xbf16>, vector<9x32xbf16>, vector<256x32xf32> -> vector<256x32xf32>
    %15 = arith.maximumf %11, %14 : vector<256x32xf32>
    %c0_13 = arith.constant 0 : index
    %c0_14 = arith.constant 0 : index
    %16 = vector.load %arg3[%c0_13, %c0_14] : memref<1x32xf32, #tpu.memory_space<vmem>>, vector<1x32xf32>
    %17 = vector.broadcast %16 : vector<1x32xf32> to vector<256x32xf32>
    %18 = arith.addf %15, %17 : vector<256x32xf32>
    %cst_15 = arith.constant 0.000000e+00 : f32
    %19 = vector.broadcast %cst_15 : f32 to vector<256x32xf32>
    %20 = arith.maximumf %18, %19 : vector<256x32xf32>
    %21 = arith.truncf %20 : vector<256x32xf32> to vector<256x32xbf16>
    %c0_16 = arith.constant 0 : index
    %c0_17 = arith.constant 0 : index
    %22 = vector.load %arg4[%c0_16, %c0_17] : memref<256x32xbf16, #tpu.memory_space<vmem>>, vector<256x32xbf16>
    tpu.vector_store %arg4[%c0_16, %c0_17], %21 {strides = array<i32>} : memref<256x32xbf16, #tpu.memory_space<vmem>>, vector<256x32xbf16>,
    return
  }
  func.func @transform_0(%arg0: i32) -> (i32, i32, i32) {
    %c0_i32 = arith.constant 0 : i32
    %c0_i32_0 = arith.constant 0 : i32
    %c0_i32_1 = arith.constant 0 : i32
    return %c0_i32, %arg0, %c0_i32_0 : i32, i32, i32
  }
  func.func @transform_1(%arg0: i32) -> (i32, i32) {
    %c0_i32 = arith.constant 0 : i32
    %c0_i32_0 = arith.constant 0 : i32
    %c0_i32_1 = arith.constant 0 : i32
    return %c0_i32, %c0_i32_0 : i32, i32
  }
  func.func @transform_2(%arg0: i32) -> (i32, i32) {
    %c0_i32 = arith.constant 0 : i32
    %c0_i32_0 = arith.constant 0 : i32
    %c0_i32_1 = arith.constant 0 : i32
    return %c0_i32, %c0_i32_0 : i32, i32
  }
  func.func @transform_3(%arg0: i32) -> (i32, i32) {
    %c0_i32 = arith.constant 0 : i32
    %c0_i32_0 = arith.constant 0 : i32
    return %arg0, %c0_i32 : i32, i32
  }
}

module attributes {stable_mosaic.version = 11 : i64} {
  func.func @_conv_relu_pool_kernel(%arg0: i32, %arg1: memref<4x64x288xbf16, #tpu.memory_space<vmem>>, %arg2: memref<288x64xbf16, #tpu.memory_space<vmem>>, %arg3: memref<1x64xf32, #tpu.memory_space<vmem>>, %arg4: memref<64x64xbf16, #tpu.memory_space<vmem>>) attributes {dimension_semantics = [#tpu.dimension_semantics<parallel>], iteration_bounds = array<i64: 2>, scalar_prefetch = 0 : i64, scratch_operands = 0 : i64, tpu.core_type = #tpu.core_type<tc>, window_params = [{transform_indices = @transform_0, window_bounds = array<i64: 4, 64, 288>}, {pipeline_mode = #tpu.pipeline_mode<synchronous>, transform_indices = @transform_1, window_bounds = array<i64: 288, 64>}, {pipeline_mode = #tpu.pipeline_mode<synchronous>, transform_indices = @transform_2, window_bounds = array<i64: 1, 64>}, {transform_indices = @transform_3, window_bounds = array<i64: 64, 64>}]} {
    %c0 = arith.constant 0 : index
    %c0_0 = arith.constant 0 : index
    %0 = vector.load %arg2[%c0, %c0_0] : memref<288x64xbf16, #tpu.memory_space<vmem>>, vector<288x64xbf16>
    %c0_1 = arith.constant 0 : index
    %c0_2 = arith.constant 0 : index
    %c0_3 = arith.constant 0 : index
    %1 = vector.load %arg1[%c0_1, %c0_2, %c0_3] : memref<4x64x288xbf16, #tpu.memory_space<vmem>>, vector<1x64x288xbf16>
    %2 = vector.shape_cast %1 : vector<1x64x288xbf16> to vector<64x288xbf16>
    %cst = arith.constant dense<0.000000e+00> : vector<64x64xf32>
    %3 = tpu.matmul %2, %0, %cst {dimension_numbers = #tpu.dot_dimension_numbers<[1], [0], [0], [1], [0, 0, 1, 1], [], []>} : vector<64x288xbf16>, vector<288x64xbf16>, vector<64x64xf32> -> vector<64x64xf32>
    %c1 = arith.constant 1 : index
    %c0_4 = arith.constant 0 : index
    %c0_5 = arith.constant 0 : index
    %4 = vector.load %arg1[%c1, %c0_4, %c0_5] : memref<4x64x288xbf16, #tpu.memory_space<vmem>>, vector<1x64x288xbf16>
    %5 = vector.shape_cast %4 : vector<1x64x288xbf16> to vector<64x288xbf16>
    %cst_6 = arith.constant dense<0.000000e+00> : vector<64x64xf32>
    %6 = tpu.matmul %5, %0, %cst_6 {dimension_numbers = #tpu.dot_dimension_numbers<[1], [0], [0], [1], [0, 0, 1, 1], [], []>} : vector<64x288xbf16>, vector<288x64xbf16>, vector<64x64xf32> -> vector<64x64xf32>
    %7 = arith.maximumf %3, %6 : vector<64x64xf32>
    %c2 = arith.constant 2 : index
    %c0_7 = arith.constant 0 : index
    %c0_8 = arith.constant 0 : index
    %8 = vector.load %arg1[%c2, %c0_7, %c0_8] : memref<4x64x288xbf16, #tpu.memory_space<vmem>>, vector<1x64x288xbf16>
    %9 = vector.shape_cast %8 : vector<1x64x288xbf16> to vector<64x288xbf16>
    %cst_9 = arith.constant dense<0.000000e+00> : vector<64x64xf32>
    %10 = tpu.matmul %9, %0, %cst_9 {dimension_numbers = #tpu.dot_dimension_numbers<[1], [0], [0], [1], [0, 0, 1, 1], [], []>} : vector<64x288xbf16>, vector<288x64xbf16>, vector<64x64xf32> -> vector<64x64xf32>
    %11 = arith.maximumf %7, %10 : vector<64x64xf32>
    %c3 = arith.constant 3 : index
    %c0_10 = arith.constant 0 : index
    %c0_11 = arith.constant 0 : index
    %12 = vector.load %arg1[%c3, %c0_10, %c0_11] : memref<4x64x288xbf16, #tpu.memory_space<vmem>>, vector<1x64x288xbf16>
    %13 = vector.shape_cast %12 : vector<1x64x288xbf16> to vector<64x288xbf16>
    %cst_12 = arith.constant dense<0.000000e+00> : vector<64x64xf32>
    %14 = tpu.matmul %13, %0, %cst_12 {dimension_numbers = #tpu.dot_dimension_numbers<[1], [0], [0], [1], [0, 0, 1, 1], [], []>} : vector<64x288xbf16>, vector<288x64xbf16>, vector<64x64xf32> -> vector<64x64xf32>
    %15 = arith.maximumf %11, %14 : vector<64x64xf32>
    %c0_13 = arith.constant 0 : index
    %c0_14 = arith.constant 0 : index
    %16 = vector.load %arg3[%c0_13, %c0_14] : memref<1x64xf32, #tpu.memory_space<vmem>>, vector<1x64xf32>
    %17 = vector.broadcast %16 : vector<1x64xf32> to vector<64x64xf32>
    %18 = arith.addf %15, %17 : vector<64x64xf32>
    %cst_15 = arith.constant 0.000000e+00 : f32
    %19 = vector.broadcast %cst_15 : f32 to vector<64x64xf32>
    %20 = arith.maximumf %18, %19 : vector<64x64xf32>
    %21 = arith.truncf %20 : vector<64x64xf32> to vector<64x64xbf16>
    %c0_16 = arith.constant 0 : index
    %c0_17 = arith.constant 0 : index
    %22 = vector.load %arg4[%c0_16, %c0_17] : memref<64x64xbf16, #tpu.memory_space<vmem>>, vector<64x64xbf16>
    tpu.vector_store %arg4[%c0_16, %c0_17], %21 {strides = array<i32>} : memref<64x64xbf16, #tpu.memory_space<vmem>>, vector<64x64xbf16>,
    return
  }
  func.func @transform_0(%arg0: i32) -> (i32, i32, i32) {
    %c0_i32 = arith.constant 0 : i32
    %c0_i32_0 = arith.constant 0 : i32
    %c0_i32_1 = arith.constant 0 : i32
    return %c0_i32, %arg0, %c0_i32_0 : i32, i32, i32
  }
  func.func @transform_1(%arg0: i32) -> (i32, i32) {
    %c0_i32 = arith.constant 0 : i32
    %c0_i32_0 = arith.constant 0 : i32
    %c0_i32_1 = arith.constant 0 : i32
    return %c0_i32, %c0_i32_0 : i32, i32
  }
  func.func @transform_2(%arg0: i32) -> (i32, i32) {
    %c0_i32 = arith.constant 0 : i32
    %c0_i32_0 = arith.constant 0 : i32
    %c0_i32_1 = arith.constant 0 : i32
    return %c0_i32, %c0_i32_0 : i32, i32
  }
  func.func @transform_3(%arg0: i32) -> (i32, i32) {
    %c0_i32 = arith.constant 0 : i32
    %c0_i32_0 = arith.constant 0 : i32
    return %arg0, %c0_i32 : i32, i32
  }
}

module attributes {stable_mosaic.version = 11 : i64} {
  func.func @_conv_relu_pool_kernel(%arg0: i32, %arg1: memref<4x16x576xbf16, #tpu.memory_space<vmem>>, %arg2: memref<576x128xbf16, #tpu.memory_space<vmem>>, %arg3: memref<1x128xf32, #tpu.memory_space<vmem>>, %arg4: memref<16x128xbf16, #tpu.memory_space<vmem>>) attributes {dimension_semantics = [#tpu.dimension_semantics<parallel>], iteration_bounds = array<i64: 2>, scalar_prefetch = 0 : i64, scratch_operands = 0 : i64, tpu.core_type = #tpu.core_type<tc>, window_params = [{transform_indices = @transform_0, window_bounds = array<i64: 4, 16, 576>}, {pipeline_mode = #tpu.pipeline_mode<synchronous>, transform_indices = @transform_1, window_bounds = array<i64: 576, 128>}, {pipeline_mode = #tpu.pipeline_mode<synchronous>, transform_indices = @transform_2, window_bounds = array<i64: 1, 128>}, {transform_indices = @transform_3, window_bounds = array<i64: 16, 128>}]} {
    %c0 = arith.constant 0 : index
    %c0_0 = arith.constant 0 : index
    %0 = vector.load %arg2[%c0, %c0_0] : memref<576x128xbf16, #tpu.memory_space<vmem>>, vector<576x128xbf16>
    %c0_1 = arith.constant 0 : index
    %c0_2 = arith.constant 0 : index
    %c0_3 = arith.constant 0 : index
    %1 = vector.load %arg1[%c0_1, %c0_2, %c0_3] : memref<4x16x576xbf16, #tpu.memory_space<vmem>>, vector<1x16x576xbf16>
    %2 = vector.shape_cast %1 : vector<1x16x576xbf16> to vector<16x576xbf16>
    %cst = arith.constant dense<0.000000e+00> : vector<16x128xf32>
    %3 = tpu.matmul %2, %0, %cst {dimension_numbers = #tpu.dot_dimension_numbers<[1], [0], [0], [1], [0, 0, 1, 1], [], []>} : vector<16x576xbf16>, vector<576x128xbf16>, vector<16x128xf32> -> vector<16x128xf32>
    %c1 = arith.constant 1 : index
    %c0_4 = arith.constant 0 : index
    %c0_5 = arith.constant 0 : index
    %4 = vector.load %arg1[%c1, %c0_4, %c0_5] : memref<4x16x576xbf16, #tpu.memory_space<vmem>>, vector<1x16x576xbf16>
    %5 = vector.shape_cast %4 : vector<1x16x576xbf16> to vector<16x576xbf16>
    %cst_6 = arith.constant dense<0.000000e+00> : vector<16x128xf32>
    %6 = tpu.matmul %5, %0, %cst_6 {dimension_numbers = #tpu.dot_dimension_numbers<[1], [0], [0], [1], [0, 0, 1, 1], [], []>} : vector<16x576xbf16>, vector<576x128xbf16>, vector<16x128xf32> -> vector<16x128xf32>
    %7 = arith.maximumf %3, %6 : vector<16x128xf32>
    %c2 = arith.constant 2 : index
    %c0_7 = arith.constant 0 : index
    %c0_8 = arith.constant 0 : index
    %8 = vector.load %arg1[%c2, %c0_7, %c0_8] : memref<4x16x576xbf16, #tpu.memory_space<vmem>>, vector<1x16x576xbf16>
    %9 = vector.shape_cast %8 : vector<1x16x576xbf16> to vector<16x576xbf16>
    %cst_9 = arith.constant dense<0.000000e+00> : vector<16x128xf32>
    %10 = tpu.matmul %9, %0, %cst_9 {dimension_numbers = #tpu.dot_dimension_numbers<[1], [0], [0], [1], [0, 0, 1, 1], [], []>} : vector<16x576xbf16>, vector<576x128xbf16>, vector<16x128xf32> -> vector<16x128xf32>
    %11 = arith.maximumf %7, %10 : vector<16x128xf32>
    %c3 = arith.constant 3 : index
    %c0_10 = arith.constant 0 : index
    %c0_11 = arith.constant 0 : index
    %12 = vector.load %arg1[%c3, %c0_10, %c0_11] : memref<4x16x576xbf16, #tpu.memory_space<vmem>>, vector<1x16x576xbf16>
    %13 = vector.shape_cast %12 : vector<1x16x576xbf16> to vector<16x576xbf16>
    %cst_12 = arith.constant dense<0.000000e+00> : vector<16x128xf32>
    %14 = tpu.matmul %13, %0, %cst_12 {dimension_numbers = #tpu.dot_dimension_numbers<[1], [0], [0], [1], [0, 0, 1, 1], [], []>} : vector<16x576xbf16>, vector<576x128xbf16>, vector<16x128xf32> -> vector<16x128xf32>
    %15 = arith.maximumf %11, %14 : vector<16x128xf32>
    %c0_13 = arith.constant 0 : index
    %c0_14 = arith.constant 0 : index
    %16 = vector.load %arg3[%c0_13, %c0_14] : memref<1x128xf32, #tpu.memory_space<vmem>>, vector<1x128xf32>
    %17 = vector.broadcast %16 : vector<1x128xf32> to vector<16x128xf32>
    %18 = arith.addf %15, %17 : vector<16x128xf32>
    %cst_15 = arith.constant 0.000000e+00 : f32
    %19 = vector.broadcast %cst_15 : f32 to vector<16x128xf32>
    %20 = arith.maximumf %18, %19 : vector<16x128xf32>
    %21 = arith.truncf %20 : vector<16x128xf32> to vector<16x128xbf16>
    %c0_16 = arith.constant 0 : index
    %c0_17 = arith.constant 0 : index
    %22 = vector.load %arg4[%c0_16, %c0_17] : memref<16x128xbf16, #tpu.memory_space<vmem>>, vector<16x128xbf16>
    tpu.vector_store %arg4[%c0_16, %c0_17], %21 {strides = array<i32>} : memref<16x128xbf16, #tpu.memory_space<vmem>>, vector<16x128xbf16>,
    return
  }
  func.func @transform_0(%arg0: i32) -> (i32, i32, i32) {
    %c0_i32 = arith.constant 0 : i32
    %c0_i32_0 = arith.constant 0 : i32
    %c0_i32_1 = arith.constant 0 : i32
    return %c0_i32, %arg0, %c0_i32_0 : i32, i32, i32
  }
  func.func @transform_1(%arg0: i32) -> (i32, i32) {
    %c0_i32 = arith.constant 0 : i32
    %c0_i32_0 = arith.constant 0 : i32
    %c0_i32_1 = arith.constant 0 : i32
    return %c0_i32, %c0_i32_0 : i32, i32
  }
  func.func @transform_2(%arg0: i32) -> (i32, i32) {
    %c0_i32 = arith.constant 0 : i32
    %c0_i32_0 = arith.constant 0 : i32
    %c0_i32_1 = arith.constant 0 : i32
    return %c0_i32, %c0_i32_0 : i32, i32
  }
  func.func @transform_3(%arg0: i32) -> (i32, i32) {
    %c0_i32 = arith.constant 0 : i32
    %c0_i32_0 = arith.constant 0 : i32
    return %arg0, %c0_i32 : i32, i32
  }
}

module attributes {stable_mosaic.version = 11 : i64} {
  func.func @_fc_fused_kernel(%arg0: i32, %arg1: memref<8x2048xbf16, #tpu.memory_space<vmem>>, %arg2: memref<2048x512xbf16, #tpu.memory_space<vmem>>, %arg3: memref<1x512xf32, #tpu.memory_space<vmem>>, %arg4: memref<512x128xbf16, #tpu.memory_space<vmem>>, %arg5: memref<1x128xf32, #tpu.memory_space<vmem>>, %arg6: memref<8x128xf32, #tpu.memory_space<vmem>>) attributes {dimension_semantics = [#tpu.dimension_semantics<parallel>], iteration_bounds = array<i64: 2>, scalar_prefetch = 0 : i64, scratch_operands = 0 : i64, tpu.core_type = #tpu.core_type<tc>, window_params = [{transform_indices = @transform_0, window_bounds = array<i64: 8, 2048>}, {pipeline_mode = #tpu.pipeline_mode<synchronous>, transform_indices = @transform_1, window_bounds = array<i64: 2048, 512>}, {pipeline_mode = #tpu.pipeline_mode<synchronous>, transform_indices = @transform_2, window_bounds = array<i64: 1, 512>}, {pipeline_mode = #tpu.pipeline_mode<synchronous>, transform_indices = @transform_3, window_bounds = array<i64: 512, 128>}, {pipeline_mode = #tpu.pipeline_mode<synchronous>, transform_indices = @transform_4, window_bounds = array<i64: 1, 128>}, {transform_indices = @transform_5, window_bounds = array<i64: 8, 128>}]} {
    %c0 = arith.constant 0 : index
    %c0_0 = arith.constant 0 : index
    %0 = vector.load %arg1[%c0, %c0_0] : memref<8x2048xbf16, #tpu.memory_space<vmem>>, vector<8x2048xbf16>
    %c0_1 = arith.constant 0 : index
    %c0_2 = arith.constant 0 : index
    %1 = vector.load %arg2[%c0_1, %c0_2] : memref<2048x512xbf16, #tpu.memory_space<vmem>>, vector<2048x512xbf16>
    %cst = arith.constant dense<0.000000e+00> : vector<8x512xf32>
    %2 = tpu.matmul %0, %1, %cst {dimension_numbers = #tpu.dot_dimension_numbers<[1], [0], [0], [1], [0, 0, 1, 1], [], []>} : vector<8x2048xbf16>, vector<2048x512xbf16>, vector<8x512xf32> -> vector<8x512xf32>
    %c0_3 = arith.constant 0 : index
    %c0_4 = arith.constant 0 : index
    %3 = vector.load %arg3[%c0_3, %c0_4] : memref<1x512xf32, #tpu.memory_space<vmem>>, vector<1x512xf32>
    %4 = vector.broadcast %3 : vector<1x512xf32> to vector<8x512xf32>
    %5 = arith.addf %2, %4 : vector<8x512xf32>
    %cst_5 = arith.constant 0.000000e+00 : f32
    %6 = vector.broadcast %cst_5 : f32 to vector<8x512xf32>
    %7 = arith.maximumf %5, %6 : vector<8x512xf32>
    %8 = arith.truncf %7 : vector<8x512xf32> to vector<8x512xbf16>
    %c0_6 = arith.constant 0 : index
    %c0_7 = arith.constant 0 : index
    %9 = vector.load %arg4[%c0_6, %c0_7] : memref<512x128xbf16, #tpu.memory_space<vmem>>, vector<512x128xbf16>
    %cst_8 = arith.constant dense<0.000000e+00> : vector<8x128xf32>
    %10 = tpu.matmul %8, %9, %cst_8 {dimension_numbers = #tpu.dot_dimension_numbers<[1], [0], [0], [1], [0, 0, 1, 1], [], []>} : vector<8x512xbf16>, vector<512x128xbf16>, vector<8x128xf32> -> vector<8x128xf32>
    %c0_9 = arith.constant 0 : index
    %c0_10 = arith.constant 0 : index
    %11 = vector.load %arg5[%c0_9, %c0_10] : memref<1x128xf32, #tpu.memory_space<vmem>>, vector<1x128xf32>
    %12 = vector.broadcast %11 : vector<1x128xf32> to vector<8x128xf32>
    %13 = arith.addf %10, %12 : vector<8x128xf32>
    %c0_11 = arith.constant 0 : index
    %c0_12 = arith.constant 0 : index
    %14 = vector.load %arg6[%c0_11, %c0_12] : memref<8x128xf32, #tpu.memory_space<vmem>>, vector<8x128xf32>
    tpu.vector_store %arg6[%c0_11, %c0_12], %13 {strides = array<i32>} : memref<8x128xf32, #tpu.memory_space<vmem>>, vector<8x128xf32>,
    return
  }
  func.func @transform_0(%arg0: i32) -> (i32, i32) {
    %c0_i32 = arith.constant 0 : i32
    %c0_i32_0 = arith.constant 0 : i32
    return %arg0, %c0_i32 : i32, i32
  }
  func.func @transform_1(%arg0: i32) -> (i32, i32) {
    %c0_i32 = arith.constant 0 : i32
    %c0_i32_0 = arith.constant 0 : i32
    %c0_i32_1 = arith.constant 0 : i32
    return %c0_i32, %c0_i32_0 : i32, i32
  }
  func.func @transform_2(%arg0: i32) -> (i32, i32) {
    %c0_i32 = arith.constant 0 : i32
    %c0_i32_0 = arith.constant 0 : i32
    %c0_i32_1 = arith.constant 0 : i32
    return %c0_i32, %c0_i32_0 : i32, i32
  }
  func.func @transform_3(%arg0: i32) -> (i32, i32) {
    %c0_i32 = arith.constant 0 : i32
    %c0_i32_0 = arith.constant 0 : i32
    %c0_i32_1 = arith.constant 0 : i32
    return %c0_i32, %c0_i32_0 : i32, i32
  }
  func.func @transform_4(%arg0: i32) -> (i32, i32) {
    %c0_i32 = arith.constant 0 : i32
    %c0_i32_0 = arith.constant 0 : i32
    %c0_i32_1 = arith.constant 0 : i32
    return %c0_i32, %c0_i32_0 : i32, i32
  }
  func.func @transform_5(%arg0: i32) -> (i32, i32) {
    %c0_i32 = arith.constant 0 : i32
    %c0_i32_0 = arith.constant 0 : i32
    return %arg0, %c0_i32 : i32, i32
  }
}

</mosaic_0001>

<bundles_post_ra>
// kernel: traffic_sign_cnn_forward.4
= control target key start
LH: loop header
LB: loop body
LE: loop exit
PB: predicated region body
PF: predicated region fallthrough
CT: control target
= control target key end

     0   :  { %s3061_s12 = smov 0   ;;  %s3063_s13 = smov 0   ;;  %s3673_s0 = inlined_call_operand.vmem [shape: bf16[4,512,9], index: 0, kind: input, shape index: {}]   ;;  %s3674_s1 = inlined_call_operand.vmem [shape: bf16[9,32], index: 1, kind: input, shape index: {}]   ;;  %s3675_s2 = inlined_call_operand.vmem [shape: f32[1,32], index: 2, kind: input, shape index: {}]   ;;  %s3676_s3 = inlined_call_operand.vmem [shape: bf16[512,32], index: 3, kind: output, shape index: {}]  }
   0x1   :  { %s3065_s14 = smov 0  }
   0x2 LB: > { %s2418_s15 = sadd.s32 4294967295, %s3038_s14   ;;  %s3078_s16 = sadd.s32 1, %s3038_s14   ;;  %s3038_s14 = sphi %s3065_s14, %s3713_s14   ;;  %s3034_s13 = sphi %s3063_s13, %s3712_s13   ;;  %s3030_s12 = sphi %s3061_s12, %s3711_s12  }
   0x3   : > { %s17_s17 = ssub.s32 %s3038_s14, %s3078_s16  ;;  %s20_s18 = sadd.s32 1, %s3034_s13 }
   0x4   : > { %p18_p0 = scmp.eq.s32.totalorder %s17_s17, 0  ;;  %p27_p1 = scmp.ne.s32.totalorder %s3034_s13, %s3030_s12 }
   0x5   : > { %p28_p2 = scmp.eq.s32.totalorder %s3038_s14, 0  ;;  %p2421_p4 = scmp.ge.s32.totalorder %s3038_s14, 2 }
   0x6   : > { %s3087_s19 = scalar_select %p18_p0, %s3034_s13, %s20_s18  }
   0x7   : > { %p29_p3 = por %p28_p2, %p27_p1  ;;  %127 = sbr.rel (%p2421_p4) target bundleno = 48 (0x30), region = 24 }
   0xc   : > { %130 = sbr.rel (!%p29_p3) target bundleno = 48 (0x30), region = 28  ;;  %s132_s20 = sand.u32 (%p29_p3), 1, %s3034_s13  }
   0xd   : > { %s2689_s21 = sshll.u32 (%p29_p3), %s3038_s14, 7  ;;  %s2422_s22 = sshll.u32 (%p29_p3), %s132_s20, 9 }
   0xe   : > { %s3095_s25 = scalar_lea.vmem (%p29_p3), %s3673_s0, %s2689_s21  ;;  %s3100_s26 = scalar_lea.vmem (%p29_p3), [#allocation2], %s2422_s22 }
   0xf   : > { %v154_v0 = vld [vmem:[%s3095_s25] sm:$0xff] (%p29_p3)   ;;  %v158_v1 = vld [vmem:[%s3095_s25 + $0x8] sm:$0xff] (%p29_p3)   ;;  %v162_v2 = vld [vmem:[%s3095_s25 + $0x10] sm:$0xff] (%p29_p3)  }
  0x10   : > { %155 = vst [vmem:[%s3100_s26] sm:$0xff] (%p29_p3), %v154_v0   ;;  %159 = vst [vmem:[%s3100_s26 + $0x8] sm:$0xff] (%p29_p3), %v158_v1   ;;  %v166_v3 = vld [vmem:[%s3095_s25 + $0x18] sm:$0xff] (%p29_p3)   ;;  %v170_v4 = vld [vmem:[%s3095_s25 + $0x20] sm:$0xff] (%p29_p3)  }
  0x11   : > { %163 = vst [vmem:[%s3100_s26 + $0x10] sm:$0xff] %v162_v2   ;;  %v174_v5 = vld [vmem:[%s3095_s25 + $0x28] sm:$0xff]   ;;  %167 = vst [vmem:[%s3100_s26 + $0x18] sm:$0xff] %v166_v3   ;;  %v178_v6 = vld [vmem:[%s3095_s25 + $0x30] sm:$0xff]  }
  0x12   : > { %171 = vst [vmem:[%s3100_s26 + $0x20] sm:$0xff] %v170_v4   ;;  %175 = vst [vmem:[%s3100_s26 + $0x28] sm:$0xff] %v174_v5   ;;  %v182_v7 = vld [vmem:[%s3095_s25 + $0x38] sm:$0xff]   ;;  %v186_v8 = vld [vmem:[%s3095_s25 + $0x40] sm:$0xff]  }
  0x13   : > { %179 = vst [vmem:[%s3100_s26 + $0x30] sm:$0xff] %v178_v6   ;;  %183 = vst [vmem:[%s3100_s26 + $0x38] sm:$0xff] %v182_v7   ;;  %v190_v9 = vld [vmem:[%s3095_s25 + $0x48] sm:$0xff]   ;;  %v194_v10 = vld [vmem:[%s3095_s25 + $0x50] sm:$0xff]  }
  0x14   : > { %187 = vst [vmem:[%s3100_s26 + $0x40] sm:$0xff] %v186_v8   ;;  %v198_v11 = vld [vmem:[%s3095_s25 + $0x58] sm:$0xff]   ;;  %191 = vst [vmem:[%s3100_s26 + $0x48] sm:$0xff] %v190_v9   ;;  %v202_v12 = vld [vmem:[%s3095_s25 + $0x60] sm:$0xff]  }
  0x15   : > { %195 = vst [vmem:[%s3100_s26 + $0x50] sm:$0xff] %v194_v10   ;;  %199 = vst [vmem:[%s3100_s26 + $0x58] sm:$0xff] %v198_v11   ;;  %v206_v13 = vld [vmem:[%s3095_s25 + $0x68] sm:$0xff]   ;;  %v210_v14 = vld [vmem:[%s3095_s25 + $0x70] sm:$0xff]  }
  0x16   : > { %203 = vst [vmem:[%s3100_s26 + $0x60] sm:$0xff] %v202_v12   ;;  %207 = vst [vmem:[%s3100_s26 + $0x68] sm:$0xff] %v206_v13   ;;  %v214_v15 = vld [vmem:[%s3095_s25 + $0x78] sm:$0xff]   ;;  %v218_v16 = vld [vmem:[%s3095_s25 + $0x100] sm:$0xff]  }
  0x17   : > { %211 = vst [vmem:[%s3100_s26 + $0x70] sm:$0xff] %v210_v14   ;;  %v222_v17 = vld [vmem:[%s3095_s25 + $0x108] sm:$0xff]   ;;  %215 = vst [vmem:[%s3100_s26 + $0x78] sm:$0xff] %v214_v15   ;;  %v226_v18 = vld [vmem:[%s3095_s25 + $0x110] sm:$0xff]  }
  0x18   : > { %219 = vst [vmem:[%s3100_s26 + $0x80] sm:$0xff] %v218_v16   ;;  %223 = vst [vmem:[%s3100_s26 + $0x88] sm:$0xff] %v222_v17   ;;  %v230_v19 = vld [vmem:[%s3095_s25 + $0x118] sm:$0xff]   ;;  %v234_v20 = vld [vmem:[%s3095_s25 + $0x120] sm:$0xff]  }
  0x19   : > { %227 = vst [vmem:[%s3100_s26 + $0x90] sm:$0xff] %v226_v18   ;;  %231 = vst [vmem:[%s3100_s26 + $0x98] sm:$0xff] %v230_v19   ;;  %v238_v21 = vld [vmem:[%s3095_s25 + $0x128] sm:$0xff]   ;;  %v242_v22 = vld [vmem:[%s3095_s25 + $0x130] sm:$0xff]  }
  0x1a   : > { %235 = vst [vmem:[%s3100_s26 + $0xa0] sm:$0xff] %v234_v20   ;;  %v246_v23 = vld [vmem:[%s3095_s25 + $0x138] sm:$0xff]   ;;  %239 = vst [vmem:[%s3100_s26 + $0xa8] sm:$0xff] %v238_v21   ;;  %v250_v24 = vld [vmem:[%s3095_s25 + $0x140] sm:$0xff]  }
  0x1b   : > { %243 = vst [vmem:[%s3100_s26 + $0xb0] sm:$0xff] %v242_v22   ;;  %247 = vst [vmem:[%s3100_s26 + $0xb8] sm:$0xff] %v246_v23   ;;  %v254_v25 = vld [vmem:[%s3095_s25 + $0x148] sm:$0xff]   ;;  %v258_v26 = vld [vmem:[%s3095_s25 + $0x150] sm:$0xff]  }
  0x1c   : > { %251 = vst [vmem:[%s3100_s26 + $0xc0] sm:$0xff] %v250_v24   ;;  %255 = vst [vmem:[%s3100_s26 + $0xc8] sm:$0xff] %v254_v25   ;;  %v262_v27 = vld [vmem:[%s3095_s25 + $0x158] sm:$0xff]   ;;  %v266_v28 = vld [vmem:[%s3095_s25 + $0x160] sm:$0xff]  }
  0x1d   : > { %259 = vst [vmem:[%s3100_s26 + $0xd0] sm:$0xff] %v258_v26   ;;  %v270_v29 = vld [vmem:[%s3095_s25 + $0x168] sm:$0xff]   ;;  %263 = vst [vmem:[%s3100_s26 + $0xd8] sm:$0xff] %v262_v27   ;;  %v274_v30 = vld [vmem:[%s3095_s25 + $0x170] sm:$0xff]  }
  0x1e   : > { %267 = vst [vmem:[%s3100_s26 + $0xe0] sm:$0xff] %v266_v28   ;;  %271 = vst [vmem:[%s3100_s26 + $0xe8] sm:$0xff] %v270_v29   ;;  %v278_v31 = vld [vmem:[%s3095_s25 + $0x178] sm:$0xff]   ;;  %v282_v32 = vld [vmem:[%s3095_s25 + $0x200] sm:$0xff]  }
  0x1f   : > { %275 = vst [vmem:[%s3100_s26 + $0xf0] sm:$0xff] %v274_v30   ;;  %279 = vst [vmem:[%s3100_s26 + $0xf8] sm:$0xff] %v278_v31   ;;  %v286_v33 = vld [vmem:[%s3095_s25 + $0x208] sm:$0xff]   ;;  %v290_v34 = vld [vmem:[%s3095_s25 + $0x210] sm:$0xff]  }
  0x20   : > { %283 = vst [vmem:[%s3100_s26 + $0x100] sm:$0xff] %v282_v32   ;;  %v294_v35 = vld [vmem:[%s3095_s25 + $0x218] sm:$0xff]   ;;  %287 = vst [vmem:[%s3100_s26 + $0x108] sm:$0xff] %v286_v33   ;;  %v298_v36 = vld [vmem:[%s3095_s25 + $0x220] sm:$0xff]  }
  0x21   : > { %291 = vst [vmem:[%s3100_s26 + $0x110] sm:$0xff] %v290_v34   ;;  %295 = vst [vmem:[%s3100_s26 + $0x118] sm:$0xff] %v294_v35   ;;  %v302_v37 = vld [vmem:[%s3095_s25 + $0x228] sm:$0xff]   ;;  %v306_v38 = vld [vmem:[%s3095_s25 + $0x230] sm:$0xff]  }
  0x22   : > { %299 = vst [vmem:[%s3100_s26 + $0x120] sm:$0xff] %v298_v36   ;;  %303 = vst [vmem:[%s3100_s26 + $0x128] sm:$0xff] %v302_v37   ;;  %v310_v39 = vld [vmem:[%s3095_s25 + $0x238] sm:$0xff]   ;;  %v314_v40 = vld [vmem:[%s3095_s25 + $0x240] sm:$0xff]  }
  0x23   : > { %307 = vst [vmem:[%s3100_s26 + $0x130] sm:$0xff] %v306_v38   ;;  %v318_v41 = vld [vmem:[%s3095_s25 + $0x248] sm:$0xff]   ;;  %311 = vst [vmem:[%s3100_s26 + $0x138] sm:$0xff] %v310_v39   ;;  %v322_v42 = vld [vmem:[%s3095_s25 + $0x250] sm:$0xff]  }
  0x24   : > { %315 = vst [vmem:[%s3100_s26 + $0x140] sm:$0xff] %v314_v40   ;;  %319 = vst [vmem:[%s3100_s26 + $0x148] sm:$0xff] %v318_v41   ;;  %v326_v43 = vld [vmem:[%s3095_s25 + $0x258] sm:$0xff]   ;;  %v330_v44 = vld [vmem:[%s3095_s25 + $0x260] sm:$0xff]  }
  0x25   : > { %323 = vst [vmem:[%s3100_s26 + $0x150] sm:$0xff] %v322_v42   ;;  %327 = vst [vmem:[%s3100_s26 + $0x158] sm:$0xff] %v326_v43   ;;  %v334_v45 = vld [vmem:[%s3095_s25 + $0x268] sm:$0xff]   ;;  %v338_v46 = vld [vmem:[%s3095_s25 + $0x270] sm:$0xff]  }
  0x26   : > { %331 = vst [vmem:[%s3100_s26 + $0x160] sm:$0xff] %v330_v44   ;;  %v342_v47 = vld [vmem:[%s3095_s25 + $0x278] sm:$0xff]   ;;  %335 = vst [vmem:[%s3100_s26 + $0x168] sm:$0xff] %v334_v45   ;;  %v346_v48 = vld [vmem:[%s3095_s25 + $0x300] sm:$0xff]  }
  0x27   : > { %339 = vst [vmem:[%s3100_s26 + $0x170] sm:$0xff] %v338_v46   ;;  %343 = vst [vmem:[%s3100_s26 + $0x178] sm:$0xff] %v342_v47   ;;  %v350_v49 = vld [vmem:[%s3095_s25 + $0x308] sm:$0xff]   ;;  %v354_v50 = vld [vmem:[%s3095_s25 + $0x310] sm:$0xff]  }
  0x28   : > { %347 = vst [vmem:[%s3100_s26 + $0x180] sm:$0xff] %v346_v48   ;;  %351 = vst [vmem:[%s3100_s26 + $0x188] sm:$0xff] %v350_v49   ;;  %v358_v51 = vld [vmem:[%s3095_s25 + $0x318] sm:$0xff]   ;;  %v362_v52 = vld [vmem:[%s3095_s25 + $0x320] sm:$0xff]  }
  0x29   : > { %355 = vst [vmem:[%s3100_s26 + $0x190] sm:$0xff] %v354_v50   ;;  %v366_v53 = vld [vmem:[%s3095_s25 + $0x328] sm:$0xff]   ;;  %359 = vst [vmem:[%s3100_s26 + $0x198] sm:$0xff] %v358_v51   ;;  %v370_v54 = vld [vmem:[%s3095_s25 + $0x330] sm:$0xff]  }
  0x2a   : > { %363 = vst [vmem:[%s3100_s26 + $0x1a0] sm:$0xff] %v362_v52   ;;  %367 = vst [vmem:[%s3100_s26 + $0x1a8] sm:$0xff] %v366_v53   ;;  %v374_v55 = vld [vmem:[%s3095_s25 + $0x338] sm:$0xff]   ;;  %v378_v56 = vld [vmem:[%s3095_s25 + $0x340] sm:$0xff]  }
  0x2b   : > { %371 = vst [vmem:[%s3100_s26 + $0x1b0] sm:$0xff] %v370_v54   ;;  %375 = vst [vmem:[%s3100_s26 + $0x1b8] sm:$0xff] %v374_v55   ;;  %v382_v57 = vld [vmem:[%s3095_s25 + $0x348] sm:$0xff]   ;;  %v386_v58 = vld [vmem:[%s3095_s25 + $0x350] sm:$0xff]  }
  0x2c   : > { %379 = vst [vmem:[%s3100_s26 + $0x1c0] sm:$0xff] %v378_v56   ;;  %v390_v59 = vld [vmem:[%s3095_s25 + $0x358] sm:$0xff]   ;;  %383 = vst [vmem:[%s3100_s26 + $0x1c8] sm:$0xff] %v382_v57   ;;  %v394_v60 = vld [vmem:[%s3095_s25 + $0x360] sm:$0xff]  }
  0x2d   : > { %387 = vst [vmem:[%s3100_s26 + $0x1d0] sm:$0xff] %v386_v58   ;;  %391 = vst [vmem:[%s3100_s26 + $0x1d8] sm:$0xff] %v390_v59   ;;  %v398_v61 = vld [vmem:[%s3095_s25 + $0x368] sm:$0xff]   ;;  %v402_v62 = vld [vmem:[%s3095_s25 + $0x370] sm:$0xff]  }
  0x2e   : > { %395 = vst [vmem:[%s3100_s26 + $0x1e0] sm:$0xff] %v394_v60   ;;  %399 = vst [vmem:[%s3100_s26 + $0x1e8] sm:$0xff] %v398_v61   ;;  %v406_v63 = vld [vmem:[%s3095_s25 + $0x378] sm:$0xff]  }
  0x2f   : > { %403 = vst [vmem:[%s3100_s26 + $0x1f0] sm:$0xff] %v402_v62   ;;  %407 = vst [vmem:[%s3100_s26 + $0x1f8] sm:$0xff] %v406_v63  }
  0x30 PF: > { %p2425_p5 = scmp.ge.s32.totalorder %s3038_s14, 1  ;;  %p688_p6 = scmp.lt.s32.totalorder %s3038_s14, 3 }
  0x32   : > { %p689_p7 = pnand %p2425_p5, %p688_p6 }
  0x34   : > { %692 = sbr.rel (%p689_p7) target bundleno = 396 (0x18c), region = 69 }
  0x39   : > { %v2951_v0 = vld [vmem:[%s3674_s1] sm:$0x1f]   ;;  %vm894_vm0 = vcmask 1043456   ;;  %vm895_vm1 = vcmask 1044480   ;;  %s695_s29 = sand.u32 1, %s3030_s12   ;;  %v3040_v1 = vmov 65535  }
  0x3a   : > { %v896_v2 = vsel %vm894_vm0, 4294967295, %v3040_v1  ;;  %s2426_s30 = sshll.u32 %s695_s29, 9  ;;  %vm845_vm2 = vcmask 72704   ;;  %s2427_s5 = sshll.u32 %s2418_s15, 5  ;;  %vm2323_vm3 = vcmask 257024  }
  0x3b   : > { %v897_v3 = vsel %vm895_vm1, %v896_v2, 0  ;;  %s3233_s4 = scalar_lea.vmem [#allocation2], %s2426_s30  ;;  %p720_p8 = scmp.lt.s32.totalorder %s2427_s5, 63 }
  0x3c   : > { %v899_v4 = vand.u32 %v2951_v0, %v897_v3  ;;  %v2952_v5 = vld [vmem:[%s3233_s4] sm:$0xff]   ;;  %v2954_v7 = vld [vmem:[%s3233_s4 + $0x8] sm:$0xff]   ;;  %v2956_v9 = vld [vmem:[%s3233_s4 + $0x10] sm:$0xff]  }
  0x3d   : > { %v2953_v6 = vld [vmem:[%s3233_s4 + $0x80] sm:$0xff]   ;;  %v2955_v8 = vld [vmem:[%s3233_s4 + $0x88] sm:$0xff]   ;;  %2792 = vmatprep.mubr.msk.bf16.mxu0 %vm845_vm2, %v2952_v5  ;;  %v2957_v10 = vld [vmem:[%s3233_s4 + $0x90] sm:$0xff]   ;;  %s3715_s5 = smov (!%p720_p8, %s2427_s5), 63 }
  0x3e   : > { %2790 = vmatprep.subr.bf16.mxu0 %v899_v4  ;;  %2824 = vmatprep.subr.bf16.mxu1 %v899_v4  ;;  %v2958_v11 = vld [vmem:[%s3233_s4 + $0x18] sm:$0xff]   ;;  %v2960_v13 = vld [vmem:[%s3233_s4 + $0x20] sm:$0xff]   ;;  %v2962_v15 = vld [vmem:[%s3233_s4 + $0x28] sm:$0xff]   ;;  %s2428_s8 = sshll.u32 %s3715_s5, 2 }
  0x3f   : > { %2791 = vmatpush3.bf16.msra.mxu0 %v899_v4  ;;  %2825 = vmatpush3.bf16.msra.mxu1 %v899_v4  ;;  %v2959_v12 = vld [vmem:[%s3233_s4 + $0x98] sm:$0xff]   ;;  %v2961_v14 = vld [vmem:[%s3233_s4 + $0xa0] sm:$0xff]   ;;  %v2963_v16 = vld [vmem:[%s3233_s4 + $0xa8] sm:$0xff]   ;;  %s3515_s11 = scalar_lea.vmem %s3676_s3, %s2428_s8 }
  0x40   : > { %2826 = vmatprep.mubr.msk.bf16.mxu1 %vm845_vm2, %v2953_v6  ;;  %2858 = vmatprep.subr.bf16.mxu0 %v899_v4  ;;  %v2964_v17 = vld [vmem:[%s3233_s4 + $0x30] sm:$0xff]   ;;  %v2966_v19 = vld [vmem:[%s3233_s4 + $0x38] sm:$0xff]   ;;  %v2968_v21 = vld [vmem:[%s3233_s4 + $0x40] sm:$0xff]  }
  0x41   : > { %2892 = vmatprep.subr.bf16.mxu1 %v899_v4  ;;  %v2965_v18 = vld [vmem:[%s3233_s4 + $0xb0] sm:$0xff]   ;;  %v2967_v20 = vld [vmem:[%s3233_s4 + $0xb8] sm:$0xff]   ;;  %v2969_v22 = vld [vmem:[%s3233_s4 + $0xc0] sm:$0xff]  }
  0x42   : > { %2793 = vmatmul.mubr.msk.bf16.vlgmr.msra.gmra.mxu0 %vm845_vm2, %v2954_v7  ;;  %2827 = vmatmul.mubr.msk.bf16.vlgmr.msra.gmra.mxu1 %vm845_vm2, %v2955_v8  ;;  %v2970_v23 = vld [vmem:[%s3233_s4 + $0x48] sm:$0xff]   ;;  %v2972_v25 = vld [vmem:[%s3233_s4 + $0x50] sm:$0xff]   ;;  %v2974_v27 = vld [vmem:[%s3233_s4 + $0x58] sm:$0xff]  }
  0x43   : > { %2859 = vmatpush3.bf16.msra.mxu0 %v899_v4  ;;  %2893 = vmatpush3.bf16.msra.mxu1 %v899_v4  ;;  %v2971_v24 = vld [vmem:[%s3233_s4 + $0xc8] sm:$0xff]   ;;  %v2973_v26 = vld [vmem:[%s3233_s4 + $0xd0] sm:$0xff]   ;;  %v2975_v28 = vld [vmem:[%s3233_s4 + $0xd8] sm:$0xff]  }
  0x44   : > { %2796 = vmatprep.mubr.msk.bf16.mxu0 %vm845_vm2, %v2956_v9  ;;  %2830 = vmatprep.mubr.msk.bf16.mxu1 %vm845_vm2, %v2957_v10  ;;  %v2976_v29 = vld [vmem:[%s3233_s4 + $0x60] sm:$0xff]   ;;  %v2978_v31 = vld [vmem:[%s3233_s4 + $0x68] sm:$0xff]   ;;  %v2980_v33 = vld [vmem:[%s3233_s4 + $0x70] sm:$0xff]  }
  0x45   : > { %v2977_v30 = vld [vmem:[%s3233_s4 + $0xe0] sm:$0xff]   ;;  %v2979_v32 = vld [vmem:[%s3233_s4 + $0xe8] sm:$0xff]   ;;  %v2981_v34 = vld [vmem:[%s3233_s4 + $0xf0] sm:$0xff]  }
  0x46   : > { %v2982_v35 = vld [vmem:[%s3233_s4 + $0x78] sm:$0xff]   ;;  %v2984_v37 = vld [vmem:[%s3233_s4 + $0x100] sm:$0xff]   ;;  %v2986_v39 = vld [vmem:[%s3233_s4 + $0x108] sm:$0xff]  }
  0x47   : > { %v2983_v36 = vld [vmem:[%s3233_s4 + $0xf8] sm:$0xff]   ;;  %v2985_v38 = vld [vmem:[%s3233_s4 + $0x180] sm:$0xff]   ;;  %v2987_v40 = vld [vmem:[%s3233_s4 + $0x188] sm:$0xff]  }
  0x48   : > { %v2988_v41 = vld [vmem:[%s3233_s4 + $0x110] sm:$0xff]   ;;  %v2990_v43 = vld [vmem:[%s3233_s4 + $0x118] sm:$0xff]   ;;  %v2992_v45 = vld [vmem:[%s3233_s4 + $0x120] sm:$0xff]  }
  0x49   : > { %v2989_v42 = vld [vmem:[%s3233_s4 + $0x190] sm:$0xff]   ;;  %v2991_v44 = vld [vmem:[%s3233_s4 + $0x198] sm:$0xff]   ;;  %v2993_v46 = vld [vmem:[%s3233_s4 + $0x1a0] sm:$0xff]  }
  0x4a   : > { %2797 = vmatmul.mubr.msk.bf16.gmra.mxu0 %vm845_vm2, %v2958_v11  ;;  %2831 = vmatmul.mubr.msk.bf16.gmra.mxu1 %vm845_vm2, %v2959_v12  ;;  %v2994_v47 = vld [vmem:[%s3233_s4 + $0x128] sm:$0xff]   ;;  %v2996_v49 = vld [vmem:[%s3233_s4 + $0x130] sm:$0xff]   ;;  %v2998_v51 = vld [vmem:[%s3233_s4 + $0x138] sm:$0xff]  }
  0x4b   : > { %2800 = vmatprep.mubr.msk.bf16.mxu0 %vm845_vm2, %v2960_v13  ;;  %2834 = vmatprep.mubr.msk.bf16.mxu1 %vm845_vm2, %v2961_v14  ;;  %v2995_v48 = vld [vmem:[%s3233_s4 + $0x1a8] sm:$0xff]   ;;  %v2997_v50 = vld [vmem:[%s3233_s4 + $0x1b0] sm:$0xff]   ;;  %v2999_v52 = vld [vmem:[%s3233_s4 + $0x1b8] sm:$0xff]  }
  0x4c   : > { %v3000_v53 = vld [vmem:[%s3233_s4 + $0x140] sm:$0xff]   ;;  %v3002_v55 = vld [vmem:[%s3233_s4 + $0x148] sm:$0xff]   ;;  %v3004_v57 = vld [vmem:[%s3233_s4 + $0x150] sm:$0xff]  }
  0x4d   : > { %v3001_v54 = vld [vmem:[%s3233_s4 + $0x1c0] sm:$0xff]   ;;  %v3003_v56 = vld [vmem:[%s3233_s4 + $0x1c8] sm:$0xff]   ;;  %v3005_v58 = vld [vmem:[%s3233_s4 + $0x1d0] sm:$0xff]  }
  0x4e   : > { %v3006_v59 = vld [vmem:[%s3233_s4 + $0x158] sm:$0xff]   ;;  %v3008_v61 = vld [vmem:[%s3233_s4 + $0x160] sm:$0xff]   ;;  %v3010_v63 = vld [vmem:[%s3233_s4 + $0x168] sm:$0xff]  }
  0x4f   : > { %v3007_v60 = vld [vmem:[%s3233_s4 + $0x1d8] sm:$0xff]   ;;  %v3009_v62 = vld [vmem:[%s3233_s4 + $0x1e0] sm:$0xff]   ;;  %v3011_v0 = vld [vmem:[%s3233_s4 + $0x1e8] sm:$0xff]  }
  0x50   : > { %v3012_v1 = vld [vmem:[%s3233_s4 + $0x170] sm:$0xff]   ;;  %v3014_v3 = vld [vmem:[%s3233_s4 + $0x178] sm:$0xff]  }
  0x51   : > { %v3013_v2 = vld [vmem:[%s3233_s4 + $0x1f0] sm:$0xff]   ;;  %v3015_v4 = vld [vmem:[%s3233_s4 + $0x1f8] sm:$0xff]  }
  0x52   : > { %2801 = vmatmul.mubr.msk.bf16.gmra.mxu0 %vm845_vm2, %v2962_v15  ;;  %2835 = vmatmul.mubr.msk.bf16.gmra.mxu1 %vm845_vm2, %v2963_v16 }
  0x53   : > { %2804 = vmatprep.mubr.msk.bf16.mxu0 %vm845_vm2, %v2964_v17  ;;  %2838 = vmatprep.mubr.msk.bf16.mxu1 %vm845_vm2, %v2965_v18 }
  0x5a   : > { %2805 = vmatmul.mubr.msk.bf16.gmra.mxu0 %vm845_vm2, %v2966_v19  ;;  %2839 = vmatmul.mubr.msk.bf16.gmra.mxu1 %vm845_vm2, %v2967_v20 }
  0x5b   : > { %2808 = vmatprep.mubr.msk.bf16.mxu0 %vm845_vm2, %v2968_v21  ;;  %2842 = vmatprep.mubr.msk.bf16.mxu1 %vm845_vm2, %v2969_v22 }
  0x62   : > { %2809 = vmatmul.mubr.msk.bf16.gmra.mxu0 %vm845_vm2, %v2970_v23  ;;  %2843 = vmatmul.mubr.msk.bf16.gmra.mxu1 %vm845_vm2, %v2971_v24 }
  0x63   : > { %2812 = vmatprep.mubr.msk.bf16.mxu0 %vm845_vm2, %v2972_v25  ;;  %2846 = vmatprep.mubr.msk.bf16.mxu1 %vm845_vm2, %v2973_v26 }
  0x6a   : > { %2813 = vmatmul.mubr.msk.bf16.gmra.mxu0 %vm845_vm2, %v2974_v27  ;;  %2847 = vmatmul.mubr.msk.bf16.gmra.mxu1 %vm845_vm2, %v2975_v28 }
  0x6b   : > { %2816 = vmatprep.mubr.msk.bf16.mxu0 %vm845_vm2, %v2976_v29  ;;  %2850 = vmatprep.mubr.msk.bf16.mxu1 %vm845_vm2, %v2977_v30 }
  0x72   : > { %2817 = vmatmul.mubr.msk.bf16.gmra.mxu0 %vm845_vm2, %v2978_v31  ;;  %2851 = vmatmul.mubr.msk.bf16.gmra.mxu1 %vm845_vm2, %v2979_v32 }
  0x73   : > { %2820 = vmatprep.mubr.msk.bf16.mxu0 %vm845_vm2, %v2980_v33  ;;  %2854 = vmatprep.mubr.msk.bf16.mxu1 %vm845_vm2, %v2981_v34 }
  0x7a   : > { %2821 = vmatmul.mubr.msk.bf16.gmra.mxu0 %vm845_vm2, %v2982_v35  ;;  %2855 = vmatmul.mubr.msk.bf16.gmra.mxu1 %vm845_vm2, %v2983_v36 }
  0x7b   : > { %2860 = vmatprep.mubr.msk.bf16.mxu0 %vm845_vm2, %v2984_v37  ;;  %2894 = vmatprep.mubr.msk.bf16.mxu1 %vm845_vm2, %v2985_v38 }
  0x82   : > { %2861 = vmatmul.mubr.msk.bf16.vlgmr.msra.gmra.mxu0 %vm845_vm2, %v2986_v39  ;;  %2895 = vmatmul.mubr.msk.bf16.vlgmr.msra.gmra.mxu1 %vm845_vm2, %v2987_v40 }
  0x83   : > { %2864 = vmatprep.mubr.msk.bf16.mxu0 %vm845_vm2, %v2988_v41  ;;  %2898 = vmatprep.mubr.msk.bf16.mxu1 %vm845_vm2, %v2989_v42 }
  0x8a   : > { %2865 = vmatmul.mubr.msk.bf16.gmra.mxu0 %vm845_vm2, %v2990_v43  ;;  %2899 = vmatmul.mubr.msk.bf16.gmra.mxu1 %vm845_vm2, %v2991_v44 }
  0x8b   : > { %2868 = vmatprep.mubr.msk.bf16.mxu0 %vm845_vm2, %v2992_v45  ;;  %2902 = vmatprep.mubr.msk.bf16.mxu1 %vm845_vm2, %v2993_v46 }
  0x92   : > { %2869 = vmatmul.mubr.msk.bf16.gmra.mxu0 %vm845_vm2, %v2994_v47  ;;  %2903 = vmatmul.mubr.msk.bf16.gmra.mxu1 %vm845_vm2, %v2995_v48 }
  0x93   : > { %2872 = vmatprep.mubr.msk.bf16.mxu0 %vm845_vm2, %v2996_v49  ;;  %2906 = vmatprep.mubr.msk.bf16.mxu1 %vm845_vm2, %v2997_v50 }
  0x9a   : > { %2873 = vmatmul.mubr.msk.bf16.gmra.mxu0 %vm845_vm2, %v2998_v51  ;;  %2907 = vmatmul.mubr.msk.bf16.gmra.mxu1 %vm845_vm2, %v2999_v52 }
  0x9b   : > { %2876 = vmatprep.mubr.msk.bf16.mxu0 %vm845_vm2, %v3000_v53  ;;  %2910 = vmatprep.mubr.msk.bf16.mxu1 %vm845_vm2, %v3001_v54 }
  0xa2   : > { %2877 = vmatmul.mubr.msk.bf16.gmra.mxu0 %vm845_vm2, %v3002_v55  ;;  %2911 = vmatmul.mubr.msk.bf16.gmra.mxu1 %vm845_vm2, %v3003_v56 }
  0xa3   : > { %2880 = vmatprep.mubr.msk.bf16.mxu0 %vm845_vm2, %v3004_v57  ;;  %2914 = vmatprep.mubr.msk.bf16.mxu1 %vm845_vm2, %v3005_v58 }
  0xaa   : > { %2881 = vmatmul.mubr.msk.bf16.gmra.mxu0 %vm845_vm2, %v3006_v59  ;;  %2915 = vmatmul.mubr.msk.bf16.gmra.mxu1 %vm845_vm2, %v3007_v60 }
  0xab   : > { %2884 = vmatprep.mubr.msk.bf16.mxu0 %vm845_vm2, %v3008_v61  ;;  %2918 = vmatprep.mubr.msk.bf16.mxu1 %vm845_vm2, %v3009_v62 }
  0xb2   : > { %2885 = vmatmul.mubr.msk.bf16.gmra.mxu0 %vm845_vm2, %v3010_v63  ;;  %2919 = vmatmul.mubr.msk.bf16.gmra.mxu1 %vm845_vm2, %v3011_v0 }
  0xb3   : > { %2888 = vmatprep.mubr.msk.bf16.mxu0 %vm845_vm2, %v3012_v1  ;;  %2922 = vmatprep.mubr.msk.bf16.mxu1 %vm845_vm2, %v3013_v2 }
  0xba   : > { %2889 = vmatmul.mubr.msk.bf16.gmra.mxu0 %vm845_vm2, %v3014_v3  ;;  %2923 = vmatmul.mubr.msk.bf16.gmra.mxu1 %vm845_vm2, %v3015_v4 }
 0x102   : > { %v3363_v5 = vpop.f32.mrf.mxu0  ;;  %v3365_v6 = vpop.f32.mrf.mxu1 }
 0x104   : > { %v3367_v7 = vpop.f32.mrf.mxu0  ;;  %v3369_v8 = vpop.f32.mrf.mxu1 }
 0x106   : > { %v3371_v9 = vpop.f32.mrf.mxu0  ;;  %v3373_v10 = vpop.f32.mrf.mxu1 }
 0x108   : > { %v3375_v11 = vpop.f32.mrf.mxu0  ;;  %v3377_v12 = vpop.f32.mrf.mxu1 }
 0x10a   : > { %v3379_v13 = vpop.f32.mrf.mxu0  ;;  %v3381_v14 = vpop.f32.mrf.mxu1 }
 0x10c   : > { %v3383_v15 = vpop.f32.mrf.mxu0  ;;  %v3385_v16 = vpop.f32.mrf.mxu1 }
 0x10e   : > { %v3387_v17 = vpop.f32.mrf.mxu0  ;;  %v3389_v18 = vpop.f32.mrf.mxu1 }
 0x110   : > { %v3391_v19 = vpop.f32.mrf.mxu0  ;;  %v3393_v20 = vpop.f32.mrf.mxu1 }
 0x112   : > { %v3395_v21 = vpop.f32.mrf.mxu0  ;;  %v3397_v22 = vpop.f32.mrf.mxu1 }
 0x114   : > { %v3399_v23 = vpop.f32.mrf.mxu0  ;;  %v3401_v24 = vpop.f32.mrf.mxu1 }
 0x116   : > { %v3403_v25 = vpop.f32.mrf.mxu0  ;;  %v3405_v26 = vpop.f32.mrf.mxu1 }
 0x118   : > { %v3407_v27 = vpop.f32.mrf.mxu0  ;;  %v3409_v28 = vpop.f32.mrf.mxu1 }
 0x11a   : > { %v3411_v29 = vpop.f32.mrf.mxu0  ;;  %v3413_v30 = vpop.f32.mrf.mxu1 }
 0x11c   : > { %v3415_v31 = vpop.f32.mrf.mxu0  ;;  %v3417_v32 = vpop.f32.mrf.mxu1 }
 0x11e   : > { %v3419_v33 = vpop.f32.mrf.mxu0  ;;  %v3421_v34 = vpop.f32.mrf.mxu1 }
 0x120   : > { %v3423_v35 = vpop.f32.mrf.mxu0  ;;  %v3425_v36 = vpop.f32.mrf.mxu1 }
 0x122   : > { %v3427_v37 = vpop.f32.mrf.mxu0  ;;  %v3429_v38 = vpop.f32.mrf.mxu1 }
 0x124   : > { %v3431_v39 = vpop.f32.mrf.mxu0  ;;  %v3433_v40 = vpop.f32.mrf.mxu1 }
 0x126   : > { %v3435_v41 = vpop.f32.mrf.mxu0  ;;  %v3437_v42 = vpop.f32.mrf.mxu1 }
 0x128   : > { %v3439_v43 = vpop.f32.mrf.mxu0  ;;  %v3441_v44 = vpop.f32.mrf.mxu1 }
 0x12a   : > { %v3443_v45 = vpop.f32.mrf.mxu0  ;;  %v3445_v46 = vpop.f32.mrf.mxu1 }
 0x12c   : > { %v3447_v47 = vpop.f32.mrf.mxu0  ;;  %v3449_v48 = vpop.f32.mrf.mxu1 }
 0x12e   : > { %v3451_v49 = vpop.f32.mrf.mxu0  ;;  %v3453_v50 = vpop.f32.mrf.mxu1 }
 0x130   : > { %v3455_v51 = vpop.f32.mrf.mxu0  ;;  %v3457_v52 = vpop.f32.mrf.mxu1 }
 0x131   : > { %3677 = vst [vmem:[#allocation3_spill] sm:$0xff] %v3455_v51 }
 0x132   : > { %v3459_v53 = vpop.f32.mrf.mxu0  ;;  %v3461_v54 = vpop.f32.mrf.mxu1 }
 0x133   : > { %3678 = vst [vmem:[#allocation4_spill] sm:$0xff] %v3459_v53  ;;  %3679 = vst [vmem:[#allocation5_spill] sm:$0xff] %v3461_v54 }
 0x134   : > { %v3463_v55 = vpop.f32.mrf.mxu0  ;;  %v3465_v56 = vpop.f32.mrf.mxu1 }
 0x135   : > { %3680 = vst [vmem:[#allocation6_spill] sm:$0xff] %v3463_v55  ;;  %3681 = vst [vmem:[#allocation7_spill] sm:$0xff] %v3465_v56 }
 0x136   : > { %v3467_v57 = vpop.f32.mrf.mxu0  ;;  %v3469_v58 = vpop.f32.mrf.mxu1 }
 0x137   : > { %3682 = vst [vmem:[#allocation8_spill] sm:$0xff] %v3467_v57  ;;  %3683 = vst [vmem:[#allocation9_spill] sm:$0xff] %v3469_v58  ;;  %v1385_v58 = vmax.f32 %v3375_v11, %v3377_v12 }
 0x138   : > { %v3471_v59 = vpop.f32.mrf.mxu0  ;;  %v3473_v60 = vpop.f32.mrf.mxu1 }
 0x139   : > { %3684 = vst [vmem:[#allocation10_spill] sm:$0xff] %v3471_v59  ;;  %3685 = vst [vmem:[#allocation11_spill] sm:$0xff] %v3473_v60 }
 0x13a   : > { %v3475_v61 = vpop.f32.mrf.mxu0  ;;  %v3477_v62 = vpop.f32.mrf.mxu1 }
 0x13b   : > { %3686 = vst [vmem:[#allocation12_spill] sm:$0xff] %v3475_v61  ;;  %3687 = vst [vmem:[#allocation13_spill] sm:$0xff] %v3477_v62  ;;  %v1386_v61 = vmax.f32 %v3363_v5, %v3365_v6 }
 0x13c   : > { %v3479_v63 = vpop.f32.mrf.mxu0  ;;  %v3481_v0 = vpop.f32.mrf.mxu1 }
 0x13d   : > { %3688 = vst [vmem:[#allocation14_spill] sm:$0xff] %v3479_v63  ;;  %3689 = vst [vmem:[#allocation15_spill] sm:$0xff] %v3481_v0  ;;  %v1384_v63 = vmax.f32 %v3367_v7, %v3369_v8 }
 0x13e   : > { %v3485_v1 = vpop.f32.mrf.mxu0  ;;  %v3487_v2 = vpop.f32.mrf.mxu1 }
 0x13f   : > { %3690 = vst [vmem:[#allocation16_spill] sm:$0xff] %v3485_v1  ;;  %3691 = vst [vmem:[#allocation17_spill] sm:$0xff] %v3487_v2  ;;  %v3500_v1 = vld [vmem:[%s3675_s2] ss:$0 sm:$0xff] }
 0x140   : > { %v3489_v3 = vpop.f32.mrf.mxu0  ;;  %v3491_v4 = vpop.f32.mrf.mxu1 }
 0x141   : > { %3692 = vst [vmem:[#allocation18_spill] sm:$0xff] %v3489_v3  ;;  %3693 = vst [vmem:[#allocation19_spill] sm:$0xff] %v3491_v4  ;;  %v1387_v3 = vmax.f32 %v3371_v9, %v3373_v10  ;;  %v1390_v9 = vmax.f32 %v3379_v13, %v3381_v14  ;;  %v1388_v10 = vmax.f32 %v3383_v15, %v3385_v16 }
 0x142   : > { %v2862_v59 = vpop.f32.mrf.mxu0  ;;  %v2896_v62 = vpop.f32.mrf.mxu1  ;;  %v1391_v13 = vmax.f32 %v3387_v17, %v3389_v18 }
 0x143   : > { %v1740_v0 = vmax.f32 %v1386_v61, %v2862_v59 }
 0x144   : > { %v1611_v2 = vpop.f32.mrf.mxu0  ;;  %v1965_v60 = vpop.f32.mrf.mxu1 }
 0x145   : > { %v2094_v4 = vmax.f32 %v1740_v0, %v2896_v62  ;;  %v1738_v57 = vmax.f32 %v1384_v63, %v1611_v2 }
 0x146   : > { %v2863_v5 = vpop.f32.mrf.mxu0  ;;  %v2897_v6 = vpop.f32.mrf.mxu1 }
 0x147   : > { %v2133_v7 = vadd.f32 %v3500_v1, %v2094_v4  ;;  %v2092_v8 = vmax.f32 %v1738_v57, %v1965_v60  ;;  %v1741_v59 = vmax.f32 %v1387_v3, %v2863_v5  ;;  %v1394_v5 = vmax.f32 %v3395_v21, %v3397_v22 }
 0x148   : > { %v1614_v61 = vpop.f32.mrf.mxu0  ;;  %v1968_v55 = vpop.f32.mrf.mxu1 }
 0x149   : > { %v2165_v56 = vmax.f32 %v2133_v7, 0.0  ;;  %v2131_v53 = vadd.f32 %v3500_v1, %v2092_v8  ;;  %v2095_v54 = vmax.f32 %v1741_v59, %v2897_v6  ;;  %v1739_v51 = vmax.f32 %v1385_v58, %v1614_v61 }
 0x14a   : > { %v2866_v11 = vpop.f32.mrf.mxu0  ;;  %v2900_v12 = vpop.f32.mrf.mxu1 }
 0x14b   : > { %v2692_v57 = vpack.c.bf16 %v2165_v56, %v2165_v56  ;;  %v2163_v60 = vmax.f32 %v2131_v53, 0.0  ;;  %v2134_v58 = vadd.f32 %v3500_v1, %v2095_v54  ;;  %v2093_v62 = vmax.f32 %v1739_v51, %v1968_v55 }
 0x14c   : > { %v1744_v14 = vmax.f32 %v1390_v9, %v2866_v11  ;;  %v1627_v15 = vpop.f32.mrf.mxu0  ;;  %v1981_v16 = vpop.f32.mrf.mxu1  ;;  %v1389_v53 = vmax.f32 %v3391_v19, %v3393_v20 }
 0x14d   : > { %2326 = vst.msk [vmem:[%s3515_s11 + $0x8] sm:$0xf] %vm2323_vm3, %v2692_v57  ;;  %v2690_v63 = vpack.c.bf16 %v2163_v60, %v2163_v60  ;;  %v2166_v0 = vmax.f32 %v2134_v58, 0.0  ;;  %v2132_v2 = vadd.f32 %v3500_v1, %v2093_v62  ;;  %v1742_v3 = vmax.f32 %v1388_v10, %v1627_v15 }
 0x14e   : > { %v2098_v56 = vmax.f32 %v1744_v14, %v2900_v12  ;;  %v2867_v54 = vpop.f32.mrf.mxu0  ;;  %v2901_v51 = vpop.f32.mrf.mxu1  ;;  %v1392_v60 = vmax.f32 %v3399_v23, %v3401_v24  ;;  %v1395_v58 = vmax.f32 %v3403_v25, %v3405_v26 }
 0x14f   : > { %2324 = vst.msk [vmem:[%s3515_s11] sm:$0xf] %vm2323_vm3, %v2690_v63  ;;  %v2693_v17 = vpack.c.bf16 %v2166_v0, %v2166_v0  ;;  %v2164_v18 = vmax.f32 %v2132_v2, 0.0  ;;  %v2096_v55 = vmax.f32 %v1742_v3, %v1981_v16  ;;  %v1745_v4 = vmax.f32 %v1391_v13, %v2867_v54 }
 0x150   : > { %v2137_v6 = vadd.f32 %v3500_v1, %v2098_v56  ;;  %v1630_v7 = vpop.f32.mrf.mxu0  ;;  %v1984_v8 = vpop.f32.mrf.mxu1  ;;  %v1393_v2 = vmax.f32 %v3407_v27, %v3409_v28  ;;  %v1398_v54 = vmax.f32 %v3411_v29, %v3413_v30 }
 0x151   : > { %2327 = vst.msk [vmem:[%s3515_s11 + $0xc] sm:$0xf] %vm2323_vm3, %v2693_v17  ;;  %v2691_v19 = vpack.c.bf16 %v2164_v18, %v2164_v18  ;;  %v2135_v20 = vadd.f32 %v3500_v1, %v2096_v55  ;;  %v2099_v59 = vmax.f32 %v1745_v4, %v2901_v51  ;;  %v1743_v61 = vmax.f32 %v1389_v53, %v1630_v7 }
 0x152   : > { %v2169_v9 = vmax.f32 %v2137_v6, 0.0  ;;  %v2870_v10 = vpop.f32.mrf.mxu0  ;;  %v2904_v11 = vpop.f32.mrf.mxu1 }
 0x153   : > { %2325 = vst.msk [vmem:[%s3515_s11 + $0x4] sm:$0xf] %vm2323_vm3, %v2691_v19  ;;  %v2167_v12 = vmax.f32 %v2135_v20, 0.0  ;;  %v2138_v21 = vadd.f32 %v3500_v1, %v2099_v59  ;;  %v2097_v22 = vmax.f32 %v1743_v61, %v1984_v8  ;;  %v1748_v57 = vmax.f32 %v1394_v5, %v2870_v10 }
 0x154   : > { %v2696_v62 = vpack.c.bf16 %v2169_v9, %v2169_v9  ;;  %v1643_v13 = vpop.f32.mrf.mxu0  ;;  %v1997_v14 = vpop.f32.mrf.mxu1  ;;  %v1396_v5 = vmax.f32 %v3415_v31, %v3417_v32 }
 0x155   : > { %v2694_v15 = vpack.c.bf16 %v2167_v12, %v2167_v12  ;;  %v2170_v16 = vmax.f32 %v2138_v21, 0.0  ;;  %v2136_v63 = vadd.f32 %v3500_v1, %v2097_v22  ;;  %v2102_v0 = vmax.f32 %v1748_v57, %v2904_v11 }
 0x156   : > { %2330 = vst.msk [vmem:[%s3515_s11 + $0x18] sm:$0xf] %vm2323_vm3, %v2696_v62  ;;  %v1746_v3 = vmax.f32 %v1392_v60, %v1643_v13  ;;  %v2871_v53 = vpop.f32.mrf.mxu0  ;;  %v2905_v23 = vpop.f32.mrf.mxu1  ;;  %v1399_v12 = vmax.f32 %v3419_v33, %v3421_v34  ;;  %v1397_v21 = vmax.f32 %v3423_v35, %v3425_v36 }
 0x157   : > { %2328 = vst.msk [vmem:[%s3515_s11 + $0x10] sm:$0xf] %vm2323_vm3, %v2694_v15  ;;  %v2697_v24 = vpack.c.bf16 %v2170_v16, %v2170_v16  ;;  %v2168_v25 = vmax.f32 %v2136_v63, 0.0  ;;  %v2141_v26 = vadd.f32 %v3500_v1, %v2102_v0  ;;  %v1749_v56 = vmax.f32 %v1395_v58, %v2871_v53 }
 0x158   : > { %v2100_v51 = vmax.f32 %v1746_v3, %v1997_v14  ;;  %v1646_v17 = vpop.f32.mrf.mxu0  ;;  %v2000_v18 = vpop.f32.mrf.mxu1  ;;  %v1402_v15 = vmax.f32 %v3427_v37, %v3429_v38 }
 0x159   : > { %2331 = vst.msk [vmem:[%s3515_s11 + $0x1c] sm:$0xf] %vm2323_vm3, %v2697_v24  ;;  %v2695_v27 = vpack.c.bf16 %v2168_v25, %v2168_v25  ;;  %v2173_v28 = vmax.f32 %v2141_v26, 0.0  ;;  %v2103_v55 = vmax.f32 %v1749_v56, %v2905_v23  ;;  %v1747_v4 = vmax.f32 %v1393_v2, %v1646_v17 }
 0x15a   : > { %v2139_v6 = vadd.f32 %v3500_v1, %v2100_v51  ;;  %v2874_v7 = vpop.f32.mrf.mxu0  ;;  %v2908_v8 = vpop.f32.mrf.mxu1  ;;  %v1400_v2 = vmax.f32 %v3431_v39, %v3433_v40  ;;  %v1403_v26 = vmax.f32 %v3435_v41, %v3437_v42 }
 0x15b   : > { %2329 = vst.msk [vmem:[%s3515_s11 + $0x14] sm:$0xf] %vm2323_vm3, %v2695_v27  ;;  %v2700_v29 = vpack.c.bf16 %v2173_v28, %v2173_v28  ;;  %v2142_v30 = vadd.f32 %v3500_v1, %v2103_v55  ;;  %v2101_v19 = vmax.f32 %v1747_v4, %v2000_v18  ;;  %v1752_v20 = vmax.f32 %v1398_v54, %v2874_v7 }
 0x15c   : > { %v2171_v59 = vmax.f32 %v2139_v6, 0.0  ;;  %v1659_v61 = vpop.f32.mrf.mxu0  ;;  %v2013_v9 = vpop.f32.mrf.mxu1  ;;  %v1401_v6 = vmax.f32 %v3439_v43, %v3441_v44  ;;  %v1406_v7 = vmax.f32 %v3443_v45, %v3445_v46 }
 0x15d   : > { %2334 = vst.msk [vmem:[%s3515_s11 + $0x28] sm:$0xf] %vm2323_vm3, %v2700_v29  ;;  %v2174_v10 = vmax.f32 %v2142_v30, 0.0  ;;  %v2140_v31 = vadd.f32 %v3500_v1, %v2101_v19  ;;  %v2106_v32 = vmax.f32 %v1752_v20, %v2908_v8  ;;  %v1750_v11 = vmax.f32 %v1396_v5, %v1659_v61 }
 0x15e   : > { %v2698_v22 = vpack.c.bf16 %v2171_v59, %v2171_v59  ;;  %v2875_v57 = vpop.f32.mrf.mxu0  ;;  %v2909_v60 = vpop.f32.mrf.mxu1 }
 0x15f   : > { %v2701_v58 = vpack.c.bf16 %v2174_v10, %v2174_v10  ;;  %v2172_v62 = vmax.f32 %v2140_v31, 0.0  ;;  %v2145_v13 = vadd.f32 %v3500_v1, %v2106_v32  ;;  %v2104_v14 = vmax.f32 %v1750_v11, %v2013_v9 }
 0x160   : > { %2332 = vst.msk [vmem:[%s3515_s11 + $0x20] sm:$0xf] %vm2323_vm3, %v2698_v22  ;;  %v1753_v16 = vmax.f32 %v1399_v12, %v2875_v57  ;;  %v1662_v63 = vpop.f32.mrf.mxu0  ;;  %v2016_v33 = vpop.f32.mrf.mxu1  ;;  %v1404_v9 = vmax.f32 %v3447_v47, %v3449_v48  ;;  %v1407_v11 = vmax.f32 %v3451_v49, %v3453_v50 }
 0x161   : > { %2335 = vst.msk [vmem:[%s3515_s11 + $0x2c] sm:$0xf] %vm2323_vm3, %v2701_v58  ;;  %v2699_v34 = vpack.c.bf16 %v2172_v62, %v2172_v62  ;;  %v2177_v35 = vmax.f32 %v2145_v13, 0.0  ;;  %v2143_v36 = vadd.f32 %v3500_v1, %v2104_v14  ;;  %v1751_v0 = vmax.f32 %v1397_v21, %v1662_v63  ;;  %v3694_v58 = vld [vmem:[#allocation3_spill] sm:$0xff] }
 0x162   : > { %v2107_v3 = vmax.f32 %v1753_v16, %v2909_v60  ;;  %v2878_v53 = vpop.f32.mrf.mxu0  ;;  %v2912_v23 = vpop.f32.mrf.mxu1  ;;  %v1405_v62 = vmax.f32 %v3694_v58, %v3457_v52 }
 0x163   : > { %2333 = vst.msk [vmem:[%s3515_s11 + $0x24] sm:$0xf] %vm2323_vm3, %v2699_v34  ;;  %v2704_v37 = vpack.c.bf16 %v2177_v35, %v2177_v35  ;;  %v2175_v38 = vmax.f32 %v2143_v36, 0.0  ;;  %v2105_v24 = vmax.f32 %v1751_v0, %v2016_v33  ;;  %v1756_v25 = vmax.f32 %v1402_v15, %v2878_v53  ;;  %v3696_v53 = vld [vmem:[#allocation4_spill] sm:$0xff] }
 0x164   : > { %v2146_v56 = vadd.f32 %v3500_v1, %v2107_v3  ;;  %v1675_v54 = vpop.f32.mrf.mxu0  ;;  %v2029_v51 = vpop.f32.mrf.mxu1  ;;  %v3695_v3 = vld [vmem:[#allocation5_spill] sm:$0xff] }
 0x165   : > { %2338 = vst.msk [vmem:[%s3515_s11 + $0x38] sm:$0xf] %vm2323_vm3, %v2704_v37  ;;  %v2702_v39 = vpack.c.bf16 %v2175_v38, %v2175_v38  ;;  %v2144_v40 = vadd.f32 %v3500_v1, %v2105_v24  ;;  %v2110_v17 = vmax.f32 %v1756_v25, %v2912_v23  ;;  %v1754_v18 = vmax.f32 %v1400_v2, %v1675_v54  ;;  %v3697_v37 = vld [vmem:[#allocation7_spill] sm:$0xff]  ;;  %v3698_v38 = vld [vmem:[#allocation6_spill] sm:$0xff] }
 0x166   : > { %v2178_v27 = vmax.f32 %v2146_v56, 0.0  ;;  %v2879_v28 = vpop.f32.mrf.mxu0  ;;  %v2913_v55 = vpop.f32.mrf.mxu1  ;;  %v1410_v23 = vmax.f32 %v3696_v53, %v3695_v3  ;;  %v1408_v24 = vmax.f32 %v3698_v38, %v3697_v37  ;;  %v3709_v3 = vld [vmem:[#allocation19_spill] sm:$0xff]  ;;  %v3710_v53 = vld [vmem:[#allocation18_spill] sm:$0xff] }
 0x167   : > { %2336 = vst.msk [vmem:[%s3515_s11 + $0x30] sm:$0xf] %vm2323_vm3, %v2702_v39  ;;  %v2176_v4 = vmax.f32 %v2144_v40, 0.0  ;;  %v2149_v41 = vadd.f32 %v3500_v1, %v2110_v17  ;;  %v2108_v42 = vmax.f32 %v1754_v18, %v2029_v51  ;;  %v1757_v5 = vmax.f32 %v1403_v26, %v2879_v28  ;;  %v3699_v17 = vld [vmem:[#allocation9_spill] sm:$0xff]  ;;  %v3700_v18 = vld [vmem:[#allocation8_spill] sm:$0xff] }
 0x168   : > { %v2705_v8 = vpack.c.bf16 %v2178_v27, %v2178_v27  ;;  %v1678_v29 = vpop.f32.mrf.mxu0  ;;  %v2032_v30 = vpop.f32.mrf.mxu1  ;;  %v1411_v27 = vmax.f32 %v3700_v18, %v3699_v17 }
 0x169   : > { %v2703_v19 = vpack.c.bf16 %v2176_v4, %v2176_v4  ;;  %v2181_v20 = vmax.f32 %v2149_v41, 0.0  ;;  %v2147_v59 = vadd.f32 %v3500_v1, %v2108_v42  ;;  %v2111_v61 = vmax.f32 %v1757_v5, %v2913_v55 }
 0x16a   : > { %2339 = vst.msk [vmem:[%s3515_s11 + $0x3c] sm:$0xf] %vm2323_vm3, %v2705_v8  ;;  %v1755_v10 = vmax.f32 %v1401_v6, %v1678_v29  ;;  %v2882_v31 = vpop.f32.mrf.mxu0  ;;  %v2916_v43 = vpop.f32.mrf.mxu1  ;;  %v3702_v8 = vld [vmem:[#allocation10_spill] sm:$0xff] }
 0x16b   : > { %2337 = vst.msk [vmem:[%s3515_s11 + $0x34] sm:$0xf] %vm2323_vm3, %v2703_v19  ;;  %v2708_v44 = vpack.c.bf16 %v2181_v20, %v2181_v20  ;;  %v2179_v45 = vmax.f32 %v2147_v59, 0.0  ;;  %v2150_v46 = vadd.f32 %v3500_v1, %v2111_v61  ;;  %v1760_v32 = vmax.f32 %v1406_v7, %v2882_v31  ;;  %v3701_v7 = vld [vmem:[#allocation11_spill] sm:$0xff]  ;;  %v3703_v31 = vld [vmem:[#allocation13_spill] sm:$0xff] }
 0x16c   : > { %v2109_v12 = vmax.f32 %v1755_v10, %v2032_v30  ;;  %v1691_v21 = vpop.f32.mrf.mxu0  ;;  %v2045_v22 = vpop.f32.mrf.mxu1  ;;  %v1409_v29 = vmax.f32 %v3702_v8, %v3701_v7 }
 0x16d   : > { %2342 = vst.msk [vmem:[%s3515_s11 + $0x48] sm:$0xf] %vm2323_vm3, %v2708_v44  ;;  %v2706_v47 = vpack.c.bf16 %v2179_v45, %v2179_v45  ;;  %v2182_v48 = vmax.f32 %v2150_v46, 0.0  ;;  %v2114_v57 = vmax.f32 %v1760_v32, %v2916_v43  ;;  %v1758_v60 = vmax.f32 %v1404_v9, %v1691_v21  ;;  %v3704_v43 = vld [vmem:[#allocation12_spill] sm:$0xff] }
 0x16e   : > { %v2148_v13 = vadd.f32 %v3500_v1, %v2109_v12  ;;  %v2883_v14 = vpop.f32.mrf.mxu0  ;;  %v2917_v15 = vpop.f32.mrf.mxu1  ;;  %v1414_v44 = vmax.f32 %v3704_v43, %v3703_v31 }
 0x16f   : > { %2340 = vst.msk [vmem:[%s3515_s11 + $0x40] sm:$0xf] %vm2323_vm3, %v2706_v47  ;;  %v2709_v49 = vpack.c.bf16 %v2182_v48, %v2182_v48  ;;  %v2153_v50 = vadd.f32 %v3500_v1, %v2114_v57  ;;  %v2112_v16 = vmax.f32 %v1758_v60, %v2045_v22  ;;  %v1761_v63 = vmax.f32 %v1407_v11, %v2883_v14  ;;  %v3705_v14 = vld [vmem:[#allocation15_spill] sm:$0xff] }
 0x170   : > { %v2180_v33 = vmax.f32 %v2148_v13, 0.0  ;;  %v1694_v34 = vpop.f32.mrf.mxu0  ;;  %v2048_v35 = vpop.f32.mrf.mxu1 }
 0x171   : > { %2343 = vst.msk [vmem:[%s3515_s11 + $0x4c] sm:$0xf] %vm2323_vm3, %v2709_v49  ;;  %v2185_v36 = vmax.f32 %v2153_v50, 0.0  ;;  %v2151_v52 = vadd.f32 %v3500_v1, %v2112_v16  ;;  %v2115_v0 = vmax.f32 %v1761_v63, %v2917_v15  ;;  %v1759_v2 = vmax.f32 %v1405_v62, %v1694_v34  ;;  %v3706_v15 = vld [vmem:[#allocation14_spill] sm:$0xff]  ;;  %v3707_v50 = vld [vmem:[#allocation17_spill] sm:$0xff]  ;;  %v3708_v16 = vld [vmem:[#allocation16_spill] sm:$0xff] }
 0x172   : > { %v2707_v25 = vpack.c.bf16 %v2180_v33, %v2180_v33  ;;  %v2886_v26 = vpop.f32.mrf.mxu0  ;;  %v2920_v56 = vpop.f32.mrf.mxu1  ;;  %v1412_v49 = vmax.f32 %v3706_v15, %v3705_v14  ;;  %v1415_v63 = vmax.f32 %v3708_v16, %v3707_v50 }
 0x173   : > { %v2712_v54 = vpack.c.bf16 %v2185_v36, %v2185_v36  ;;  %v2183_v51 = vmax.f32 %v2151_v52, 0.0  ;;  %v2154_v39 = vadd.f32 %v3500_v1, %v2115_v0  ;;  %v2113_v40 = vmax.f32 %v1759_v2, %v2048_v35 }
 0x174   : > { %2341 = vst.msk [vmem:[%s3515_s11 + $0x44] sm:$0xf] %vm2323_vm3, %v2707_v25  ;;  %v1764_v28 = vmax.f32 %v1410_v23, %v2886_v26  ;;  %v1707_v55 = vpop.f32.mrf.mxu0  ;;  %v2061_v4 = vpop.f32.mrf.mxu1  ;;  %v1413_v23 = vmax.f32 %v3710_v53, %v3709_v3 }
 0x175   : > { %2346 = vst.msk [vmem:[%s3515_s11 + $0x58] sm:$0xf] %vm2323_vm3, %v2712_v54  ;;  %v2710_v41 = vpack.c.bf16 %v2183_v51, %v2183_v51  ;;  %v2186_v42 = vmax.f32 %v2154_v39, 0.0  ;;  %v2152_v5 = vadd.f32 %v3500_v1, %v2113_v40  ;;  %v1762_v6 = vmax.f32 %v1408_v24, %v1707_v55 }
 0x176   : > { %v2118_v30 = vmax.f32 %v1764_v28, %v2920_v56  ;;  %v2887_v19 = vpop.f32.mrf.mxu0  ;;  %v2921_v20 = vpop.f32.mrf.mxu1 }
 0x177   : > { %2344 = vst.msk [vmem:[%s3515_s11 + $0x50] sm:$0xf] %vm2323_vm3, %v2710_v41  ;;  %v2713_v59 = vpack.c.bf16 %v2186_v42, %v2186_v42  ;;  %v2184_v61 = vmax.f32 %v2152_v5, 0.0  ;;  %v2116_v9 = vmax.f32 %v1762_v6, %v2061_v4  ;;  %v1765_v10 = vmax.f32 %v1411_v27, %v2887_v19 }
 0x178   : > { %v2157_v45 = vadd.f32 %v3500_v1, %v2118_v30  ;;  %v1710_v46 = vpop.f32.mrf.mxu0  ;;  %v2064_v32 = vpop.f32.mrf.mxu1 }
 0x179   : > { %2347 = vst.msk [vmem:[%s3515_s11 + $0x5c] sm:$0xf] %vm2323_vm3, %v2713_v59  ;;  %v2711_v11 = vpack.c.bf16 %v2184_v61, %v2184_v61  ;;  %v2155_v12 = vadd.f32 %v3500_v1, %v2116_v9  ;;  %v2119_v21 = vmax.f32 %v1765_v10, %v2921_v20  ;;  %v1763_v22 = vmax.f32 %v1409_v29, %v1710_v46 }
 0x17a   : > { %v2189_v47 = vmax.f32 %v2157_v45, 0.0  ;;  %v2890_v48 = vpop.f32.mrf.mxu0  ;;  %v2924_v57 = vpop.f32.mrf.mxu1 }
 0x17b   : > { %2345 = vst.msk [vmem:[%s3515_s11 + $0x54] sm:$0xf] %vm2323_vm3, %v2711_v11  ;;  %v2187_v60 = vmax.f32 %v2155_v12, 0.0  ;;  %v2158_v58 = vadd.f32 %v3500_v1, %v2119_v21  ;;  %v2117_v62 = vmax.f32 %v1763_v22, %v2064_v32  ;;  %v1768_v13 = vmax.f32 %v1414_v44, %v2890_v48 }
 0x17c   : > { %v2716_v33 = vpack.c.bf16 %v2189_v47, %v2189_v47  ;;  %v1723_v34 = vpop.f32.mrf.mxu0  ;;  %v2077_v35 = vpop.f32.mrf.mxu1 }
 0x17d   : > { %v2714_v36 = vpack.c.bf16 %v2187_v60, %v2187_v60  ;;  %v2190_v52 = vmax.f32 %v2158_v58, 0.0  ;;  %v2156_v0 = vadd.f32 %v3500_v1, %v2117_v62  ;;  %v2122_v2 = vmax.f32 %v1768_v13, %v2924_v57 }
 0x17e   : > { %2350 = vst.msk [vmem:[%s3515_s11 + $0x68] sm:$0xf] %vm2323_vm3, %v2716_v33  ;;  %v1766_v37 = vmax.f32 %v1412_v49, %v1723_v34  ;;  %v2891_v38 = vpop.f32.mrf.mxu0  ;;  %v2925_v24 = vpop.f32.mrf.mxu1 }
 0x17f   : > { %2348 = vst.msk [vmem:[%s3515_s11 + $0x60] sm:$0xf] %vm2323_vm3, %v2714_v36  ;;  %v2717_v25 = vpack.c.bf16 %v2190_v52, %v2190_v52  ;;  %v2188_v26 = vmax.f32 %v2156_v0, 0.0  ;;  %v2161_v56 = vadd.f32 %v3500_v1, %v2122_v2  ;;  %v1769_v54 = vmax.f32 %v1415_v63, %v2891_v38 }
 0x180   : > { %v2120_v51 = vmax.f32 %v1766_v37, %v2077_v35  ;;  %v1726_v39 = vpop.f32.mrf.mxu0  ;;  %v2080_v55 = vpop.f32.mrf.mxu1 }
 0x181   : > { %2351 = vst.msk [vmem:[%s3515_s11 + $0x6c] sm:$0xf] %vm2323_vm3, %v2717_v25  ;;  %v2715_v40 = vpack.c.bf16 %v2188_v26, %v2188_v26  ;;  %v2193_v17 = vmax.f32 %v2161_v56, 0.0  ;;  %v2123_v18 = vmax.f32 %v1769_v54, %v2925_v24  ;;  %v1767_v27 = vmax.f32 %v1413_v23, %v1726_v39 }
 0x182   : > { %v2159_v28 = vadd.f32 %v3500_v1, %v2120_v51 }
 0x183   : > { %2349 = vst.msk [vmem:[%s3515_s11 + $0x64] sm:$0xf] %vm2323_vm3, %v2715_v40  ;;  %v2720_v4 = vpack.c.bf16 %v2193_v17, %v2193_v17  ;;  %v2162_v41 = vadd.f32 %v3500_v1, %v2123_v18  ;;  %v2121_v42 = vmax.f32 %v1767_v27, %v2080_v55 }
 0x184   : > { %v2191_v5 = vmax.f32 %v2159_v28, 0.0 }
 0x185   : > { %2354 = vst.msk [vmem:[%s3515_s11 + $0x78] sm:$0xf] %vm2323_vm3, %v2720_v4  ;;  %v2194_v6 = vmax.f32 %v2162_v41, 0.0  ;;  %v2160_v7 = vadd.f32 %v3500_v1, %v2121_v42 }
 0x186   : > { %v2718_v8 = vpack.c.bf16 %v2191_v5, %v2191_v5 }
 0x187   : > { %v2721_v29 = vpack.c.bf16 %v2194_v6, %v2194_v6  ;;  %v2192_v30 = vmax.f32 %v2160_v7, 0.0 }
 0x188   : > { %2352 = vst.msk [vmem:[%s3515_s11 + $0x70] sm:$0xf] %vm2323_vm3, %v2718_v8 }
 0x189   : > { %2355 = vst.msk [vmem:[%s3515_s11 + $0x7c] sm:$0xf] %vm2323_vm3, %v2721_v29  ;;  %v2719_v19 = vpack.c.bf16 %v2192_v30, %v2192_v30 }
 0x18b   : > { %2353 = vst.msk [vmem:[%s3515_s11 + $0x74] sm:$0xf] %vm2323_vm3, %v2719_v19 }
 0x18c PF: > { %p10_p9 = scmp.ge.s32.totalorder %s3078_s16, 4   ;;  %s3711_s12 = smov %s3034_s13 }
 0x18d   : > { %s3712_s13 = smov %s3087_s19  ;;  %s3713_s14 = smov %s3078_s16 }
 0x18e   :  { %12 = sbr.rel (!%p10_p9) target bundleno = 2 (0x2), region = 111 }

// kernel: traffic_sign_cnn_forward.5
= control target key start
LH: loop header
LB: loop body
LE: loop exit
PB: predicated region body
PF: predicated region fallthrough
CT: control target
= control target key end

     0   :  { %s2113_s12 = smov 0   ;;  %s2115_s13 = smov 0   ;;  %s2690_s0 = inlined_call_operand.vmem [shape: bf16[4,128,288], index: 0, kind: input, shape index: {}]   ;;  %s2691_s1 = inlined_call_operand.vmem [shape: bf16[288,64], index: 1, kind: input, shape index: {}]   ;;  %s2692_s2 = inlined_call_operand.vmem [shape: f32[1,64], index: 2, kind: input, shape index: {}]   ;;  %s2693_s3 = inlined_call_operand.vmem [shape: bf16[128,64], index: 3, kind: output, shape index: {}]  }
   0x1   :  { %s2117_s14 = smov 0  }
   0x2 LB: > { %s1505_s15 = sadd.s32 4294967295, %s2091_s14   ;;  %s2130_s16 = sadd.s32 1, %s2091_s14   ;;  %s2091_s14 = sphi %s2117_s14, %s2703_s14   ;;  %s2087_s13 = sphi %s2115_s13, %s2702_s13   ;;  %s2083_s12 = sphi %s2113_s12, %s2701_s12  }
   0x3   : > { %s17_s17 = ssub.s32 %s2091_s14, %s2130_s16  ;;  %s20_s18 = sadd.s32 1, %s2087_s13 }
   0x4   : > { %p18_p0 = scmp.eq.s32.totalorder %s17_s17, 0  ;;  %p27_p1 = scmp.ne.s32.totalorder %s2087_s13, %s2083_s12 }
   0x5   : > { %p28_p2 = scmp.eq.s32.totalorder %s2091_s14, 0  ;;  %p1508_p4 = scmp.ge.s32.totalorder %s2091_s14, 2 }
   0x6   : > { %s2139_s19 = scalar_select %p18_p0, %s2087_s13, %s20_s18  }
   0x7   : > { %p29_p3 = por %p28_p2, %p27_p1  ;;  %127 = sbr.rel (%p1508_p4) target bundleno = 54 (0x36), region = 24 }
   0xc   : > { %130 = sbr.rel (!%p29_p3) target bundleno = 54 (0x36), region = 28  ;;  %s132_s20 = sand.u32 (%p29_p3), 1, %s2087_s13  }
   0xd   : > { %s1961_s21 = smul.u32 (%p29_p3), 96, %s2091_s14 }
   0xe   : > { %s1960_s22 = smul.u32 (%p29_p3), 384, %s132_s20 }
   0xf   : > { %s2147_s25 = scalar_lea.vmem (%p29_p3), %s2690_s0, %s1961_s21 }
  0x10   : > { %v153_v0 = vld [vmem:[%s2147_s25] sm:$0xff] (%p29_p3)  ;;  %v155_v1 = vld [vmem:[%s2147_s25 + $0xc] sm:$0xff] (%p29_p3)  ;;  %v157_v2 = vld [vmem:[%s2147_s25 + $0x18] sm:$0xff] (%p29_p3)  ;;  %s2152_s26 = scalar_lea.vmem (%p29_p3), [#allocation2], %s1960_s22 }
  0x11   : > { %154 = vst [vmem:[%s2152_s26] sm:$0xff] %v153_v0  ;;  %156 = vst [vmem:[%s2152_s26 + $0xc] sm:$0xff] %v155_v1  ;;  %v159_v3 = vld [vmem:[%s2147_s25 + $0x24] sm:$0xff]  ;;  %v161_v4 = vld [vmem:[%s2147_s25 + $0x30] sm:$0xff] }
  0x12   : > { %158 = vst [vmem:[%s2152_s26 + $0x18] sm:$0xff] %v157_v2  ;;  %v163_v5 = vld [vmem:[%s2147_s25 + $0x3c] sm:$0xff]  ;;  %160 = vst [vmem:[%s2152_s26 + $0x24] sm:$0xff] %v159_v3  ;;  %v165_v6 = vld [vmem:[%s2147_s25 + $0x48] sm:$0xff] }
  0x13   : > { %162 = vst [vmem:[%s2152_s26 + $0x30] sm:$0xff] %v161_v4  ;;  %164 = vst [vmem:[%s2152_s26 + $0x3c] sm:$0xff] %v163_v5  ;;  %v167_v7 = vld [vmem:[%s2147_s25 + $0x54] sm:$0xff]  ;;  %v169_v8 = vld [vmem:[%s2147_s25 + $0xc0] sm:$0xff] }
  0x14   : > { %166 = vst [vmem:[%s2152_s26 + $0x48] sm:$0xff] %v165_v6  ;;  %168 = vst [vmem:[%s2152_s26 + $0x54] sm:$0xff] %v167_v7  ;;  %v171_v9 = vld [vmem:[%s2147_s25 + $0xcc] sm:$0xff]  ;;  %v173_v10 = vld [vmem:[%s2147_s25 + $0xd8] sm:$0xff] }
  0x15   : > { %170 = vst [vmem:[%s2152_s26 + $0x60] sm:$0xff] %v169_v8  ;;  %v175_v11 = vld [vmem:[%s2147_s25 + $0xe4] sm:$0xff]  ;;  %172 = vst [vmem:[%s2152_s26 + $0x6c] sm:$0xff] %v171_v9  ;;  %v177_v12 = vld [vmem:[%s2147_s25 + $0xf0] sm:$0xff] }
  0x16   : > { %174 = vst [vmem:[%s2152_s26 + $0x78] sm:$0xff] %v173_v10  ;;  %176 = vst [vmem:[%s2152_s26 + $0x84] sm:$0xff] %v175_v11  ;;  %v179_v13 = vld [vmem:[%s2147_s25 + $0xfc] sm:$0xff]  ;;  %v181_v14 = vld [vmem:[%s2147_s25 + $0x108] sm:$0xff] }
  0x17   : > { %178 = vst [vmem:[%s2152_s26 + $0x90] sm:$0xff] %v177_v12  ;;  %180 = vst [vmem:[%s2152_s26 + $0x9c] sm:$0xff] %v179_v13  ;;  %v183_v15 = vld [vmem:[%s2147_s25 + $0x114] sm:$0xff]  ;;  %v185_v16 = vld [vmem:[%s2147_s25 + $0x180] sm:$0xff] }
  0x18   : > { %182 = vst [vmem:[%s2152_s26 + $0xa8] sm:$0xff] %v181_v14  ;;  %v187_v17 = vld [vmem:[%s2147_s25 + $0x18c] sm:$0xff]  ;;  %184 = vst [vmem:[%s2152_s26 + $0xb4] sm:$0xff] %v183_v15  ;;  %v189_v18 = vld [vmem:[%s2147_s25 + $0x198] sm:$0xff] }
  0x19   : > { %186 = vst [vmem:[%s2152_s26 + $0xc0] sm:$0xff] %v185_v16  ;;  %188 = vst [vmem:[%s2152_s26 + $0xcc] sm:$0xff] %v187_v17  ;;  %v191_v19 = vld [vmem:[%s2147_s25 + $0x1a4] sm:$0xff]  ;;  %v193_v20 = vld [vmem:[%s2147_s25 + $0x1b0] sm:$0xff] }
  0x1a   : > { %190 = vst [vmem:[%s2152_s26 + $0xd8] sm:$0xff] %v189_v18  ;;  %192 = vst [vmem:[%s2152_s26 + $0xe4] sm:$0xff] %v191_v19  ;;  %v195_v21 = vld [vmem:[%s2147_s25 + $0x1bc] sm:$0xff]  ;;  %v197_v22 = vld [vmem:[%s2147_s25 + $0x1c8] sm:$0xff] }
  0x1b   : > { %194 = vst [vmem:[%s2152_s26 + $0xf0] sm:$0xff] %v193_v20  ;;  %v199_v23 = vld [vmem:[%s2147_s25 + $0x1d4] sm:$0xff]  ;;  %196 = vst [vmem:[%s2152_s26 + $0xfc] sm:$0xff] %v195_v21  ;;  %v201_v24 = vld [vmem:[%s2147_s25 + $0x240] sm:$0xff] }
  0x1c   : > { %198 = vst [vmem:[%s2152_s26 + $0x108] sm:$0xff] %v197_v22  ;;  %200 = vst [vmem:[%s2152_s26 + $0x114] sm:$0xff] %v199_v23  ;;  %v203_v25 = vld [vmem:[%s2147_s25 + $0x24c] sm:$0xff]  ;;  %v205_v26 = vld [vmem:[%s2147_s25 + $0x258] sm:$0xff] }
  0x1d   : > { %202 = vst [vmem:[%s2152_s26 + $0x120] sm:$0xff] %v201_v24  ;;  %204 = vst [vmem:[%s2152_s26 + $0x12c] sm:$0xff] %v203_v25  ;;  %v207_v27 = vld [vmem:[%s2147_s25 + $0x264] sm:$0xff]  ;;  %v209_v28 = vld [vmem:[%s2147_s25 + $0x270] sm:$0xff] }
  0x1e   : > { %206 = vst [vmem:[%s2152_s26 + $0x138] sm:$0xff] %v205_v26  ;;  %v211_v29 = vld [vmem:[%s2147_s25 + $0x27c] sm:$0xff]  ;;  %208 = vst [vmem:[%s2152_s26 + $0x144] sm:$0xff] %v207_v27  ;;  %v213_v30 = vld [vmem:[%s2147_s25 + $0x288] sm:$0xff] }
  0x1f   : > { %210 = vst [vmem:[%s2152_s26 + $0x150] sm:$0xff] %v209_v28  ;;  %212 = vst [vmem:[%s2152_s26 + $0x15c] sm:$0xff] %v211_v29  ;;  %v215_v31 = vld [vmem:[%s2147_s25 + $0x294] sm:$0xff]  ;;  %v1512_v32 = vld [vmem:[%s2147_s25 + $0x8] sm:$0xf] }
  0x20   : > { %214 = vst [vmem:[%s2152_s26 + $0x168] sm:$0xff] %v213_v30  ;;  %216 = vst [vmem:[%s2152_s26 + $0x174] sm:$0xff] %v215_v31  ;;  %v1514_v33 = vld [vmem:[%s2147_s25 + $0x14] sm:$0xf]  ;;  %v1516_v34 = vld [vmem:[%s2147_s25 + $0x20] sm:$0xf] }
  0x21   : > { %1513 = vst [vmem:[%s2152_s26 + $0x8] sm:$0xf] %v1512_v32  ;;  %v1518_v35 = vld [vmem:[%s2147_s25 + $0x2c] sm:$0xf]  ;;  %1515 = vst [vmem:[%s2152_s26 + $0x14] sm:$0xf] %v1514_v33 }
  0x22   : > { %1517 = vst [vmem:[%s2152_s26 + $0x20] sm:$0xf] %v1516_v34  ;;  %1519 = vst [vmem:[%s2152_s26 + $0x2c] sm:$0xf] %v1518_v35  ;;  %v1520_v36 = vld [vmem:[%s2147_s25 + $0x38] sm:$0xf] }
  0x23   : > { %v1522_v37 = vld [vmem:[%s2147_s25 + $0x44] sm:$0xf]  ;;  %v1524_v38 = vld [vmem:[%s2147_s25 + $0x50] sm:$0xf]  ;;  %1521 = vst [vmem:[%s2152_s26 + $0x38] sm:$0xf] %v1520_v36 }
  0x24   : > { %1523 = vst [vmem:[%s2152_s26 + $0x44] sm:$0xf] %v1522_v37  ;;  %1525 = vst [vmem:[%s2152_s26 + $0x50] sm:$0xf] %v1524_v38  ;;  %v1526_v39 = vld [vmem:[%s2147_s25 + $0x5c] sm:$0xf] }
  0x25   : > { %v1528_v40 = vld [vmem:[%s2147_s25 + $0xc8] sm:$0xf]  ;;  %v1530_v41 = vld [vmem:[%s2147_s25 + $0xd4] sm:$0xf]  ;;  %1527 = vst [vmem:[%s2152_s26 + $0x5c] sm:$0xf] %v1526_v39 }
  0x26   : > { %1529 = vst [vmem:[%s2152_s26 + $0x68] sm:$0xf] %v1528_v40  ;;  %1531 = vst [vmem:[%s2152_s26 + $0x74] sm:$0xf] %v1530_v41  ;;  %v1532_v42 = vld [vmem:[%s2147_s25 + $0xe0] sm:$0xf] }
  0x27   : > { %v1534_v43 = vld [vmem:[%s2147_s25 + $0xec] sm:$0xf]  ;;  %v1536_v44 = vld [vmem:[%s2147_s25 + $0xf8] sm:$0xf]  ;;  %1533 = vst [vmem:[%s2152_s26 + $0x80] sm:$0xf] %v1532_v42 }
  0x28   : > { %1535 = vst [vmem:[%s2152_s26 + $0x8c] sm:$0xf] %v1534_v43  ;;  %1537 = vst [vmem:[%s2152_s26 + $0x98] sm:$0xf] %v1536_v44  ;;  %v1538_v45 = vld [vmem:[%s2147_s25 + $0x104] sm:$0xf] }
  0x29   : > { %v1540_v46 = vld [vmem:[%s2147_s25 + $0x110] sm:$0xf]  ;;  %v1542_v47 = vld [vmem:[%s2147_s25 + $0x11c] sm:$0xf]  ;;  %1539 = vst [vmem:[%s2152_s26 + $0xa4] sm:$0xf] %v1538_v45 }
  0x2a   : > { %1541 = vst [vmem:[%s2152_s26 + $0xb0] sm:$0xf] %v1540_v46  ;;  %1543 = vst [vmem:[%s2152_s26 + $0xbc] sm:$0xf] %v1542_v47  ;;  %v1544_v48 = vld [vmem:[%s2147_s25 + $0x188] sm:$0xf] }
  0x2b   : > { %v1546_v49 = vld [vmem:[%s2147_s25 + $0x194] sm:$0xf]  ;;  %v1548_v50 = vld [vmem:[%s2147_s25 + $0x1a0] sm:$0xf]  ;;  %1545 = vst [vmem:[%s2152_s26 + $0xc8] sm:$0xf] %v1544_v48 }
  0x2c   : > { %1547 = vst [vmem:[%s2152_s26 + $0xd4] sm:$0xf] %v1546_v49  ;;  %1549 = vst [vmem:[%s2152_s26 + $0xe0] sm:$0xf] %v1548_v50  ;;  %v1550_v51 = vld [vmem:[%s2147_s25 + $0x1ac] sm:$0xf] }
  0x2d   : > { %v1552_v52 = vld [vmem:[%s2147_s25 + $0x1b8] sm:$0xf]  ;;  %v1554_v53 = vld [vmem:[%s2147_s25 + $0x1c4] sm:$0xf]  ;;  %1551 = vst [vmem:[%s2152_s26 + $0xec] sm:$0xf] %v1550_v51 }
  0x2e   : > { %1553 = vst [vmem:[%s2152_s26 + $0xf8] sm:$0xf] %v1552_v52  ;;  %1555 = vst [vmem:[%s2152_s26 + $0x104] sm:$0xf] %v1554_v53  ;;  %v1556_v54 = vld [vmem:[%s2147_s25 + $0x1d0] sm:$0xf] }
  0x2f   : > { %v1558_v55 = vld [vmem:[%s2147_s25 + $0x1dc] sm:$0xf]  ;;  %v1560_v56 = vld [vmem:[%s2147_s25 + $0x248] sm:$0xf]  ;;  %1557 = vst [vmem:[%s2152_s26 + $0x110] sm:$0xf] %v1556_v54 }
  0x30   : > { %1559 = vst [vmem:[%s2152_s26 + $0x11c] sm:$0xf] %v1558_v55  ;;  %1561 = vst [vmem:[%s2152_s26 + $0x128] sm:$0xf] %v1560_v56  ;;  %v1562_v57 = vld [vmem:[%s2147_s25 + $0x254] sm:$0xf] }
  0x31   : > { %v1564_v58 = vld [vmem:[%s2147_s25 + $0x260] sm:$0xf]  ;;  %v1566_v59 = vld [vmem:[%s2147_s25 + $0x26c] sm:$0xf]  ;;  %1563 = vst [vmem:[%s2152_s26 + $0x134] sm:$0xf] %v1562_v57 }
  0x32   : > { %1565 = vst [vmem:[%s2152_s26 + $0x140] sm:$0xf] %v1564_v58  ;;  %1567 = vst [vmem:[%s2152_s26 + $0x14c] sm:$0xf] %v1566_v59  ;;  %v1568_v60 = vld [vmem:[%s2147_s25 + $0x278] sm:$0xf] }
  0x33   : > { %v1570_v61 = vld [vmem:[%s2147_s25 + $0x284] sm:$0xf]  ;;  %v1572_v62 = vld [vmem:[%s2147_s25 + $0x290] sm:$0xf]  ;;  %1569 = vst [vmem:[%s2152_s26 + $0x158] sm:$0xf] %v1568_v60 }
  0x34   : > { %1571 = vst [vmem:[%s2152_s26 + $0x164] sm:$0xf] %v1570_v61  ;;  %1573 = vst [vmem:[%s2152_s26 + $0x170] sm:$0xf] %v1572_v62  ;;  %v1574_v63 = vld [vmem:[%s2147_s25 + $0x29c] sm:$0xf] }
  0x35   : > { %1575 = vst [vmem:[%s2152_s26 + $0x17c] sm:$0xf] %v1574_v63 }
  0x36 PF: > { %p1576_p5 = scmp.ge.s32.totalorder %s2091_s14, 1  ;;  %p293_p6 = scmp.lt.s32.totalorder %s2091_s14, 3 }
  0x38   : > { %p294_p7 = pnand %p1576_p5, %p293_p6 }
  0x3a   : > { %297 = sbr.rel (%p294_p7) target bundleno = 396 (0x18c), region = 54 }
  0x3f   : > { %v2284_v0 = vld [vmem:[%s2691_s1 + $0x78] sm:$0xff]   ;;  %v2296_v2 = vld [vmem:[%s2691_s1 + $0x70] sm:$0xff]   ;;  %v2310_v4 = vld [vmem:[%s2691_s1 + $0x68] sm:$0xff]   ;;  %s300_s17 = sand.u32 1, %s2083_s12   ;;  %vm551_vm0 = vcmask 261120   ;;  %s1577_s23 = sshll.u32 %s1505_s15, 3 }
  0x40   : > { %v2289_v1 = vld [vmem:[%s2691_s1 + $0x38] sm:$0xff]   ;;  %1728 = vmatprep.subr.bf16.mxu0 %v2284_v0  ;;  %1774 = vmatprep.subr.bf16.mxu1 %v2284_v0  ;;  %v2303_v3 = vld [vmem:[%s2691_s1 + $0x30] sm:$0xff]   ;;  %v2317_v5 = vld [vmem:[%s2691_s1 + $0x28] sm:$0xff]   ;;  %s1962_s21 = smul.u32 384, %s300_s17  ;;  %p325_p8 = scmp.lt.s32.totalorder %s1577_s23, 15  ;;  %vm1430_vm1 = vcmask 519168  }
  0x41   : > { %1729 = vmatpush3.bf16.msra.mxu0 %v2289_v1  ;;  %1775 = vmatpush3.bf16.msra.mxu1 %v2289_v1  ;;  %v2325_v6 = vld [vmem:[%s2691_s1 + $0x60] sm:$0xff]   ;;  %v2339_v8 = vld [vmem:[%s2691_s1 + $0x58] sm:$0xff]   ;;  %v2353_v10 = vld [vmem:[%s2691_s1 + $0x50] sm:$0xff]  }
  0x42   : > { %1730 = vmatprep.subr.bf16.mxu0 %v2296_v2  ;;  %1776 = vmatprep.subr.bf16.mxu1 %v2296_v2  ;;  %v2332_v7 = vld [vmem:[%s2691_s1 + $0x20] sm:$0xff]   ;;  %v2346_v9 = vld [vmem:[%s2691_s1 + $0x18] sm:$0xff]   ;;  %s2355_s29 = scalar_lea.vmem [#allocation2], %s1962_s21  ;;  %v2364_v13 = vld [vmem:[%s2691_s1 + $0x10] sm:$0xff]   ;;  %s2705_s23 = smov (!%p325_p8, %s1577_s23), 15 }
  0x43   : > { %v2005_v11 = vld [vmem:[%s2355_s29 + $0x4] ss:$12 sps:$4 sm:$0xff]   ;;  %v2371_v14 = vld [vmem:[%s2691_s1 + $0x48] sm:$0xff]   ;;  %v2016_v26 = vld [vmem:[%s2355_s29 + $0x34] ss:$12 sps:$4 sm:$0xff]   ;;  %s1578_s12 = sshll.u32 %s2705_s23, 2 }
  0x44   : > { %v2008_v12 = vld [vmem:[%s2355_s29 + $0x64] ss:$12 sps:$4 sm:$0xff]   ;;  %596 = vmatprep.mubr.bf16.mxu0 %v2005_v11  ;;  %v2378_v15 = vld [vmem:[%s2691_s1 + $0x8] sm:$0xff]   ;;  %v2018_v27 = vld [vmem:[%s2355_s29 + $0x94] ss:$12 sps:$4 sm:$0xff]   ;;  %s2646_s26 = scalar_lea.vmem %s2693_s3, %s1578_s12 }
  0x45   : > { %1731 = vmatpush3.bf16.msra.mxu0 %v2303_v3  ;;  %1777 = vmatpush3.bf16.msra.mxu1 %v2303_v3  ;;  %v2385_v16 = vld [vmem:[%s2691_s1 + $0x40] sm:$0xff]   ;;  %v2399_v18 = vld [vmem:[%s2691_s1 + $0x88] sm:$0xff]   ;;  %v2020_v28 = vld [vmem:[%s2355_s29 + $0x30] ss:$12 sps:$4 sm:$0xff]  }
  0x46   : > { %1732 = vmatprep.subr.bf16.mxu0 %v2310_v4  ;;  %1778 = vmatprep.subr.bf16.mxu1 %v2310_v4  ;;  %v2392_v17 = vld [vmem:[%s2691_s1] sm:$0xff]   ;;  %v2010_v21 = vld [vmem:[%s2355_s29 + $0x1c] ss:$12 sps:$4 sm:$0xff]   ;;  %v2023_v30 = vld [vmem:[%s2355_s29 + $0x4c] ss:$12 sps:$4 sm:$0xff]  }
  0x47   : > { %815 = vmatprep.mubr.bf16.mxu1 %v2008_v12  ;;  %v2003_v19 = vld [vmem:[%s2355_s29] ss:$12 sps:$4 sm:$0xff]   ;;  %v2012_v22 = vld [vmem:[%s2355_s29 + $0x7c] ss:$12 sps:$4 sm:$0xff]   ;;  %v2014_v24 = vld [vmem:[%s2355_s29 + $0x18] ss:$12 sps:$4 sm:$0xff]  }
  0x48   : > { %v2006_v20 = vld [vmem:[%s2355_s29 + $0x60] ss:$12 sps:$4 sm:$0xff]   ;;  %v2015_v25 = vld [vmem:[%s2355_s29 + $0x78] ss:$12 sps:$4 sm:$0xff]   ;;  %v2021_v29 = vld [vmem:[%s2355_s29 + $0x90] ss:$12 sps:$4 sm:$0xff]  }
  0x49   : > { %1733 = vmatpush3.bf16.msra.mxu0 %v2317_v5  ;;  %1779 = vmatpush3.bf16.msra.mxu1 %v2317_v5  ;;  %v2412_v23 = vld [vmem:[%s2691_s1 + $0x80] sm:$0xff]   ;;  %v2025_v31 = vld [vmem:[%s2355_s29 + $0xac] ss:$12 sps:$4 sm:$0xff]   ;;  %v2027_v32 = vld [vmem:[%s2355_s29 + $0x48] ss:$12 sps:$4 sm:$0xff]  }
  0x4a   : > { %1734 = vmatprep.subr.bf16.mxu0 %v2325_v6  ;;  %1780 = vmatprep.subr.bf16.mxu1 %v2325_v6  ;;  %v2028_v33 = vld [vmem:[%s2355_s29 + $0xa8] ss:$12 sps:$4 sm:$0xff]   ;;  %v2032_v35 = vld [vmem:[%s2355_s29 + $0xc4] ss:$12 sps:$4 sm:$0xff]   ;;  %v2030_v36 = vld [vmem:[%s2355_s29 + $0xc0] ss:$12 sps:$4 sm:$0xff]  }
  0x4b   : > { %v2029_v34 = vld [vmem:[%s2355_s29 + $0x8] ss:$12 sps:$4 sm:$0xff]   ;;  %v2033_v37 = vld [vmem:[%s2355_s29 + $0x20] ss:$12 sps:$4 sm:$0xff]   ;;  %v2034_v38 = vld [vmem:[%s2355_s29 + $0x38] ss:$12 sps:$4 sm:$0xff]  }
  0x4c   : > { %v2035_v39 = vld [vmem:[%s2355_s29 + $0xdc] ss:$12 sps:$4 sm:$0xff]   ;;  %v2038_v41 = vld [vmem:[%s2355_s29 + $0xd8] ss:$12 sps:$4 sm:$0xff]   ;;  %v2040_v43 = vld [vmem:[%s2355_s29 + $0xf4] ss:$12 sps:$4 sm:$0xff]  }
  0x4d   : > { %1735 = vmatpush3.bf16.msra.mxu0 %v2332_v7  ;;  %1781 = vmatpush3.bf16.msra.mxu1 %v2332_v7  ;;  %v2037_v40 = vld [vmem:[%s2355_s29 + $0x50] ss:$12 sps:$4 sm:$0xff]   ;;  %v2039_v42 = vld [vmem:[%s2355_s29 + $0x68] ss:$12 sps:$4 sm:$0xff]   ;;  %v2042_v44 = vld [vmem:[%s2355_s29 + $0x80] ss:$12 sps:$4 sm:$0xff]  }
  0x4e   : > { %1736 = vmatprep.subr.bf16.mxu0 %v2339_v8  ;;  %1782 = vmatprep.subr.bf16.mxu1 %v2339_v8  ;;  %v2043_v45 = vld [vmem:[%s2355_s29 + $0xf0] ss:$12 sps:$4 sm:$0xff]   ;;  %v2044_v46 = vld [vmem:[%s2355_s29 + $0x98] ss:$12 sps:$4 sm:$0xff]   ;;  %v2048_v49 = vld [vmem:[%s2355_s29 + $0x108] ss:$12 sps:$4 sm:$0xff]  }
  0x4f   : > { %v2045_v47 = vld [vmem:[%s2355_s29 + $0x10c] ss:$12 sps:$4 sm:$0xff]   ;;  %v2047_v48 = vld [vmem:[%s2355_s29 + $0xb0] ss:$12 sps:$4 sm:$0xff]   ;;  %v2049_v50 = vld [vmem:[%s2355_s29 + $0xc8] ss:$12 sps:$4 sm:$0xff]  }
  0x50   : > { %v2052_v51 = vld [vmem:[%s2355_s29 + $0x124] ss:$12 sps:$4 sm:$0xff]   ;;  %v2050_v52 = vld [vmem:[%s2355_s29 + $0x120] ss:$12 sps:$4 sm:$0xff]   ;;  %v2055_v55 = vld [vmem:[%s2355_s29 + $0x13c] ss:$12 sps:$4 sm:$0xff]  }
  0x51   : > { %1737 = vmatpush3.bf16.msra.mxu0 %v2346_v9  ;;  %1783 = vmatpush3.bf16.msra.mxu1 %v2346_v9  ;;  %v2053_v53 = vld [vmem:[%s2355_s29 + $0xe0] ss:$12 sps:$4 sm:$0xff]   ;;  %v2054_v54 = vld [vmem:[%s2355_s29 + $0xf8] ss:$12 sps:$4 sm:$0xff]   ;;  %v2057_v56 = vld [vmem:[%s2355_s29 + $0x110] ss:$12 sps:$4 sm:$0xff]  }
  0x52   : > { %1738 = vmatprep.subr.bf16.mxu0 %v2353_v10  ;;  %1784 = vmatprep.subr.bf16.mxu1 %v2353_v10  ;;  %v2058_v57 = vld [vmem:[%s2355_s29 + $0x138] ss:$12 sps:$4 sm:$0xff]   ;;  %v2059_v58 = vld [vmem:[%s2355_s29 + $0x154] ss:$12 sps:$4 sm:$0xff]   ;;  %v2062_v60 = vld [vmem:[%s2355_s29 + $0x150] ss:$12 sps:$4 sm:$0xff]  }
  0x53   : > { %v2061_v59 = vld [vmem:[%s2355_s29 + $0x128] ss:$12 sps:$4 sm:$0xff]   ;;  %v2063_v61 = vld [vmem:[%s2355_s29 + $0x140] ss:$12 sps:$4 sm:$0xff]   ;;  %v2066_v63 = vld [vmem:[%s2355_s29 + $0x158] ss:$12 sps:$4 sm:$0xff]  }
  0x54   : > { %v2064_v62 = vld [vmem:[%s2355_s29 + $0x16c] ss:$12 sps:$4 sm:$0xff]  }
  0x55   : > { %1739 = vmatpush3.bf16.msra.mxu0 %v2364_v13  ;;  %1785 = vmatpush3.bf16.msra.mxu1 %v2364_v13 }
  0x56   : > { %1740 = vmatprep.subr.bf16.mxu0 %v2371_v14  ;;  %1786 = vmatprep.subr.bf16.mxu1 %v2371_v14 }
  0x59   : > { %1741 = vmatpush3.bf16.msra.mxu0 %v2378_v15  ;;  %1787 = vmatpush3.bf16.msra.mxu1 %v2378_v15 }
  0x5a   : > { %1742 = vmatprep.subr.bf16.mxu0 %v2385_v16  ;;  %1788 = vmatprep.subr.bf16.mxu1 %v2385_v16 }
  0x5d   : > { %1743 = vmatpush3.bf16.msra.mxu0 %v2392_v17  ;;  %1789 = vmatpush3.bf16.msra.mxu1 %v2392_v17 }
  0x5e   : > { %1820 = vmatprep.subr.bf16.mxu1 %v2284_v0  ;;  %1912 = vmatprep.subr.bf16.mxu0 %v2399_v18 }
  0x60   : > { %597 = vmatmul.mubr.bf16.vlgmr.msra.gmra.mxu0 %v2003_v19  ;;  %816 = vmatmul.mubr.bf16.vlgmr.msra.gmra.mxu1 %v2006_v20 }
  0x61   : > { %1821 = vmatpush3.bf16.msra.mxu1 %v2289_v1  ;;  %1913 = vmatpush3.bf16.msra.mxu0 %v2399_v18 }
  0x62   : > { %1822 = vmatprep.subr.bf16.mxu1 %v2296_v2  ;;  %604 = vmatprep.mubr.bf16.mxu0 %v2010_v21 }
  0x63   : > { %823 = vmatprep.mubr.bf16.mxu1 %v2012_v22  ;;  %1914 = vmatprep.subr.bf16.mxu0 %v2412_v23 }
  0x65   : > { %1823 = vmatpush3.bf16.msra.mxu1 %v2303_v3  ;;  %1915 = vmatpush3.bf16.msra.mxu0 %v2412_v23 }
  0x66   : > { %1824 = vmatprep.subr.bf16.mxu1 %v2310_v4  ;;  %1924 = vmatprep.subr.bf16.mxu0 %v2399_v18 }
  0x68   : > { %605 = vmatmul.mubr.bf16.gmra.mxu0 %v2014_v24  ;;  %824 = vmatmul.mubr.bf16.gmra.mxu1 %v2015_v25 }
  0x69   : > { %1825 = vmatpush3.bf16.msra.mxu1 %v2317_v5  ;;  %612 = vmatprep.mubr.bf16.mxu0 %v2016_v26 }
  0x6a   : > { %1826 = vmatprep.subr.bf16.mxu1 %v2325_v6  ;;  %831 = vmatprep.mubr.bf16.mxu1 %v2018_v27 }
  0x6d   : > { %1827 = vmatpush3.bf16.msra.mxu1 %v2332_v7 }
  0x6e   : > { %1828 = vmatprep.subr.bf16.mxu1 %v2339_v8 }
  0x70   : > { %613 = vmatmul.mubr.bf16.gmra.mxu0 %v2020_v28  ;;  %832 = vmatmul.mubr.bf16.gmra.mxu1 %v2021_v29 }
  0x71   : > { %1829 = vmatpush3.bf16.msra.mxu1 %v2346_v9  ;;  %620 = vmatprep.mubr.bf16.mxu0 %v2023_v30 }
  0x72   : > { %1830 = vmatprep.subr.bf16.mxu1 %v2353_v10  ;;  %839 = vmatprep.mubr.bf16.mxu1 %v2025_v31 }
  0x75   : > { %1831 = vmatpush3.bf16.msra.mxu1 %v2364_v13 }
  0x76   : > { %1832 = vmatprep.subr.bf16.mxu1 %v2371_v14 }
  0x78   : > { %621 = vmatmul.mubr.bf16.gmra.mxu0 %v2027_v32  ;;  %840 = vmatmul.mubr.bf16.gmra.mxu1 %v2028_v33 }
  0x79   : > { %1833 = vmatpush3.bf16.msra.mxu1 %v2378_v15  ;;  %1916 = vmatprep.mubr.msk.bf16.mxu0 %vm551_vm0, %v2029_v34 }
  0x7a   : > { %1834 = vmatprep.subr.bf16.mxu1 %v2385_v16  ;;  %1042 = vmatprep.mubr.bf16.mxu1 %v2032_v35 }
  0x7d   : > { %1835 = vmatpush3.bf16.msra.mxu1 %v2392_v17 }
  0x7e   : > { %1866 = vmatprep.subr.bf16.mxu1 %v2284_v0  ;;  %v2067_v0 = vld [vmem:[%s2355_s29 + $0x168] ss:$12 sps:$4 sm:$0xff]  }
  0x80   : > { %1917 = vmatmul.mubr.msk.bf16.vlgmr.msra.gmra.mxu0 %vm551_vm0, %v2033_v37  ;;  %1043 = vmatmul.mubr.bf16.vlgmr.msra.gmra.mxu1 %v2030_v36 }
  0x81   : > { %1867 = vmatpush3.bf16.msra.mxu1 %v2289_v1  ;;  %1925 = vmatpush3.bf16.msra.mxu0 %v2399_v18  ;;  %v2068_v1 = vld [vmem:[%s2355_s29 + $0x170] ss:$12 sps:$4 sm:$0xff]  }
  0x82   : > { %1868 = vmatprep.subr.bf16.mxu1 %v2296_v2  ;;  %1920 = vmatprep.mubr.msk.bf16.mxu0 %vm551_vm0, %v2034_v38 }
  0x83   : > { %1050 = vmatprep.mubr.bf16.mxu1 %v2035_v39  ;;  %1926 = vmatprep.subr.bf16.mxu0 %v2412_v23 }
  0x85   : > { %1869 = vmatpush3.bf16.msra.mxu1 %v2303_v3  ;;  %1927 = vmatpush3.bf16.msra.mxu0 %v2412_v23 }
  0x86   : > { %1870 = vmatprep.subr.bf16.mxu1 %v2310_v4  ;;  %1936 = vmatprep.subr.bf16.mxu0 %v2399_v18 }
  0x88   : > { %1921 = vmatmul.mubr.msk.bf16.gmra.mxu0 %vm551_vm0, %v2037_v40  ;;  %1051 = vmatmul.mubr.bf16.gmra.mxu1 %v2038_v41 }
  0x89   : > { %1871 = vmatpush3.bf16.msra.mxu1 %v2317_v5  ;;  %1928 = vmatprep.mubr.msk.bf16.mxu0 %vm551_vm0, %v2039_v42 }
  0x8a   : > { %1872 = vmatprep.subr.bf16.mxu1 %v2325_v6  ;;  %1058 = vmatprep.mubr.bf16.mxu1 %v2040_v43 }
  0x8d   : > { %1873 = vmatpush3.bf16.msra.mxu1 %v2332_v7 }
  0x8e   : > { %1874 = vmatprep.subr.bf16.mxu1 %v2339_v8 }
  0x90   : > { %1929 = vmatmul.mubr.msk.bf16.vlgmr.msra.gmra.mxu0 %vm551_vm0, %v2042_v44  ;;  %1059 = vmatmul.mubr.bf16.gmra.mxu1 %v2043_v45 }
  0x91   : > { %1875 = vmatpush3.bf16.msra.mxu1 %v2346_v9  ;;  %1937 = vmatpush3.bf16.msra.mxu0 %v2399_v18 }
  0x92   : > { %1876 = vmatprep.subr.bf16.mxu1 %v2353_v10  ;;  %1932 = vmatprep.mubr.msk.bf16.mxu0 %vm551_vm0, %v2044_v46 }
  0x93   : > { %1066 = vmatprep.mubr.bf16.mxu1 %v2045_v47  ;;  %1938 = vmatprep.subr.bf16.mxu0 %v2412_v23 }
  0x95   : > { %1877 = vmatpush3.bf16.msra.mxu1 %v2364_v13  ;;  %1939 = vmatpush3.bf16.msra.mxu0 %v2412_v23 }
  0x96   : > { %1878 = vmatprep.subr.bf16.mxu1 %v2371_v14  ;;  %1948 = vmatprep.subr.bf16.mxu0 %v2399_v18 }
  0x98   : > { %1933 = vmatmul.mubr.msk.bf16.gmra.mxu0 %vm551_vm0, %v2047_v48  ;;  %1067 = vmatmul.mubr.bf16.gmra.mxu1 %v2048_v49 }
  0x99   : > { %1879 = vmatpush3.bf16.msra.mxu1 %v2378_v15  ;;  %1940 = vmatprep.mubr.msk.bf16.mxu0 %vm551_vm0, %v2049_v50 }
  0x9a   : > { %1880 = vmatprep.subr.bf16.mxu1 %v2385_v16  ;;  %1269 = vmatprep.mubr.bf16.mxu1 %v2052_v51 }
  0x9d   : > { %1881 = vmatpush3.bf16.msra.mxu1 %v2392_v17 }
  0xa0   : > { %1941 = vmatmul.mubr.msk.bf16.vlgmr.msra.gmra.mxu0 %vm551_vm0, %v2053_v53  ;;  %1270 = vmatmul.mubr.bf16.vlgmr.msra.gmra.mxu1 %v2050_v52 }
  0xa1   : > { %1949 = vmatpush3.bf16.msra.mxu0 %v2399_v18  ;;  %1944 = vmatprep.mubr.msk.bf16.mxu0 %vm551_vm0, %v2054_v54 }
  0xa2   : > { %1277 = vmatprep.mubr.bf16.mxu1 %v2055_v55  ;;  %1950 = vmatprep.subr.bf16.mxu0 %v2412_v23 }
  0xa5   : > { %1951 = vmatpush3.bf16.msra.mxu0 %v2412_v23 }
  0xa8   : > { %1945 = vmatmul.mubr.msk.bf16.gmra.mxu0 %vm551_vm0, %v2057_v56  ;;  %1278 = vmatmul.mubr.bf16.gmra.mxu1 %v2058_v57 }
  0xa9   : > { %1285 = vmatprep.mubr.bf16.mxu1 %v2059_v58  ;;  %1952 = vmatprep.mubr.msk.bf16.mxu0 %vm551_vm0, %v2061_v59 }
  0xb0   : > { %1286 = vmatmul.mubr.bf16.gmra.mxu1 %v2062_v60  ;;  %1953 = vmatmul.mubr.msk.bf16.vlgmr.msra.gmra.mxu0 %vm551_vm0, %v2063_v61 }
  0xb1   : > { %1293 = vmatprep.mubr.bf16.mxu1 %v2064_v62  ;;  %1956 = vmatprep.mubr.msk.bf16.mxu0 %vm551_vm0, %v2066_v63 }
  0xb8   : > { %1294 = vmatmul.mubr.bf16.gmra.mxu1 %v2067_v0  ;;  %1957 = vmatmul.mubr.msk.bf16.gmra.mxu0 %vm551_vm0, %v2068_v1 }
 0x120   : > { %v1744_v2 = vpop.f32.mrf.mxu0  ;;  %v1790_v3 = vpop.f32.mrf.mxu1 }
 0x122   : > { %v1745_v4 = vpop.f32.mrf.mxu0  ;;  %v1791_v5 = vpop.f32.mrf.mxu1 }
 0x123   : > { %v1746_v6 = vadd.f32 %v1745_v4, %v1744_v2  ;;  %v2518_v7 = vadd.f32 %v1791_v5, %v1790_v3 }
 0x124   : > { %v1747_v8 = vpop.f32.mrf.mxu0  ;;  %v1793_v9 = vpop.f32.mrf.mxu1 }
 0x126   : > { %v1748_v10 = vpop.f32.mrf.mxu0  ;;  %v1794_v11 = vpop.f32.mrf.mxu1 }
 0x127   : > { %v2520_v12 = vadd.f32 %v1748_v10, %v1747_v8  ;;  %v2522_v13 = vadd.f32 %v1794_v11, %v1793_v9 }
 0x128   : > { %v1750_v14 = vpop.f32.mrf.mxu0  ;;  %v1796_v15 = vpop.f32.mrf.mxu1 }
 0x12a   : > { %v1751_v16 = vpop.f32.mrf.mxu0  ;;  %v1797_v17 = vpop.f32.mrf.mxu1 }
 0x12b   : > { %v1752_v18 = vadd.f32 %v1751_v16, %v1750_v14  ;;  %v1798_v19 = vadd.f32 %v1797_v17, %v1796_v15 }
 0x12c   : > { %v1753_v20 = vpop.f32.mrf.mxu0  ;;  %v1799_v21 = vpop.f32.mrf.mxu1 }
 0x12e   : > { %v1754_v22 = vpop.f32.mrf.mxu0  ;;  %v1800_v23 = vpop.f32.mrf.mxu1 }
 0x12f   : > { %v1755_v24 = vadd.f32 %v1754_v22, %v1753_v20  ;;  %v1801_v25 = vadd.f32 %v1800_v23, %v1799_v21 }
 0x130   : > { %v1756_v26 = vpop.f32.mrf.mxu0  ;;  %v1802_v27 = vpop.f32.mrf.mxu1 }
 0x132   : > { %v1757_v28 = vpop.f32.mrf.mxu0  ;;  %v1803_v29 = vpop.f32.mrf.mxu1 }
 0x133   : > { %v1758_v30 = vadd.f32 %v1757_v28, %v1756_v26  ;;  %v1804_v31 = vadd.f32 %v1803_v29, %v1802_v27 }
 0x134   : > { %v1759_v32 = vpop.f32.mrf.mxu0  ;;  %v1805_v33 = vpop.f32.mrf.mxu1 }
 0x136   : > { %v1760_v34 = vpop.f32.mrf.mxu0  ;;  %v1806_v35 = vpop.f32.mrf.mxu1 }
 0x137   : > { %v1761_v36 = vadd.f32 %v1760_v34, %v1759_v32  ;;  %v1807_v37 = vadd.f32 %v1806_v35, %v1805_v33 }
 0x138   : > { %v2524_v38 = vpop.f32.mrf.mxu0  ;;  %v2526_v39 = vpop.f32.mrf.mxu1 }
 0x13a   : > { %v2528_v40 = vpop.f32.mrf.mxu0  ;;  %v2530_v41 = vpop.f32.mrf.mxu1 }
 0x13c   : > { %v2532_v42 = vpop.f32.mrf.mxu0  ;;  %v2534_v43 = vpop.f32.mrf.mxu1 }
 0x13e   : > { %v2536_v44 = vpop.f32.mrf.mxu0  ;;  %v2538_v45 = vpop.f32.mrf.mxu1 }
 0x140   : > { %v1918_v46 = vpop.f32.mrf.mxu0  ;;  %v2540_v47 = vpop.f32.mrf.mxu1 }
 0x141   : > { %v672_v0 = vadd.f32 %v1918_v46, %v1752_v18 }
 0x142   : > { %v663_v48 = vpop.f32.mrf.mxu0  ;;  %v2542_v49 = vpop.f32.mrf.mxu1 }
 0x143   : > { %v2556_v4 = vadd.f32 %v1746_v6, %v663_v48 }
 0x144   : > { %v1919_v50 = vpop.f32.mrf.mxu0  ;;  %v2544_v51 = vpop.f32.mrf.mxu1 }
 0x145   : > { %v2563_v11 = vadd.f32 %v1919_v50, %v1755_v24 }
 0x146   : > { %v666_v52 = vpop.f32.mrf.mxu0  ;;  %v2546_v53 = vpop.f32.mrf.mxu1 }
 0x147   : > { %v2572_v6 = vadd.f32 %v2520_v12, %v666_v52 }
 0x148   : > { %v2548_v54 = vpop.f32.mrf.mxu0  ;;  %v1842_v55 = vpop.f32.mrf.mxu1 }
 0x14a   : > { %v679_v56 = vpop.f32.mrf.mxu0  ;;  %v1843_v57 = vpop.f32.mrf.mxu1 }
 0x14b   : > { %v2585_v24 = vadd.f32 %v1758_v30, %v679_v56 }
 0x14c   : > { %v2550_v58 = vpop.f32.mrf.mxu0  ;;  %v1845_v59 = vpop.f32.mrf.mxu1 }
 0x14e   : > { %v682_v60 = vpop.f32.mrf.mxu0  ;;  %v1846_v61 = vpop.f32.mrf.mxu1 }
 0x14f   : > { %v2597_v29 = vadd.f32 %v1761_v36, %v682_v60  ;;  %v1844_v36 = vadd.f32 %v1843_v57, %v1842_v55 }
 0x150   : > { %v1930_v62 = vpop.f32.mrf.mxu0  ;;  %v2552_v63 = vpop.f32.mrf.mxu1 }
 0x151   : > { %v891_v1 = vadd.f32 %v1930_v62, %v1798_v19 }
 0x152   : > { %v882_v2 = vpop.f32.mrf.mxu0  ;;  %v2554_v3 = vpop.f32.mrf.mxu1 }
 0x153   : > { %v915_v5 = vmax.f32 %v672_v0, %v891_v1  ;;  %v2559_v8 = vadd.f32 %v2518_v7, %v882_v2  ;;  %v1838_v2 = vadd.f32 %v2542_v49, %v2540_v47  ;;  %v1764_v47 = vadd.f32 %v2528_v40, %v2524_v38 }
 0x154   : > { %v1931_v9 = vpop.f32.mrf.mxu0  ;;  %v2561_v10 = vpop.f32.mrf.mxu1  ;;  %v1767_v49 = vadd.f32 %v2536_v44, %v2532_v42  ;;  %v1813_v38 = vadd.f32 %v2538_v45, %v2534_v43  ;;  %v1850_v42 = vadd.f32 %v2554_v3, %v2552_v63 }
 0x155   : > { %v913_v14 = vmax.f32 %v2556_v4, %v2559_v8  ;;  %v2567_v15 = vadd.f32 %v1931_v9, %v1801_v25  ;;  %v688_v40 = vadd.f32 %v2548_v54, %v1764_v47 }
 0x156   : > { %v885_v16 = vpop.f32.mrf.mxu0  ;;  %v2569_v17 = vpop.f32.mrf.mxu1 }
 0x157   : > { %v2577_v18 = vadd.f32 %v2522_v13, %v885_v16  ;;  %v1847_v16 = vadd.f32 %v1846_v61, %v1845_v59  ;;  %v1841_v59 = vadd.f32 %v2546_v53, %v2544_v51  ;;  %v1853_v43 = vadd.f32 %v2569_v17, %v2561_v10 }
 0x158   : > { %v1934_v19 = vpop.f32.mrf.mxu0  ;;  %v2579_v20 = vpop.f32.mrf.mxu1 }
 0x15a   : > { %v898_v22 = vpop.f32.mrf.mxu0  ;;  %v2583_v23 = vpop.f32.mrf.mxu1 }
 0x15b   : > { %v2587_v25 = vadd.f32 %v1804_v31, %v898_v22  ;;  %v1810_v31 = vadd.f32 %v2530_v41, %v2526_v39  ;;  %v2622_v41 = vld [vmem:[%s2692_s2] ss:$0 sm:$0xff]  ;;  %v1856_v45 = vadd.f32 %v2583_v23, %v2579_v20 }
 0x15c   : > { %v2589_v12 = vpop.f32.mrf.mxu0  ;;  %v2591_v26 = vpop.f32.mrf.mxu1 }
 0x15d   : > { %v907_v39 = vadd.f32 %v1934_v19, %v1810_v31  ;;  %v2696_v19 = vmax.f32 %v2563_v11, %v2567_v15 }
 0x15e   : > { %v901_v27 = vpop.f32.mrf.mxu0  ;;  %v2595_v28 = vpop.f32.mrf.mxu1 }
 0x15f   : > { %v2599_v32 = vadd.f32 %v1807_v37, %v901_v27 }
 0x160   : > { %v1942_v33 = vpop.f32.mrf.mxu0  ;;  %v1882_v30 = vpop.f32.mrf.mxu1 }
 0x161   : > { %2695 = vst [vmem:[#allocation3_spill] sm:$0xff] %v2599_v32  ;;  %v1118_v4 = vadd.f32 %v1942_v33, %v1844_v36 }
 0x162   : > { %v1109_v34 = vpop.f32.mrf.mxu0  ;;  %v1883_v35 = vpop.f32.mrf.mxu1 }
 0x163   : > { %v1110_v22 = vadd.f32 %v1838_v2, %v1109_v34  ;;  %v1142_v55 = vmax.f32 %v915_v5, %v1118_v4  ;;  %v1884_v57 = vadd.f32 %v1883_v35, %v1882_v30 }
 0x164   : > { %v1943_v46 = vpop.f32.mrf.mxu0  ;;  %v1885_v48 = vpop.f32.mrf.mxu1 }
 0x165   : > { %v1121_v7 = vadd.f32 %v1943_v46, %v1847_v16  ;;  %v1140_v33 = vmax.f32 %v913_v14, %v1110_v22 }
 0x166   : > { %v1112_v50 = vpop.f32.mrf.mxu0  ;;  %v1886_v52 = vpop.f32.mrf.mxu1 }
 0x167   : > { %v1113_v44 = vadd.f32 %v1841_v59, %v1112_v50  ;;  %v1143_v31 = vmax.f32 %v2696_v19, %v1121_v7  ;;  %v1887_v54 = vadd.f32 %v1886_v52, %v1885_v48  ;;  %v919_v50 = vmax.f32 %v688_v40, %v907_v39 }
 0x168   : > { %v1946_v56 = vpop.f32.mrf.mxu0  ;;  %v1888_v62 = vpop.f32.mrf.mxu1  ;;  %v910_v7 = vadd.f32 %v2589_v12, %v1813_v38  ;;  %v1859_v12 = vadd.f32 %v2595_v28, %v2591_v26 }
 0x16a   : > { %v1125_v0 = vpop.f32.mrf.mxu0  ;;  %v1889_v1 = vpop.f32.mrf.mxu1 }
 0x16b   : > { %v1890_v27 = vadd.f32 %v1889_v1, %v1888_v62  ;;  %v1126_v63 = vadd.f32 %v1850_v42, %v1125_v0  ;;  %v2697_v1 = vmax.f32 %v2572_v6, %v2577_v18  ;;  %v2698_v6 = vmax.f32 %v2585_v24, %v2587_v25 }
 0x16c   : > { %v2605_v37 = vpop.f32.mrf.mxu0  ;;  %v1891_v60 = vpop.f32.mrf.mxu1 }
 0x16d   : > { %v1141_v36 = vmax.f32 %v2697_v1, %v1113_v44  ;;  %v1144_v18 = vmax.f32 %v2698_v6, %v1126_v63  ;;  %v1137_v26 = vadd.f32 %v2605_v37, %v1859_v12 }
 0x16e   : > { %v1128_v8 = vpop.f32.mrf.mxu0  ;;  %v1892_v9 = vpop.f32.mrf.mxu1 }
 0x170   : > { %v1894_v13 = vpop.f32.mrf.mxu1  ;;  %v1954_v21 = vpop.f32.mrf.mxu0 }
 0x171   : > { %v1345_v32 = vadd.f32 %v1954_v21, %v1890_v27  ;;  %v1893_v21 = vadd.f32 %v1892_v9, %v1891_v60  ;;  %v1134_v60 = vadd.f32 %v1946_v56, %v1856_v45  ;;  %v1129_v56 = vadd.f32 %v1853_v43, %v1128_v8 }
 0x172   : > { %v1895_v61 = vpop.f32.mrf.mxu1  ;;  %v1336_v5 = vpop.f32.mrf.mxu0 }
 0x173   : > { %v1369_v30 = vmax.f32 %v1142_v55, %v1345_v32  ;;  %v1337_v34 = vadd.f32 %v1884_v57, %v1336_v5  ;;  %v1896_v48 = vadd.f32 %v1895_v61, %v1894_v13  ;;  %v691_v55 = vadd.f32 %v2550_v58, %v1767_v49  ;;  %v2699_v5 = vld [vmem:[#allocation3_spill] sm:$0xff] }
 0x174   : > { %v1897_v51 = vpop.f32.mrf.mxu1  ;;  %v1955_v53 = vpop.f32.mrf.mxu0  ;;  %v1146_v57 = vmax.f32 %v919_v50, %v1134_v60 }
 0x175   : > { %v1384_v14 = vadd.f32 %v2622_v41, %v1369_v30  ;;  %v1367_v32 = vmax.f32 %v1140_v33, %v1337_v34  ;;  %v1348_v35 = vadd.f32 %v1955_v53, %v1893_v21  ;;  %v920_v61 = vmax.f32 %v691_v55, %v910_v7 }
 0x176   : > { %v1898_v3 = vpop.f32.mrf.mxu1  ;;  %v1339_v46 = vpop.f32.mrf.mxu0  ;;  %v2700_v33 = vmax.f32 %v2597_v29, %v2699_v5 }
 0x177   : > { %v1392_v62 = vmax.f32 %v1384_v14, 0.0  ;;  %v1382_v11 = vadd.f32 %v2622_v41, %v1367_v32  ;;  %v1370_v15 = vmax.f32 %v1143_v31, %v1348_v35  ;;  %v1340_v10 = vadd.f32 %v1887_v54, %v1339_v46 }
 0x178   : > { %v1900_v17 = vpop.f32.mrf.mxu1  ;;  %v1958_v20 = vpop.f32.mrf.mxu0  ;;  %v1899_v47 = vadd.f32 %v1898_v3, %v1897_v51  ;;  %v1145_v58 = vmax.f32 %v2700_v33, %v1129_v56  ;;  %v1147_v42 = vmax.f32 %v920_v61, %v1137_v26 }
 0x179   : > { %v1722_v23 = vpack.c.bf16 %v1392_v62, %v1392_v62  ;;  %v1390_v52 = vmax.f32 %v1382_v11, 0.0  ;;  %v1385_v0 = vadd.f32 %v2622_v41, %v1370_v15  ;;  %v1368_v2 = vmax.f32 %v1141_v36, %v1340_v10 }
 0x17a   : > { %v1901_v4 = vpop.f32.mrf.mxu1  ;;  %v1352_v9 = vpop.f32.mrf.mxu0 }
 0x17b   : > { %1433 = vst.msk [vmem:[%s2646_s26 + $0x8] sm:$0xf] %vm1430_vm1, %v1722_v23  ;;  %v1720_v16 = vpack.c.bf16 %v1390_v52, %v1390_v52  ;;  %v1393_v22 = vmax.f32 %v1385_v0, 0.0  ;;  %v1902_v13 = vadd.f32 %v1901_v4, %v1900_v17  ;;  %v1353_v27 = vadd.f32 %v1896_v48, %v1352_v9 }
 0x17c   : > { %v1383_v24 = vadd.f32 %v2622_v41, %v1368_v2  ;;  %v1903_v25 = vpop.f32.mrf.mxu1  ;;  %v1959_v28 = vpop.f32.mrf.mxu0 }
 0x17d   : > { %1431 = vst.msk [vmem:[%s2646_s26] sm:$0xf] %vm1430_vm1, %v1720_v16  ;;  %v1723_v8 = vpack.c.bf16 %v1393_v22, %v1393_v22  ;;  %v1361_v59 = vadd.f32 %v1958_v20, %v1902_v13  ;;  %v1371_v39 = vmax.f32 %v1144_v18, %v1353_v27 }
 0x17e   : > { %v1391_v49 = vmax.f32 %v1383_v24, 0.0  ;;  %v1904_v21 = vpop.f32.mrf.mxu1  ;;  %v1355_v30 = vpop.f32.mrf.mxu0 }
 0x17f   : > { %1434 = vst.msk [vmem:[%s2646_s26 + $0xc] sm:$0xf] %vm1430_vm1, %v1723_v8  ;;  %v1373_v37 = vmax.f32 %v1146_v57, %v1361_v59  ;;  %v1386_v34 = vadd.f32 %v2622_v41, %v1371_v39  ;;  %v1905_v38 = vadd.f32 %v1904_v21, %v1903_v25  ;;  %v1356_v40 = vadd.f32 %v1899_v47, %v1355_v30 }
 0x180   : > { %v1721_v44 = vpack.c.bf16 %v1391_v49, %v1391_v49 }
 0x181   : > { %v1388_v51 = vadd.f32 %v2622_v41, %v1373_v37  ;;  %v1394_v53 = vmax.f32 %v1386_v34, 0.0  ;;  %v1364_v29 = vadd.f32 %v1959_v28, %v1905_v38  ;;  %v1372_v19 = vmax.f32 %v1145_v58, %v1356_v40 }
 0x182   : > { %1432 = vst.msk [vmem:[%s2646_s26 + $0x4] sm:$0xf] %vm1430_vm1, %v1721_v44 }
 0x183   : > { %v1396_v31 = vmax.f32 %v1388_v51, 0.0  ;;  %v1724_v14 = vpack.c.bf16 %v1394_v53, %v1394_v53  ;;  %v1374_v32 = vmax.f32 %v1147_v42, %v1364_v29  ;;  %v1387_v35 = vadd.f32 %v2622_v41, %v1372_v19 }
 0x185   : > { %v1726_v43 = vpack.c.bf16 %v1396_v31, %v1396_v31  ;;  %1435 = vst.msk [vmem:[%s2646_s26 + $0x10] sm:$0xf] %vm1430_vm1, %v1724_v14  ;;  %v1389_v45 = vadd.f32 %v2622_v41, %v1374_v32  ;;  %v1395_v54 = vmax.f32 %v1387_v35, 0.0 }
 0x187   : > { %1437 = vst.msk [vmem:[%s2646_s26 + $0x18] sm:$0xf] %vm1430_vm1, %v1726_v43  ;;  %v1397_v63 = vmax.f32 %v1389_v45, 0.0  ;;  %v1725_v3 = vpack.c.bf16 %v1395_v54, %v1395_v54 }
 0x189   : > { %v1727_v46 = vpack.c.bf16 %v1397_v63, %v1397_v63  ;;  %1436 = vst.msk [vmem:[%s2646_s26 + $0x14] sm:$0xf] %vm1430_vm1, %v1725_v3 }
 0x18b   : > { %1438 = vst.msk [vmem:[%s2646_s26 + $0x1c] sm:$0xf] %vm1430_vm1, %v1727_v46 }
 0x18c PF: > { %p10_p9 = scmp.ge.s32.totalorder %s2130_s16, 4   ;;  %s2701_s12 = smov %s2087_s13 }
 0x18d   : > { %s2702_s13 = smov %s2139_s19  ;;  %s2703_s14 = smov %s2130_s16 }
 0x18e   :  { %12 = sbr.rel (!%p10_p9) target bundleno = 2 (0x2), region = 102 }

// kernel: traffic_sign_cnn_forward.6
= control target key start
LH: loop header
LB: loop body
LE: loop exit
PB: predicated region body
PF: predicated region fallthrough
CT: control target
= control target key end

     0   :  { %s1763_s12 = smov 0   ;;  %s1765_s13 = smov 0   ;;  %s2247_s0 = inlined_call_operand.vmem [shape: bf16[4,32,576], index: 0, kind: input, shape index: {}]   ;;  %s2248_s1 = inlined_call_operand.vmem [shape: bf16[576,128], index: 1, kind: input, shape index: {}]   ;;  %s2249_s2 = inlined_call_operand.vmem [shape: f32[1,128], index: 2, kind: input, shape index: {}]   ;;  %s2250_s3 = inlined_call_operand.vmem [shape: bf16[32,128], index: 3, kind: output, shape index: {}]  }
   0x1   :  { %s1767_s14 = smov 0  }
   0x2 LB: > { %s1264_s15 = sadd.s32 4294967295, %s1739_s14   ;;  %s1780_s16 = sadd.s32 1, %s1739_s14   ;;  %s1739_s14 = sphi %s1767_s14, %s2253_s14   ;;  %s1735_s13 = sphi %s1765_s13, %s2252_s13   ;;  %s1731_s12 = sphi %s1763_s12, %s2251_s12  }
   0x3   : > { %s17_s17 = ssub.s32 %s1739_s14, %s1780_s16  ;;  %s20_s18 = sadd.s32 1, %s1735_s13 }
   0x4   : > { %p18_p0 = scmp.eq.s32.totalorder %s17_s17, 0  ;;  %p27_p1 = scmp.ne.s32.totalorder %s1735_s13, %s1731_s12 }
   0x5   : > { %p28_p2 = scmp.eq.s32.totalorder %s1739_s14, 0  ;;  %p1267_p4 = scmp.ge.s32.totalorder %s1739_s14, 2 }
   0x6   : > { %s1789_s19 = scalar_select %p18_p0, %s1735_s13, %s20_s18  }
   0x7   : > { %p29_p3 = por %p28_p2, %p27_p1  ;;  %127 = sbr.rel (%p1267_p4) target bundleno = 30 (0x1e), region = 24 }
   0xc   : > { %130 = sbr.rel (!%p29_p3) target bundleno = 30 (0x1e), region = 28  ;;  %s132_s20 = sand.u32 (%p29_p3), 1, %s1735_s13  }
   0xd   : > { %s1625_s21 = smul.u32 (%p29_p3), 40, %s1739_s14 }
   0xe   : > { %s1624_s22 = smul.u32 (%p29_p3), 160, %s132_s20 }
   0xf   : > { %s1797_s25 = scalar_lea.vmem (%p29_p3), %s2247_s0, %s1625_s21 }
  0x10   : > { %v153_v0 = vld [vmem:[%s1797_s25] sm:$0xff] (%p29_p3)  ;;  %v155_v1 = vld [vmem:[%s1797_s25 + $0x8] sm:$0xff] (%p29_p3)  ;;  %v157_v2 = vld [vmem:[%s1797_s25 + $0x14] sm:$0xff] (%p29_p3)  ;;  %s1802_s26 = scalar_lea.vmem (%p29_p3), [#allocation2], %s1624_s22 }
  0x11   : > { %154 = vst [vmem:[%s1802_s26] sm:$0xff] %v153_v0  ;;  %156 = vst [vmem:[%s1802_s26 + $0x8] sm:$0xff] %v155_v1  ;;  %v159_v3 = vld [vmem:[%s1797_s25 + $0x1c] sm:$0xff]  ;;  %v161_v4 = vld [vmem:[%s1797_s25 + $0x50] sm:$0xff] }
  0x12   : > { %158 = vst [vmem:[%s1802_s26 + $0x14] sm:$0xff] %v157_v2  ;;  %v163_v5 = vld [vmem:[%s1797_s25 + $0x58] sm:$0xff]  ;;  %160 = vst [vmem:[%s1802_s26 + $0x1c] sm:$0xff] %v159_v3  ;;  %v165_v6 = vld [vmem:[%s1797_s25 + $0x64] sm:$0xff] }
  0x13   : > { %162 = vst [vmem:[%s1802_s26 + $0x28] sm:$0xff] %v161_v4  ;;  %164 = vst [vmem:[%s1802_s26 + $0x30] sm:$0xff] %v163_v5  ;;  %v167_v7 = vld [vmem:[%s1797_s25 + $0x6c] sm:$0xff]  ;;  %v169_v8 = vld [vmem:[%s1797_s25 + $0xa0] sm:$0xff] }
  0x14   : > { %166 = vst [vmem:[%s1802_s26 + $0x3c] sm:$0xff] %v165_v6  ;;  %168 = vst [vmem:[%s1802_s26 + $0x44] sm:$0xff] %v167_v7  ;;  %v171_v9 = vld [vmem:[%s1797_s25 + $0xa8] sm:$0xff]  ;;  %v173_v10 = vld [vmem:[%s1797_s25 + $0xb4] sm:$0xff] }
  0x15   : > { %170 = vst [vmem:[%s1802_s26 + $0x50] sm:$0xff] %v169_v8  ;;  %v175_v11 = vld [vmem:[%s1797_s25 + $0xbc] sm:$0xff]  ;;  %172 = vst [vmem:[%s1802_s26 + $0x58] sm:$0xff] %v171_v9  ;;  %v177_v12 = vld [vmem:[%s1797_s25 + $0xf0] sm:$0xff] }
  0x16   : > { %174 = vst [vmem:[%s1802_s26 + $0x64] sm:$0xff] %v173_v10  ;;  %176 = vst [vmem:[%s1802_s26 + $0x6c] sm:$0xff] %v175_v11  ;;  %v179_v13 = vld [vmem:[%s1797_s25 + $0xf8] sm:$0xff]  ;;  %v181_v14 = vld [vmem:[%s1797_s25 + $0x104] sm:$0xff] }
  0x17   : > { %178 = vst [vmem:[%s1802_s26 + $0x78] sm:$0xff] %v177_v12  ;;  %180 = vst [vmem:[%s1802_s26 + $0x80] sm:$0xff] %v179_v13  ;;  %v183_v15 = vld [vmem:[%s1797_s25 + $0x10c] sm:$0xff]  ;;  %v1273_v17 = vld [vmem:[%s1797_s25 + $0x24] sm:$0xf] }
  0x18   : > { %182 = vst [vmem:[%s1802_s26 + $0x8c] sm:$0xff] %v181_v14  ;;  %v1271_v16 = vld [vmem:[%s1797_s25 + $0x10] sm:$0xf]  ;;  %184 = vst [vmem:[%s1802_s26 + $0x94] sm:$0xff] %v183_v15  ;;  %v1275_v18 = vld [vmem:[%s1797_s25 + $0x60] sm:$0xf] }
  0x19   : > { %1272 = vst [vmem:[%s1802_s26 + $0x10] sm:$0xf] %v1271_v16  ;;  %1274 = vst [vmem:[%s1802_s26 + $0x24] sm:$0xf] %v1273_v17  ;;  %v1277_v19 = vld [vmem:[%s1797_s25 + $0x74] sm:$0xf] }
  0x1a   : > { %v1279_v20 = vld [vmem:[%s1797_s25 + $0xb0] sm:$0xf]  ;;  %1276 = vst [vmem:[%s1802_s26 + $0x38] sm:$0xf] %v1275_v18  ;;  %1278 = vst [vmem:[%s1802_s26 + $0x4c] sm:$0xf] %v1277_v19 }
  0x1b   : > { %1280 = vst [vmem:[%s1802_s26 + $0x60] sm:$0xf] %v1279_v20  ;;  %v1281_v21 = vld [vmem:[%s1797_s25 + $0xc4] sm:$0xf]  ;;  %v1283_v22 = vld [vmem:[%s1797_s25 + $0x100] sm:$0xf] }
  0x1c   : > { %v1285_v23 = vld [vmem:[%s1797_s25 + $0x114] sm:$0xf]  ;;  %1282 = vst [vmem:[%s1802_s26 + $0x74] sm:$0xf] %v1281_v21  ;;  %1284 = vst [vmem:[%s1802_s26 + $0x88] sm:$0xf] %v1283_v22 }
  0x1d   : > { %1286 = vst [vmem:[%s1802_s26 + $0x9c] sm:$0xf] %v1285_v23 }
  0x1e PF: > { %p1287_p5 = scmp.ge.s32.totalorder %s1739_s14, 1  ;;  %p213_p6 = scmp.lt.s32.totalorder %s1739_s14, 3 }
  0x20   : > { %p214_p7 = pnand %p1287_p5, %p213_p6 }
  0x21   : > { %s220_s4 = sand.u32 (!%p214_p7), 1, %s1731_s12  }
  0x22   : > { %217 = sbr.rel (%p214_p7) target bundleno = 415 (0x19f), region = 54 }
  0x23   : > { %s1626_s12 = smul.u32 (!%p214_p7), 160, %s220_s4 }
  0x25   : > { %s2043_s29 = scalar_lea.vmem (!%p214_p7), [#allocation2], %s1626_s12  ;;  %s1288_s12 = sshll.u32 (!%p214_p7), %s1264_s15, 1 }
  0x26   : > { %p245_p8 = scmp.lt.s32.totalorder (!%p214_p7), %s1288_s12, 3 }
  0x27   : > { %v1854_v24 = vld [vmem:[%s2248_s1 + $0x78] sm:$0xff]   ;;  %v1877_v28 = vld [vmem:[%s2248_s1 + $0x70] sm:$0xff]   ;;  %v1901_v32 = vld [vmem:[%s2248_s1 + $0x68] sm:$0xff]   ;;  %v1741_v58 = vmov 0.0   ;;  %vm1742_vm0 = vmmov 0   ;;  %vm570_vm1 = vcmask 523264  }
  0x28   : > { %v1859_v25 = vld [vmem:[%s2248_s1 + $0xf8] sm:$0xff]   ;;  %1380 = vmatprep.subr.bf16.mxu0 %v1854_v24  ;;  %v1883_v29 = vld [vmem:[%s2248_s1 + $0xf0] sm:$0xff]   ;;  %v1907_v33 = vld [vmem:[%s2248_s1 + $0xe8] sm:$0xff]   ;;  %s2255_s12 = smov (!%p245_p8, %s1288_s12), 3 }
  0x29   : > { %v1865_v26 = vld [vmem:[%s2248_s1 + $0x38] sm:$0xff]   ;;  %1402 = vmatprep.subr.bf16.mxu1 %v1859_v25  ;;  %v1889_v30 = vld [vmem:[%s2248_s1 + $0x30] sm:$0xff]   ;;  %v1913_v34 = vld [vmem:[%s2248_s1 + $0x28] sm:$0xff]   ;;  %s1289_s14 = sshll.u32 %s2255_s12, 2 }
  0x2a   : > { %v1871_v27 = vld [vmem:[%s2248_s1 + $0xb8] sm:$0xff]   ;;  %1381 = vmatpush3.bf16.msra.mxu0 %v1865_v26  ;;  %v1895_v31 = vld [vmem:[%s2248_s1 + $0xb0] sm:$0xff]   ;;  %v1919_v35 = vld [vmem:[%s2248_s1 + $0xa8] sm:$0xff]   ;;  %s248_s20 = scalar_lea.vmem %s2250_s3, %s1289_s14 }
  0x2b   : > { %1403 = vmatpush3.bf16.msra.mxu1 %v1871_v27  ;;  %1382 = vmatprep.subr.bf16.mxu0 %v1877_v28  ;;  %v1925_v36 = vld [vmem:[%s2248_s1 + $0x60] sm:$0xff]   ;;  %v1949_v40 = vld [vmem:[%s2248_s1 + $0x58] sm:$0xff]   ;;  %v1973_v44 = vld [vmem:[%s2248_s1 + $0x50] sm:$0xff]  }
  0x2c   : > { %1404 = vmatprep.subr.bf16.mxu1 %v1883_v29  ;;  %v1931_v37 = vld [vmem:[%s2248_s1 + $0xe0] sm:$0xff]   ;;  %v1955_v41 = vld [vmem:[%s2248_s1 + $0xd8] sm:$0xff]   ;;  %v1979_v45 = vld [vmem:[%s2248_s1 + $0xd0] sm:$0xff]  }
  0x2d   : > { %v1937_v38 = vld [vmem:[%s2248_s1 + $0x20] sm:$0xff]   ;;  %v1961_v42 = vld [vmem:[%s2248_s1 + $0x18] sm:$0xff]   ;;  %v1985_v46 = vld [vmem:[%s2248_s1 + $0x10] sm:$0xff]  }
  0x2e   : > { %1383 = vmatpush3.bf16.msra.mxu0 %v1889_v30  ;;  %v1943_v39 = vld [vmem:[%s2248_s1 + $0xa0] sm:$0xff]   ;;  %v1967_v43 = vld [vmem:[%s2248_s1 + $0x98] sm:$0xff]   ;;  %v1992_v47 = vld [vmem:[%s2248_s1 + $0x90] sm:$0xff]  }
  0x2f   : > { %1405 = vmatpush3.bf16.msra.mxu1 %v1895_v31  ;;  %1384 = vmatprep.subr.bf16.mxu0 %v1901_v32  ;;  %v1998_v48 = vld [vmem:[%s2248_s1 + $0x48] sm:$0xff]   ;;  %v2022_v52 = vld [vmem:[%s2248_s1 + $0x40] sm:$0xff]   ;;  %v2055_v61 = vld [vmem:[%s2248_s1 + $0x118] sm:$0xff]  }
  0x30   : > { %1406 = vmatprep.subr.bf16.mxu1 %v1907_v33  ;;  %v2004_v49 = vld [vmem:[%s2248_s1 + $0xc8] sm:$0xff]   ;;  %v2028_v53 = vld [vmem:[%s2248_s1 + $0xc0] sm:$0xff]   ;;  %v2061_v62 = vld [vmem:[%s2248_s1 + $0x110] sm:$0xff]  }
  0x31   : > { %v2010_v50 = vld [vmem:[%s2248_s1 + $0x8] sm:$0xff]   ;;  %v2034_v54 = vld [vmem:[%s2248_s1] sm:$0xff]   ;;  %v1708_v8 = vld [vmem:[%s2043_s29 + $0x5c] ss:$20 sps:$4 sm:$0xff]  }
  0x32   : > { %1385 = vmatpush3.bf16.msra.mxu0 %v1913_v34  ;;  %v2016_v51 = vld [vmem:[%s2248_s1 + $0x88] sm:$0xff]   ;;  %v2040_v55 = vld [vmem:[%s2248_s1 + $0x80] sm:$0xff]   ;;  %v1712_v11 = vld [vmem:[%s2043_s29 + $0x7c] ss:$20 sps:$4 sm:$0xff]  }
  0x33   : > { %1407 = vmatpush3.bf16.msra.mxu1 %v1919_v35  ;;  %1386 = vmatprep.subr.bf16.mxu0 %v1925_v36  ;;  %v1685_v56 = vld [vmem:[%s2043_s29] ss:$20 sps:$4 sm:$0xff]   ;;  %v1687_v57 = vld [vmem:[%s2043_s29 + $0x4] ss:$20 sps:$4 sm:$0xff]   ;;  %v1688_v59 = vld [vmem:[%s2043_s29 + $0x8] ss:$20 sps:$4 sm:$0xff]  }
  0x34   : > { %1408 = vmatprep.subr.bf16.mxu1 %v1931_v37  ;;  %v1690_v60 = vld [vmem:[%s2043_s29 + $0xc] ss:$20 sps:$4 sm:$0xff]   ;;  %606 = vmatprep.mubr.bf16.mxu0 %v1687_v57  ;;  %v1695_v2 = vld [vmem:[%s2043_s29 + $0x10] ss:$20 sps:$4 sm:$0xff]   ;;  %v1701_v3 = vld [vmem:[%s2043_s29 + $0x34] ss:$20 sps:$4 sm:$0xff]  }
  0x35   : > { %647 = vmatprep.mubr.bf16.mxu1 %v1690_v60  ;;  %v1698_v63 = vld [vmem:[%s2043_s29 + $0x2c] ss:$20 sps:$4 sm:$0xff]   ;;  %v1696_v4 = vld [vmem:[%s2043_s29 + $0x28] ss:$20 sps:$4 sm:$0xff]   ;;  %v1699_v5 = vld [vmem:[%s2043_s29 + $0x30] ss:$20 sps:$4 sm:$0xff]  }
  0x36   : > { %1387 = vmatpush3.bf16.msra.mxu0 %v1937_v38  ;;  %v2073_v0 = vld [vmem:[%s2248_s1 + $0x108] sm:$0xff]   ;;  %v2082_v1 = vld [vmem:[%s2248_s1 + $0x100] sm:$0xff]  }
  0x37   : > { %1409 = vmatpush3.bf16.msra.mxu1 %v1943_v39  ;;  %1388 = vmatprep.subr.bf16.mxu0 %v1949_v40  ;;  %v1702_v6 = vld [vmem:[%s2043_s29 + $0x38] ss:$20 sps:$4 sm:$0xff]   ;;  %v1705_v7 = vld [vmem:[%s2043_s29 + $0x54] ss:$20 sps:$4 sm:$0xff]   ;;  %v1703_v9 = vld [vmem:[%s2043_s29 + $0x50] ss:$20 sps:$4 sm:$0xff]  }
  0x38   : > { %1410 = vmatprep.subr.bf16.mxu1 %v1955_v41  ;;  %v1706_v10 = vld [vmem:[%s2043_s29 + $0x58] ss:$20 sps:$4 sm:$0xff]   ;;  %v1709_v12 = vld [vmem:[%s2043_s29 + $0x60] ss:$20 sps:$4 sm:$0xff]   ;;  %v1716_v16 = vld [vmem:[%s2043_s29 + $0x88] ss:$20 sps:$4 sm:$0xff]  }
  0x39   : > { %v1715_v13 = vld [vmem:[%s2043_s29 + $0x84] ss:$20 sps:$4 sm:$0xff]   ;;  %v1713_v15 = vld [vmem:[%s2043_s29 + $0x80] ss:$20 sps:$4 sm:$0xff]  }
  0x3a   : > { %1389 = vmatpush3.bf16.msra.mxu0 %v1961_v42  ;;  %v1710_v14 = vld [vmem:[%s2043_s29 + $0x78] ss:$20 sps:$4 sm:$0xff]  }
  0x3b   : > { %1411 = vmatpush3.bf16.msra.mxu1 %v1967_v43  ;;  %1390 = vmatprep.subr.bf16.mxu0 %v1973_v44 }
  0x3c   : > { %1412 = vmatprep.subr.bf16.mxu1 %v1979_v45 }
  0x3e   : > { %1391 = vmatpush3.bf16.msra.mxu0 %v1985_v46 }
  0x3f   : > { %1413 = vmatpush3.bf16.msra.mxu1 %v1992_v47  ;;  %1392 = vmatprep.subr.bf16.mxu0 %v1998_v48 }
  0x40   : > { %1414 = vmatprep.subr.bf16.mxu1 %v2004_v49 }
  0x42   : > { %1393 = vmatpush3.bf16.msra.mxu0 %v2010_v50 }
  0x43   : > { %1415 = vmatpush3.bf16.msra.mxu1 %v2016_v51  ;;  %1394 = vmatprep.subr.bf16.mxu0 %v2022_v52 }
  0x44   : > { %1416 = vmatprep.subr.bf16.mxu1 %v2028_v53 }
  0x46   : > { %1395 = vmatpush3.bf16.msra.mxu0 %v2034_v54 }
  0x47   : > { %1417 = vmatpush3.bf16.msra.mxu1 %v2040_v55  ;;  %1576 = vmatprep.subr.bf16.mxu0 %v1741_v58 }
  0x48   : > { %1429 = vmatprep.subr.bf16.mxu1 %v1854_v24 }
  0x49   : > { %607 = vmatmul.mubr.bf16.vlgmr.msra.gmra.mxu0 %v1685_v56 }
  0x4a   : > { %648 = vmatmul.mubr.bf16.vlgmr.msra.gmra.mxu1 %v1688_v59  ;;  %1577 = vmatpush3.bf16.msra.mxu0 %v2055_v61 }
  0x4b   : > { %1430 = vmatpush3.bf16.msra.mxu1 %v1865_v26  ;;  %1578 = vmatprep.subr.bf16.mxu0 %v1741_v58 }
  0x4c   : > { %1431 = vmatprep.subr.bf16.mxu1 %v1877_v28  ;;  %1584 = vmatprep.mubr.msk.bf16.mxu0 %vm1742_vm0, %v1741_v58 }
  0x4d   : > { %764 = vmatprep.mubr.bf16.mxu1 %v1698_v63 }
  0x4e   : > { %1579 = vmatpush3.bf16.msra.mxu0 %v2061_v62 }
  0x4f   : > { %1432 = vmatpush3.bf16.msra.mxu1 %v1889_v30  ;;  %1580 = vmatprep.subr.bf16.mxu0 %v1741_v58 }
  0x50   : > { %1433 = vmatprep.subr.bf16.mxu1 %v1901_v32 }
  0x52   : > { %1581 = vmatpush3.bf16.msra.mxu0 %v2073_v0 }
  0x53   : > { %1434 = vmatpush3.bf16.msra.mxu1 %v1913_v34  ;;  %1582 = vmatprep.subr.bf16.mxu0 %v1741_v58 }
  0x54   : > { %1435 = vmatprep.subr.bf16.mxu1 %v1925_v36 }
  0x56   : > { %1583 = vmatpush3.bf16.msra.mxu0 %v2082_v1 }
  0x57   : > { %1436 = vmatpush3.bf16.msra.mxu1 %v1937_v38  ;;  %1451 = vmatprep.subr.bf16.mxu0 %v1859_v25 }
  0x58   : > { %1437 = vmatprep.subr.bf16.mxu1 %v1949_v40 }
  0x59   : > { %1585 = vmatmul.mubr.msk.bf16.vlgmr.msra.gmra.mxu0 %vm570_vm1, %v1695_v2 }
  0x5a   : > { %1452 = vmatpush3.bf16.msra.mxu0 %v1871_v27  ;;  %805 = vmatprep.mubr.bf16.mxu0 %v1701_v3 }
  0x5b   : > { %1438 = vmatpush3.bf16.msra.mxu1 %v1961_v42  ;;  %1453 = vmatprep.subr.bf16.mxu0 %v1883_v29 }
  0x5c   : > { %1439 = vmatprep.subr.bf16.mxu1 %v1973_v44 }
  0x5e   : > { %1454 = vmatpush3.bf16.msra.mxu0 %v1895_v31 }
  0x5f   : > { %1440 = vmatpush3.bf16.msra.mxu1 %v1985_v46  ;;  %1455 = vmatprep.subr.bf16.mxu0 %v1907_v33 }
  0x60   : > { %1441 = vmatprep.subr.bf16.mxu1 %v1998_v48 }
  0x62   : > { %1456 = vmatpush3.bf16.msra.mxu0 %v1919_v35 }
  0x63   : > { %1442 = vmatpush3.bf16.msra.mxu1 %v2010_v50  ;;  %1457 = vmatprep.subr.bf16.mxu0 %v1931_v37 }
  0x64   : > { %1443 = vmatprep.subr.bf16.mxu1 %v2022_v52 }
  0x66   : > { %1458 = vmatpush3.bf16.msra.mxu0 %v1943_v39 }
  0x67   : > { %1444 = vmatpush3.bf16.msra.mxu1 %v2034_v54  ;;  %1459 = vmatprep.subr.bf16.mxu0 %v1955_v41 }
  0x68   : > { %1588 = vmatprep.subr.bf16.mxu1 %v1741_v58 }
  0x6a   : > { %765 = vmatmul.mubr.bf16.vlgmr.msra.gmra.mxu1 %v1696_v4  ;;  %1460 = vmatpush3.bf16.msra.mxu0 %v1967_v43 }
  0x6b   : > { %1589 = vmatpush3.bf16.msra.mxu1 %v2055_v61  ;;  %1461 = vmatprep.subr.bf16.mxu0 %v1979_v45 }
  0x6c   : > { %1590 = vmatprep.subr.bf16.mxu1 %v1741_v58  ;;  %1596 = vmatprep.mubr.msk.bf16.mxu1 %vm1742_vm0, %v1741_v58 }
  0x6e   : > { %1462 = vmatpush3.bf16.msra.mxu0 %v1992_v47 }
  0x6f   : > { %1591 = vmatpush3.bf16.msra.mxu1 %v2061_v62  ;;  %1463 = vmatprep.subr.bf16.mxu0 %v2004_v49 }
  0x70   : > { %1592 = vmatprep.subr.bf16.mxu1 %v1741_v58 }
  0x72   : > { %1464 = vmatpush3.bf16.msra.mxu0 %v2016_v51 }
  0x73   : > { %1593 = vmatpush3.bf16.msra.mxu1 %v2073_v0  ;;  %1465 = vmatprep.subr.bf16.mxu0 %v2028_v53 }
  0x74   : > { %1594 = vmatprep.subr.bf16.mxu1 %v1741_v58 }
  0x76   : > { %1466 = vmatpush3.bf16.msra.mxu0 %v2040_v55 }
  0x77   : > { %1595 = vmatpush3.bf16.msra.mxu1 %v2082_v1  ;;  %1478 = vmatprep.subr.bf16.mxu0 %v1854_v24 }
  0x78   : > { %1500 = vmatprep.subr.bf16.mxu1 %v1859_v25 }
  0x79   : > { %806 = vmatmul.mubr.bf16.vlgmr.msra.gmra.mxu0 %v1699_v5 }
  0x7a   : > { %1597 = vmatmul.mubr.msk.bf16.vlgmr.msra.gmra.mxu1 %vm570_vm1, %v1702_v6  ;;  %1479 = vmatpush3.bf16.msra.mxu0 %v1865_v26 }
  0x7b   : > { %1501 = vmatpush3.bf16.msra.mxu1 %v1871_v27  ;;  %1480 = vmatprep.subr.bf16.mxu0 %v1877_v28 }
  0x7c   : > { %1502 = vmatprep.subr.bf16.mxu1 %v1883_v29  ;;  %924 = vmatprep.mubr.bf16.mxu0 %v1705_v7 }
  0x7d   : > { %965 = vmatprep.mubr.bf16.mxu1 %v1708_v8 }
  0x7e   : > { %1481 = vmatpush3.bf16.msra.mxu0 %v1889_v30 }
  0x7f   : > { %1503 = vmatpush3.bf16.msra.mxu1 %v1895_v31  ;;  %1482 = vmatprep.subr.bf16.mxu0 %v1901_v32 }
  0x80   : > { %1504 = vmatprep.subr.bf16.mxu1 %v1907_v33 }
  0x82   : > { %1483 = vmatpush3.bf16.msra.mxu0 %v1913_v34 }
  0x83   : > { %1505 = vmatpush3.bf16.msra.mxu1 %v1919_v35  ;;  %1484 = vmatprep.subr.bf16.mxu0 %v1925_v36 }
  0x84   : > { %1506 = vmatprep.subr.bf16.mxu1 %v1931_v37 }
  0x86   : > { %1485 = vmatpush3.bf16.msra.mxu0 %v1937_v38 }
  0x87   : > { %1507 = vmatpush3.bf16.msra.mxu1 %v1943_v39  ;;  %1486 = vmatprep.subr.bf16.mxu0 %v1949_v40 }
  0x88   : > { %1508 = vmatprep.subr.bf16.mxu1 %v1955_v41 }
  0x8a   : > { %1487 = vmatpush3.bf16.msra.mxu0 %v1961_v42 }
  0x8b   : > { %1509 = vmatpush3.bf16.msra.mxu1 %v1967_v43  ;;  %1488 = vmatprep.subr.bf16.mxu0 %v1973_v44 }
  0x8c   : > { %1510 = vmatprep.subr.bf16.mxu1 %v1979_v45 }
  0x8e   : > { %1489 = vmatpush3.bf16.msra.mxu0 %v1985_v46 }
  0x8f   : > { %1511 = vmatpush3.bf16.msra.mxu1 %v1992_v47  ;;  %1490 = vmatprep.subr.bf16.mxu0 %v1998_v48 }
  0x90   : > { %1512 = vmatprep.subr.bf16.mxu1 %v2004_v49 }
  0x92   : > { %1491 = vmatpush3.bf16.msra.mxu0 %v2010_v50 }
  0x93   : > { %1513 = vmatpush3.bf16.msra.mxu1 %v2016_v51  ;;  %1492 = vmatprep.subr.bf16.mxu0 %v2022_v52 }
  0x94   : > { %1514 = vmatprep.subr.bf16.mxu1 %v2028_v53 }
  0x96   : > { %1493 = vmatpush3.bf16.msra.mxu0 %v2034_v54 }
  0x97   : > { %1515 = vmatpush3.bf16.msra.mxu1 %v2040_v55  ;;  %1600 = vmatprep.subr.bf16.mxu0 %v1741_v58 }
  0x98   : > { %1527 = vmatprep.subr.bf16.mxu1 %v1854_v24 }
  0x99   : > { %925 = vmatmul.mubr.bf16.vlgmr.msra.gmra.mxu0 %v1703_v9 }
  0x9a   : > { %966 = vmatmul.mubr.bf16.vlgmr.msra.gmra.mxu1 %v1706_v10  ;;  %1601 = vmatpush3.bf16.msra.mxu0 %v2055_v61 }
  0x9b   : > { %1528 = vmatpush3.bf16.msra.mxu1 %v1865_v26  ;;  %1602 = vmatprep.subr.bf16.mxu0 %v1741_v58 }
  0x9c   : > { %1529 = vmatprep.subr.bf16.mxu1 %v1877_v28  ;;  %1608 = vmatprep.mubr.msk.bf16.mxu0 %vm1742_vm0, %v1741_v58 }
  0x9d   : > { %1084 = vmatprep.mubr.bf16.mxu1 %v1712_v11 }
  0x9e   : > { %1603 = vmatpush3.bf16.msra.mxu0 %v2061_v62 }
  0x9f   : > { %1530 = vmatpush3.bf16.msra.mxu1 %v1889_v30  ;;  %1604 = vmatprep.subr.bf16.mxu0 %v1741_v58 }
  0xa0   : > { %1531 = vmatprep.subr.bf16.mxu1 %v1901_v32 }
  0xa2   : > { %1605 = vmatpush3.bf16.msra.mxu0 %v2073_v0 }
  0xa3   : > { %1532 = vmatpush3.bf16.msra.mxu1 %v1913_v34  ;;  %1606 = vmatprep.subr.bf16.mxu0 %v1741_v58 }
  0xa4   : > { %1533 = vmatprep.subr.bf16.mxu1 %v1925_v36 }
  0xa6   : > { %1607 = vmatpush3.bf16.msra.mxu0 %v2082_v1 }
  0xa7   : > { %1534 = vmatpush3.bf16.msra.mxu1 %v1937_v38  ;;  %1549 = vmatprep.subr.bf16.mxu0 %v1859_v25 }
  0xa8   : > { %1535 = vmatprep.subr.bf16.mxu1 %v1949_v40 }
  0xa9   : > { %1609 = vmatmul.mubr.msk.bf16.vlgmr.msra.gmra.mxu0 %vm570_vm1, %v1709_v12 }
  0xaa   : > { %1550 = vmatpush3.bf16.msra.mxu0 %v1871_v27  ;;  %1125 = vmatprep.mubr.bf16.mxu0 %v1715_v13 }
  0xab   : > { %1536 = vmatpush3.bf16.msra.mxu1 %v1961_v42  ;;  %1551 = vmatprep.subr.bf16.mxu0 %v1883_v29 }
  0xac   : > { %1537 = vmatprep.subr.bf16.mxu1 %v1973_v44 }
  0xae   : > { %1552 = vmatpush3.bf16.msra.mxu0 %v1895_v31 }
  0xaf   : > { %1538 = vmatpush3.bf16.msra.mxu1 %v1985_v46  ;;  %1553 = vmatprep.subr.bf16.mxu0 %v1907_v33 }
  0xb0   : > { %1539 = vmatprep.subr.bf16.mxu1 %v1998_v48 }
  0xb2   : > { %1554 = vmatpush3.bf16.msra.mxu0 %v1919_v35 }
  0xb3   : > { %1540 = vmatpush3.bf16.msra.mxu1 %v2010_v50  ;;  %1555 = vmatprep.subr.bf16.mxu0 %v1931_v37 }
  0xb4   : > { %1541 = vmatprep.subr.bf16.mxu1 %v2022_v52 }
  0xb6   : > { %1556 = vmatpush3.bf16.msra.mxu0 %v1943_v39 }
  0xb7   : > { %1542 = vmatpush3.bf16.msra.mxu1 %v2034_v54  ;;  %1557 = vmatprep.subr.bf16.mxu0 %v1955_v41 }
  0xb8   : > { %1612 = vmatprep.subr.bf16.mxu1 %v1741_v58 }
  0xba   : > { %1085 = vmatmul.mubr.bf16.vlgmr.msra.gmra.mxu1 %v1710_v14  ;;  %1558 = vmatpush3.bf16.msra.mxu0 %v1967_v43 }
  0xbb   : > { %1613 = vmatpush3.bf16.msra.mxu1 %v2055_v61  ;;  %1559 = vmatprep.subr.bf16.mxu0 %v1979_v45 }
  0xbc   : > { %1614 = vmatprep.subr.bf16.mxu1 %v1741_v58  ;;  %1620 = vmatprep.mubr.msk.bf16.mxu1 %vm1742_vm0, %v1741_v58 }
  0xbe   : > { %1560 = vmatpush3.bf16.msra.mxu0 %v1992_v47 }
  0xbf   : > { %1615 = vmatpush3.bf16.msra.mxu1 %v2061_v62  ;;  %1561 = vmatprep.subr.bf16.mxu0 %v2004_v49 }
  0xc0   : > { %1616 = vmatprep.subr.bf16.mxu1 %v1741_v58 }
  0xc2   : > { %1562 = vmatpush3.bf16.msra.mxu0 %v2016_v51 }
  0xc3   : > { %1617 = vmatpush3.bf16.msra.mxu1 %v2073_v0  ;;  %1563 = vmatprep.subr.bf16.mxu0 %v2028_v53 }
  0xc4   : > { %1618 = vmatprep.subr.bf16.mxu1 %v1741_v58 }
  0xc6   : > { %1564 = vmatpush3.bf16.msra.mxu0 %v2040_v55 }
  0xc7   : > { %1619 = vmatpush3.bf16.msra.mxu1 %v2082_v1 }
  0xc9   : > { %1126 = vmatmul.mubr.bf16.vlgmr.msra.gmra.mxu0 %v1713_v15 }
  0xca   : > { %1621 = vmatmul.mubr.msk.bf16.vlgmr.msra.gmra.mxu1 %vm570_vm1, %v1716_v16 }
 0x109   : > { %v1396_v17 = vpop.f32.mrf.mxu0 }
 0x10a   : > { %v1418_v18 = vpop.f32.mrf.mxu1 }
 0x10b   : > { %v1397_v19 = vpop.f32.mrf.mxu0 }
 0x10c   : > { %v1398_v20 = vadd.f32 %v1397_v19, %v1396_v17  ;;  %v1419_v21 = vpop.f32.mrf.mxu1 }
 0x10d   : > { %v1420_v22 = vadd.f32 %v1419_v21, %v1418_v18  ;;  %v1399_v23 = vpop.f32.mrf.mxu0 }
 0x10e   : > { %v1421_v24 = vpop.f32.mrf.mxu1 }
 0x10f   : > { %v1400_v25 = vpop.f32.mrf.mxu0  ;;  %v650_v26 = vadd.f32 %v1420_v22, %v1398_v20 }
 0x110   : > { %v1401_v27 = vadd.f32 %v1400_v25, %v1399_v23  ;;  %v1422_v28 = vpop.f32.mrf.mxu1 }
 0x111   : > { %v1423_v29 = vadd.f32 %v1422_v28, %v1421_v24 }
 0x113   : > { %v653_v30 = vadd.f32 %v1423_v29, %v1401_v27 }
 0x119   : > { %v690_v31 = vpop.f32.mrf.mxu0 }
 0x11a   : > { %v691_v32 = vadd.f32 %v690_v31, %v650_v26 }
 0x11b   : > { %v1586_v33 = vpop.f32.mrf.mxu0 }
 0x11d   : > { %v693_v34 = vpop.f32.mrf.mxu0 }
 0x11e   : > { %v2226_v35 = vadd.f32 %v693_v34, %v653_v30 }
 0x11f   : > { %v1587_v36 = vpop.f32.mrf.mxu0 }
 0x120   : > { %v1368_v36 = vld [vmem:[%s2249_s2] ss:$0 sm:$0xff] }
 0x12a   : > { %v1445_v37 = vpop.f32.mrf.mxu1 }
 0x12c   : > { %v1446_v38 = vpop.f32.mrf.mxu1 }
 0x12d   : > { %v1447_v39 = vadd.f32 %v1446_v38, %v1445_v37 }
 0x12e   : > { %v1448_v40 = vpop.f32.mrf.mxu1 }
 0x130   : > { %v1449_v41 = vpop.f32.mrf.mxu1 }
 0x131   : > { %v1450_v42 = vadd.f32 %v1449_v41, %v1448_v40 }
 0x139   : > { %v1467_v43 = vpop.f32.mrf.mxu0 }
 0x13a   : > { %v848_v44 = vpop.f32.mrf.mxu1 }
 0x13b   : > { %v1468_v45 = vpop.f32.mrf.mxu0 }
 0x13c   : > { %v1469_v46 = vadd.f32 %v1468_v45, %v1467_v43  ;;  %v1598_v47 = vpop.f32.mrf.mxu1 }
 0x13d   : > { %v1470_v48 = vpop.f32.mrf.mxu0 }
 0x13e   : > { %v808_v49 = vadd.f32 %v1469_v46, %v1447_v39  ;;  %v851_v50 = vpop.f32.mrf.mxu1 }
 0x13f   : > { %v1471_v51 = vpop.f32.mrf.mxu0 }
 0x140   : > { %v849_v52 = vadd.f32 %v848_v44, %v808_v49  ;;  %v1472_v53 = vadd.f32 %v1471_v51, %v1470_v48  ;;  %v1599_v54 = vpop.f32.mrf.mxu1 }
 0x142   : > { %v811_v55 = vadd.f32 %v1472_v53, %v1450_v42  ;;  %v855_v56 = vmax.f32 %v691_v32, %v849_v52 }
 0x144   : > { %v852_v57 = vadd.f32 %v851_v50, %v811_v55 }
 0x146   : > { %v856_v58 = vmax.f32 %v2226_v35, %v852_v57 }
 0x159   : > { %v1494_v59 = vpop.f32.mrf.mxu0 }
 0x15a   : > { %v1516_v2 = vpop.f32.mrf.mxu1 }
 0x15b   : > { %v1495_v60 = vpop.f32.mrf.mxu0 }
 0x15c   : > { %v1517_v4 = vpop.f32.mrf.mxu1  ;;  %v1496_v10 = vadd.f32 %v1495_v60, %v1494_v59 }
 0x15d   : > { %v1497_v61 = vpop.f32.mrf.mxu0  ;;  %v1518_v11 = vadd.f32 %v1517_v4, %v1516_v2 }
 0x15e   : > { %v1519_v5 = vpop.f32.mrf.mxu1 }
 0x15f   : > { %v1498_v62 = vpop.f32.mrf.mxu0  ;;  %v968_v13 = vadd.f32 %v1518_v11, %v1496_v10 }
 0x160   : > { %v1520_v6 = vpop.f32.mrf.mxu1  ;;  %v1499_v15 = vadd.f32 %v1498_v62, %v1497_v61 }
 0x161   : > { %v1521_v16 = vadd.f32 %v1520_v6, %v1519_v5 }
 0x163   : > { %v971_v24 = vadd.f32 %v1521_v16, %v1499_v15 }
 0x169   : > { %v1008_v63 = vpop.f32.mrf.mxu0 }
 0x16a   : > { %v1009_v18 = vadd.f32 %v1008_v63, %v968_v13 }
 0x16b   : > { %v1610_v0 = vpop.f32.mrf.mxu0 }
 0x16c   : > { %v1015_v27 = vmax.f32 %v855_v56, %v1009_v18 }
 0x16d   : > { %v1011_v1 = vpop.f32.mrf.mxu0 }
 0x16e   : > { %v1012_v29 = vadd.f32 %v1011_v1, %v971_v24 }
 0x16f   : > { %v1611_v3 = vpop.f32.mrf.mxu0 }
 0x170   : > { %v1016_v37 = vmax.f32 %v856_v58, %v1012_v29 }
 0x17a   : > { %v1543_v7 = vpop.f32.mrf.mxu1 }
 0x17c   : > { %v1544_v8 = vpop.f32.mrf.mxu1 }
 0x17d   : > { %v1545_v20 = vadd.f32 %v1544_v8, %v1543_v7 }
 0x17e   : > { %v1546_v9 = vpop.f32.mrf.mxu1 }
 0x180   : > { %v1547_v12 = vpop.f32.mrf.mxu1 }
 0x181   : > { %v1548_v30 = vadd.f32 %v1547_v12, %v1546_v9 }
 0x189   : > { %v1565_v14 = vpop.f32.mrf.mxu0 }
 0x18a   : > { %v1168_v17 = vpop.f32.mrf.mxu1 }
 0x18b   : > { %v1566_v19 = vpop.f32.mrf.mxu0 }
 0x18c   : > { %v1567_v21 = vadd.f32 %v1566_v19, %v1565_v14  ;;  %v1622_v22 = vpop.f32.mrf.mxu1 }
 0x18d   : > { %v1568_v23 = vpop.f32.mrf.mxu0 }
 0x18e   : > { %v1128_v25 = vadd.f32 %v1567_v21, %v1545_v20  ;;  %v1171_v26 = vpop.f32.mrf.mxu1 }
 0x18f   : > { %v1569_v28 = vpop.f32.mrf.mxu0 }
 0x190   : > { %v1169_v31 = vadd.f32 %v1168_v17, %v1128_v25  ;;  %v1570_v32 = vadd.f32 %v1569_v28, %v1568_v23  ;;  %v1623_v33 = vpop.f32.mrf.mxu1 }
 0x192   : > { %v1175_v34 = vmax.f32 %v1015_v27, %v1169_v31  ;;  %v1131_v35 = vadd.f32 %v1570_v32, %v1548_v30 }
 0x194   : > { %v1172_v38 = vadd.f32 %v1171_v26, %v1131_v35  ;;  %v1184_v39 = vadd.f32 %v1368_v36, %v1175_v34 }
 0x196   : > { %v1176_v40 = vmax.f32 %v1016_v37, %v1172_v38  ;;  %v1186_v42 = vmax.f32 %v1184_v39, 0.0 }
 0x198   : > { %v1185_v41 = vadd.f32 %v1368_v36, %v1176_v40 }
 0x19a   : > { %v1187_v43 = vmax.f32 %v1185_v41, 0.0 }
 0x19c   : > { %v1378_v44 = vpack.c.bf16 %v1187_v43, %v1186_v42 }
 0x19e   : > { %1379 = vst [vmem:[%s248_s20] sm:$0xff] %v1378_v44  }
 0x19f PF: > { %p10_p9 = scmp.ge.s32.totalorder %s1780_s16, 4   ;;  %s2251_s12 = smov %s1735_s13 }
 0x1a0   : > { %s2252_s13 = smov %s1789_s19  ;;  %s2253_s14 = smov %s1780_s16 }
 0x1a1   :  { %12 = sbr.rel (!%p10_p9) target bundleno = 2 (0x2), region = 102 }

// kernel: traffic_sign_cnn_forward.7
= control target key start
LH: loop header
LB: loop body
LE: loop exit
PB: predicated region body
PF: predicated region fallthrough
CT: control target
= control target key end

     0   :  { %s5922_s18 = smov 0   ;;  %s7731_s0 = inlined_call_operand.vmem [shape: bf16[16,2048], index: 0, kind: input, shape index: {}]   ;;  %s7732_s1 = inlined_call_operand.vmem [shape: bf16[2048,512], index: 1, kind: input, shape index: {}]   ;;  %s7733_s2 = inlined_call_operand.vmem [shape: f32[1,512], index: 2, kind: input, shape index: {}]   ;;  %s7734_s3 = inlined_call_operand.vmem [shape: bf16[512,128], index: 3, kind: input, shape index: {}]   ;;  %s7735_s4 = inlined_call_operand.vmem [shape: f32[1,128], index: 4, kind: input, shape index: {}]   ;;  %s7736_s5 = inlined_call_operand.vmem [shape: f32[16,128], index: 5, kind: output, shape index: {}]  }
   0x1 LB: > { %s4443_s19 = sadd.s32 4294967295, %s5890_s18   ;;  %p4447_p0 = scmp.ge.s32.totalorder %s5890_s18, 1  ;;  %s5890_s18 = sphi %s5922_s18, %s15_s18  }
   0x2   : > { %p187_p1 = scmp.lt.s32.totalorder %s5890_s18, 3 }
   0x4   : > { %p188_p2 = pnand %p4447_p0, %p187_p1 }
   0x5   : > { %p214_p3 = scmp.lt.s32.totalorder (!%p188_p2), %s4443_s19, 1 }
   0x6   : > { %191 = sbr.rel (%p188_p2) target bundleno = 928 (0x3a0), region = 40 }
   0xb   : > { %v5067_v0 = vld [vmem:[%s7732_s1 + $0xe4] ss:$16 sps:$4 sm:$0xff]   ;;  %v5071_v2 = vld [vmem:[%s7732_s1 + $0xe0] ss:$16 sps:$4 sm:$0xff]   ;;  %s7738_s19 = smov (!%p214_p3, %s4443_s19), 1 }
   0xc   : > { %v5069_v1 = vld [vmem:[%s7732_s1 + $0x2e4] ss:$16 sps:$4 sm:$0xff]   ;;  %3382 = vmatprep.subr.bf16.mxu0 %v5067_v0  ;;  %v5072_v3 = vld [vmem:[%s7732_s1 + $0x2e0] ss:$16 sps:$4 sm:$0xff]   ;;  %s5014_s8 = sshll.u32 %s7738_s19, 6  ;;  %s4450_s27 = sshll.u32 %s7738_s19, 3 }
   0xd   : > { %3423 = vmatprep.subr.bf16.mxu1 %v5069_v1  ;;  %v5073_v4 = vld [vmem:[%s7732_s1 + $0xc4] ss:$16 sps:$4 sm:$0xff]   ;;  %3383 = vmatpush1.bf16.msra.mxu0 %v5071_v2  ;;  %v5077_v6 = vld [vmem:[%s7732_s1 + $0xc0] ss:$16 sps:$4 sm:$0xff]   ;;  %s6072_s17 = scalar_lea.vmem %s7731_s0, %s5014_s8  ;;  %s222_s30 = scalar_lea.vmem %s7736_s5, %s4450_s27 }
   0xe   : > { %3424 = vmatpush1.bf16.msra.mxu1 %v5072_v3  ;;  %v5075_v5 = vld [vmem:[%s7732_s1 + $0x2c4] ss:$16 sps:$4 sm:$0xff]   ;;  %3384 = vmatprep.subr.bf16.mxu0 %v5073_v4  ;;  %v5078_v7 = vld [vmem:[%s7732_s1 + $0x2c0] ss:$16 sps:$4 sm:$0xff]   ;;  %v225_v48 = vld [vmem:[%s6072_s17 + $0x8] sm:$0xff] }
   0xf   : > { %3425 = vmatprep.subr.bf16.mxu1 %v5075_v5  ;;  %v5079_v8 = vld [vmem:[%s7732_s1 + $0xa4] ss:$16 sps:$4 sm:$0xff]   ;;  %v5083_v10 = vld [vmem:[%s7732_s1 + $0xa0] ss:$16 sps:$4 sm:$0xff]   ;;  %v6090_v51 = vcombine.high %v225_v48, %v225_v48 }
  0x10   : > { %v5081_v9 = vld [vmem:[%s7732_s1 + $0x2a4] ss:$16 sps:$4 sm:$0xff]   ;;  %v5084_v11 = vld [vmem:[%s7732_s1 + $0x2a0] ss:$16 sps:$4 sm:$0xff]  }
  0x11   : > { %3385 = vmatpush1.bf16.msra.mxu0 %v5077_v6  ;;  %v5085_v12 = vld [vmem:[%s7732_s1 + $0x84] ss:$16 sps:$4 sm:$0xff]   ;;  %v5089_v14 = vld [vmem:[%s7732_s1 + $0x80] ss:$16 sps:$4 sm:$0xff]   ;;  %3455 = vmatprep.mubr.bf16.mxu1 %v6090_v51 }
  0x12   : > { %3426 = vmatpush1.bf16.msra.mxu1 %v5078_v7  ;;  %3386 = vmatprep.subr.bf16.mxu0 %v5079_v8  ;;  %v5087_v13 = vld [vmem:[%s7732_s1 + $0x284] ss:$16 sps:$4 sm:$0xff]   ;;  %v5090_v15 = vld [vmem:[%s7732_s1 + $0x280] ss:$16 sps:$4 sm:$0xff]   ;;  %v6150_v7 = vcombine.low %v225_v48, %v225_v48 }
  0x13   : > { %3427 = vmatprep.subr.bf16.mxu1 %v5081_v9  ;;  %v5091_v16 = vld [vmem:[%s7732_s1 + $0x64] ss:$16 sps:$4 sm:$0xff]   ;;  %v5095_v18 = vld [vmem:[%s7732_s1 + $0x60] ss:$16 sps:$4 sm:$0xff]  }
  0x14   : > { %v5093_v17 = vld [vmem:[%s7732_s1 + $0x264] ss:$16 sps:$4 sm:$0xff]   ;;  %v5096_v19 = vld [vmem:[%s7732_s1 + $0x260] ss:$16 sps:$4 sm:$0xff]  }
  0x15   : > { %3387 = vmatpush1.bf16.msra.mxu0 %v5083_v10  ;;  %v5097_v20 = vld [vmem:[%s7732_s1 + $0x44] ss:$16 sps:$4 sm:$0xff]   ;;  %v5101_v22 = vld [vmem:[%s7732_s1 + $0x40] ss:$16 sps:$4 sm:$0xff]  }
  0x16   : > { %3428 = vmatpush1.bf16.msra.mxu1 %v5084_v11  ;;  %3388 = vmatprep.subr.bf16.mxu0 %v5085_v12  ;;  %v5099_v21 = vld [vmem:[%s7732_s1 + $0x244] ss:$16 sps:$4 sm:$0xff]   ;;  %v5102_v23 = vld [vmem:[%s7732_s1 + $0x240] ss:$16 sps:$4 sm:$0xff]  }
  0x17   : > { %3429 = vmatprep.subr.bf16.mxu1 %v5087_v13  ;;  %v5103_v24 = vld [vmem:[%s7732_s1 + $0x24] ss:$16 sps:$4 sm:$0xff]   ;;  %v5107_v26 = vld [vmem:[%s7732_s1 + $0x20] ss:$16 sps:$4 sm:$0xff]  }
  0x18   : > { %v5105_v25 = vld [vmem:[%s7732_s1 + $0x224] ss:$16 sps:$4 sm:$0xff]   ;;  %v5108_v27 = vld [vmem:[%s7732_s1 + $0x220] ss:$16 sps:$4 sm:$0xff]  }
  0x19   : > { %3389 = vmatpush1.bf16.msra.mxu0 %v5089_v14  ;;  %v5109_v28 = vld [vmem:[%s7732_s1 + $0x4] ss:$16 sps:$4 sm:$0xff]   ;;  %v5113_v30 = vld [vmem:[%s7732_s1] ss:$16 sps:$4 sm:$0xff]  }
  0x1a   : > { %3430 = vmatpush1.bf16.msra.mxu1 %v5090_v15  ;;  %3390 = vmatprep.subr.bf16.mxu0 %v5091_v16  ;;  %v5111_v29 = vld [vmem:[%s7732_s1 + $0x204] ss:$16 sps:$4 sm:$0xff]   ;;  %v5114_v31 = vld [vmem:[%s7732_s1 + $0x200] ss:$16 sps:$4 sm:$0xff]  }
  0x1b   : > { %3431 = vmatprep.subr.bf16.mxu1 %v5093_v17  ;;  %v5115_v32 = vld [vmem:[%s7732_s1 + $0x1e4] ss:$16 sps:$4 sm:$0xff]   ;;  %v5119_v34 = vld [vmem:[%s7732_s1 + $0x1e0] ss:$16 sps:$4 sm:$0xff]  }
  0x1c   : > { %v5117_v33 = vld [vmem:[%s7732_s1 + $0x3e4] ss:$16 sps:$4 sm:$0xff]   ;;  %v5120_v35 = vld [vmem:[%s7732_s1 + $0x3e0] ss:$16 sps:$4 sm:$0xff]  }
  0x1d   : > { %3391 = vmatpush1.bf16.msra.mxu0 %v5095_v18  ;;  %v5121_v36 = vld [vmem:[%s7732_s1 + $0x1c4] ss:$16 sps:$4 sm:$0xff]   ;;  %v5125_v38 = vld [vmem:[%s7732_s1 + $0x1c0] ss:$16 sps:$4 sm:$0xff]  }
  0x1e   : > { %3432 = vmatpush1.bf16.msra.mxu1 %v5096_v19  ;;  %3392 = vmatprep.subr.bf16.mxu0 %v5097_v20  ;;  %v5123_v37 = vld [vmem:[%s7732_s1 + $0x3c4] ss:$16 sps:$4 sm:$0xff]   ;;  %v5126_v39 = vld [vmem:[%s7732_s1 + $0x3c0] ss:$16 sps:$4 sm:$0xff]  }
  0x1f   : > { %3433 = vmatprep.subr.bf16.mxu1 %v5099_v21  ;;  %v5127_v40 = vld [vmem:[%s7732_s1 + $0x1a4] ss:$16 sps:$4 sm:$0xff]   ;;  %v5131_v42 = vld [vmem:[%s7732_s1 + $0x1a0] ss:$16 sps:$4 sm:$0xff]  }
  0x20   : > { %v5129_v41 = vld [vmem:[%s7732_s1 + $0x3a4] ss:$16 sps:$4 sm:$0xff]   ;;  %v5132_v43 = vld [vmem:[%s7732_s1 + $0x3a0] ss:$16 sps:$4 sm:$0xff]  }
  0x21   : > { %3393 = vmatpush1.bf16.msra.mxu0 %v5101_v22  ;;  %v5133_v44 = vld [vmem:[%s7732_s1 + $0x184] ss:$16 sps:$4 sm:$0xff]   ;;  %v5137_v49 = vld [vmem:[%s7732_s1 + $0x180] ss:$16 sps:$4 sm:$0xff]  }
  0x22   : > { %3434 = vmatpush1.bf16.msra.mxu1 %v5102_v23  ;;  %3394 = vmatprep.subr.bf16.mxu0 %v5103_v24  ;;  %v5135_v45 = vld [vmem:[%s7732_s1 + $0x384] ss:$16 sps:$4 sm:$0xff]   ;;  %v5138_v50 = vld [vmem:[%s7732_s1 + $0x380] ss:$16 sps:$4 sm:$0xff]  }
  0x23   : > { %3435 = vmatprep.subr.bf16.mxu1 %v5105_v25  ;;  %v224_v46 = vld [vmem:[%s6072_s17] sm:$0xff] }
  0x24   : > { %v6081_v47 = vcombine.high %v224_v46, %v224_v46  ;;  %v5139_v52 = vld [vmem:[%s7732_s1 + $0x164] ss:$16 sps:$4 sm:$0xff]   ;;  %v5143_v54 = vld [vmem:[%s7732_s1 + $0x160] ss:$16 sps:$4 sm:$0xff]   ;;  %v6148_v6 = vcombine.low %v224_v46, %v224_v46 }
  0x25   : > { %3395 = vmatpush1.bf16.msra.mxu0 %v5107_v26  ;;  %v5141_v53 = vld [vmem:[%s7732_s1 + $0x364] ss:$16 sps:$4 sm:$0xff]   ;;  %v5144_v55 = vld [vmem:[%s7732_s1 + $0x360] ss:$16 sps:$4 sm:$0xff]  }
  0x26   : > { %3436 = vmatpush1.bf16.msra.mxu1 %v5108_v27  ;;  %3396 = vmatprep.subr.bf16.mxu0 %v5109_v28  ;;  %v5145_v56 = vld [vmem:[%s7732_s1 + $0x144] ss:$16 sps:$4 sm:$0xff]   ;;  %v5149_v58 = vld [vmem:[%s7732_s1 + $0x140] ss:$16 sps:$4 sm:$0xff]  }
  0x27   : > { %3437 = vmatprep.subr.bf16.mxu1 %v5111_v29  ;;  %3414 = vmatprep.mubr.bf16.mxu0 %v6081_v47  ;;  %v5147_v57 = vld [vmem:[%s7732_s1 + $0x344] ss:$16 sps:$4 sm:$0xff]   ;;  %v5150_v59 = vld [vmem:[%s7732_s1 + $0x340] ss:$16 sps:$4 sm:$0xff]  }
  0x28   : > { %v5151_v60 = vld [vmem:[%s7732_s1 + $0x124] ss:$16 sps:$4 sm:$0xff]   ;;  %v5155_v62 = vld [vmem:[%s7732_s1 + $0x120] ss:$16 sps:$4 sm:$0xff]  }
  0x29   : > { %3397 = vmatpush1.bf16.msra.mxu0 %v5113_v30  ;;  %v5153_v61 = vld [vmem:[%s7732_s1 + $0x324] ss:$16 sps:$4 sm:$0xff]   ;;  %v5156_v63 = vld [vmem:[%s7732_s1 + $0x320] ss:$16 sps:$4 sm:$0xff]  }
  0x2a   : > { %3438 = vmatpush1.bf16.msra.mxu1 %v5114_v31  ;;  %3398 = vmatprep.subr.bf16.mxu0 %v5115_v32  ;;  %v5157_v0 = vld [vmem:[%s7732_s1 + $0x104] ss:$16 sps:$4 sm:$0xff]   ;;  %v5161_v2 = vld [vmem:[%s7732_s1 + $0x100] ss:$16 sps:$4 sm:$0xff]  }
  0x2b   : > { %3439 = vmatprep.subr.bf16.mxu1 %v5117_v33  ;;  %v5159_v1 = vld [vmem:[%s7732_s1 + $0x304] ss:$16 sps:$4 sm:$0xff]   ;;  %v5162_v3 = vld [vmem:[%s7732_s1 + $0x300] ss:$16 sps:$4 sm:$0xff]   ;;  %v6230_v33 = vld [vmem:[%s6072_s17 + $0x18] sm:$0xff] }
  0x2c   : > { %v5169_v4 = vld [vmem:[%s7732_s1 + $0x4e4] ss:$16 sps:$4 sm:$0xff]   ;;  %v5167_v8 = vld [vmem:[%s7732_s1 + $0x4e0] ss:$16 sps:$4 sm:$0xff]  }
  0x2d   : > { %3399 = vmatpush2.bf16.msra.mxu0 %v5119_v34  ;;  %v5172_v5 = vld [vmem:[%s7732_s1 + $0x6e4] ss:$16 sps:$4 sm:$0xff]   ;;  %v5170_v9 = vld [vmem:[%s7732_s1 + $0x6e0] ss:$16 sps:$4 sm:$0xff]  }
  0x2e   : > { %3440 = vmatpush2.bf16.msra.mxu1 %v5120_v35  ;;  %3400 = vmatprep.subr.bf16.mxu0 %v5121_v36  ;;  %v5175_v10 = vld [vmem:[%s7732_s1 + $0x4c4] ss:$16 sps:$4 sm:$0xff]   ;;  %v5173_v12 = vld [vmem:[%s7732_s1 + $0x4c0] ss:$16 sps:$4 sm:$0xff]  }
  0x2f   : > { %3441 = vmatprep.subr.bf16.mxu1 %v5123_v37  ;;  %v5178_v11 = vld [vmem:[%s7732_s1 + $0x6c4] ss:$16 sps:$4 sm:$0xff]   ;;  %v5176_v13 = vld [vmem:[%s7732_s1 + $0x6c0] ss:$16 sps:$4 sm:$0xff]   ;;  %v6244_v37 = vcombine.high %v6230_v33, %v6230_v33 }
  0x30   : > { %v5181_v14 = vld [vmem:[%s7732_s1 + $0x4a4] ss:$16 sps:$4 sm:$0xff]   ;;  %v5179_v16 = vld [vmem:[%s7732_s1 + $0x4a0] ss:$16 sps:$4 sm:$0xff]  }
  0x31   : > { %3401 = vmatpush2.bf16.msra.mxu0 %v5125_v38  ;;  %v5184_v15 = vld [vmem:[%s7732_s1 + $0x6a4] ss:$16 sps:$4 sm:$0xff]   ;;  %v5182_v17 = vld [vmem:[%s7732_s1 + $0x6a0] ss:$16 sps:$4 sm:$0xff]  }
  0x32   : > { %3442 = vmatpush2.bf16.msra.mxu1 %v5126_v39  ;;  %3402 = vmatprep.subr.bf16.mxu0 %v5127_v40  ;;  %v5187_v18 = vld [vmem:[%s7732_s1 + $0x484] ss:$16 sps:$4 sm:$0xff]   ;;  %v5185_v20 = vld [vmem:[%s7732_s1 + $0x480] ss:$16 sps:$4 sm:$0xff]  }
  0x33   : > { %3443 = vmatprep.subr.bf16.mxu1 %v5129_v41  ;;  %v5190_v19 = vld [vmem:[%s7732_s1 + $0x684] ss:$16 sps:$4 sm:$0xff]   ;;  %v5188_v21 = vld [vmem:[%s7732_s1 + $0x680] ss:$16 sps:$4 sm:$0xff]  }
  0x34   : > { %v5193_v22 = vld [vmem:[%s7732_s1 + $0x464] ss:$16 sps:$4 sm:$0xff]   ;;  %v5191_v24 = vld [vmem:[%s7732_s1 + $0x460] ss:$16 sps:$4 sm:$0xff]  }
  0x35   : > { %3403 = vmatpush2.bf16.msra.mxu0 %v5131_v42  ;;  %v5196_v23 = vld [vmem:[%s7732_s1 + $0x664] ss:$16 sps:$4 sm:$0xff]   ;;  %v5194_v25 = vld [vmem:[%s7732_s1 + $0x660] ss:$16 sps:$4 sm:$0xff]  }
  0x36   : > { %3444 = vmatpush2.bf16.msra.mxu1 %v5132_v43  ;;  %3404 = vmatprep.subr.bf16.mxu0 %v5133_v44  ;;  %v5199_v26 = vld [vmem:[%s7732_s1 + $0x444] ss:$16 sps:$4 sm:$0xff]   ;;  %v5197_v28 = vld [vmem:[%s7732_s1 + $0x440] ss:$16 sps:$4 sm:$0xff]  }
  0x37   : > { %3445 = vmatprep.subr.bf16.mxu1 %v5135_v45  ;;  %v5202_v27 = vld [vmem:[%s7732_s1 + $0x644] ss:$16 sps:$4 sm:$0xff]   ;;  %v5200_v29 = vld [vmem:[%s7732_s1 + $0x640] ss:$16 sps:$4 sm:$0xff]  }
  0x38   : > { %v5205_v30 = vld [vmem:[%s7732_s1 + $0x424] ss:$16 sps:$4 sm:$0xff]   ;;  %v5203_v34 = vld [vmem:[%s7732_s1 + $0x420] ss:$16 sps:$4 sm:$0xff]  }
  0x39   : > { %3405 = vmatpush2.bf16.msra.mxu0 %v5137_v49  ;;  %v5208_v31 = vld [vmem:[%s7732_s1 + $0x624] ss:$16 sps:$4 sm:$0xff]   ;;  %v5206_v35 = vld [vmem:[%s7732_s1 + $0x620] ss:$16 sps:$4 sm:$0xff]  }
  0x3a   : > { %3446 = vmatpush2.bf16.msra.mxu1 %v5138_v50  ;;  %3406 = vmatprep.subr.bf16.mxu0 %v5139_v52  ;;  %v6227_v32 = vld [vmem:[%s6072_s17 + $0x10] sm:$0xff] }
  0x3b   : > { %3447 = vmatprep.subr.bf16.mxu1 %v5141_v53  ;;  %v6240_v36 = vcombine.high %v6227_v32, %v6227_v32  ;;  %v5211_v38 = vld [vmem:[%s7732_s1 + $0x404] ss:$16 sps:$4 sm:$0xff]   ;;  %v5209_v40 = vld [vmem:[%s7732_s1 + $0x400] ss:$16 sps:$4 sm:$0xff]  }
  0x3c   : > { %v5214_v39 = vld [vmem:[%s7732_s1 + $0x604] ss:$16 sps:$4 sm:$0xff]   ;;  %v5212_v41 = vld [vmem:[%s7732_s1 + $0x600] ss:$16 sps:$4 sm:$0xff]  }
  0x3d   : > { %3407 = vmatpush2.bf16.msra.mxu0 %v5143_v54  ;;  %v5217_v42 = vld [vmem:[%s7732_s1 + $0x5e4] ss:$16 sps:$4 sm:$0xff]   ;;  %v5215_v44 = vld [vmem:[%s7732_s1 + $0x5e0] ss:$16 sps:$4 sm:$0xff]  }
  0x3e   : > { %3448 = vmatpush2.bf16.msra.mxu1 %v5144_v55  ;;  %3408 = vmatprep.subr.bf16.mxu0 %v5145_v56  ;;  %v5220_v43 = vld [vmem:[%s7732_s1 + $0x7e4] ss:$16 sps:$4 sm:$0xff]   ;;  %v5218_v45 = vld [vmem:[%s7732_s1 + $0x7e0] ss:$16 sps:$4 sm:$0xff]  }
  0x3f   : > { %3449 = vmatprep.subr.bf16.mxu1 %v5147_v57  ;;  %v5223_v46 = vld [vmem:[%s7732_s1 + $0x5c4] ss:$16 sps:$4 sm:$0xff]   ;;  %v5221_v49 = vld [vmem:[%s7732_s1 + $0x5c0] ss:$16 sps:$4 sm:$0xff]  }
  0x40   : > { %v5226_v48 = vld [vmem:[%s7732_s1 + $0x7c4] ss:$16 sps:$4 sm:$0xff]   ;;  %v5224_v50 = vld [vmem:[%s7732_s1 + $0x7c0] ss:$16 sps:$4 sm:$0xff]  }
  0x41   : > { %3409 = vmatpush2.bf16.msra.mxu0 %v5149_v58  ;;  %v5229_v52 = vld [vmem:[%s7732_s1 + $0x5a4] ss:$16 sps:$4 sm:$0xff]   ;;  %v5227_v54 = vld [vmem:[%s7732_s1 + $0x5a0] ss:$16 sps:$4 sm:$0xff]  }
  0x42   : > { %3450 = vmatpush2.bf16.msra.mxu1 %v5150_v59  ;;  %3410 = vmatprep.subr.bf16.mxu0 %v5151_v60  ;;  %v5232_v53 = vld [vmem:[%s7732_s1 + $0x7a4] ss:$16 sps:$4 sm:$0xff]   ;;  %v5230_v55 = vld [vmem:[%s7732_s1 + $0x7a0] ss:$16 sps:$4 sm:$0xff]  }
  0x43   : > { %3451 = vmatprep.subr.bf16.mxu1 %v5153_v61  ;;  %v5235_v56 = vld [vmem:[%s7732_s1 + $0x584] ss:$16 sps:$4 sm:$0xff]   ;;  %v5233_v58 = vld [vmem:[%s7732_s1 + $0x580] ss:$16 sps:$4 sm:$0xff]  }
  0x44   : > { %v5238_v57 = vld [vmem:[%s7732_s1 + $0x784] ss:$16 sps:$4 sm:$0xff]   ;;  %v5236_v59 = vld [vmem:[%s7732_s1 + $0x780] ss:$16 sps:$4 sm:$0xff]  }
  0x45   : > { %3411 = vmatpush2.bf16.msra.mxu0 %v5155_v62  ;;  %v5241_v60 = vld [vmem:[%s7732_s1 + $0x564] ss:$16 sps:$4 sm:$0xff]   ;;  %v5239_v62 = vld [vmem:[%s7732_s1 + $0x560] ss:$16 sps:$4 sm:$0xff]  }
  0x46   : > { %3452 = vmatpush2.bf16.msra.mxu1 %v5156_v63  ;;  %3412 = vmatprep.subr.bf16.mxu0 %v5157_v0  ;;  %v5244_v61 = vld [vmem:[%s7732_s1 + $0x764] ss:$16 sps:$4 sm:$0xff]   ;;  %v5242_v63 = vld [vmem:[%s7732_s1 + $0x760] ss:$16 sps:$4 sm:$0xff]  }
  0x47   : > { %3453 = vmatprep.subr.bf16.mxu1 %v5159_v1  ;;  %v5247_v0 = vld [vmem:[%s7732_s1 + $0x544] ss:$16 sps:$4 sm:$0xff]  }
  0x48   : > { %v5250_v1 = vld [vmem:[%s7732_s1 + $0x744] ss:$16 sps:$4 sm:$0xff]  }
  0x49   : > { %3413 = vmatpush2.bf16.msra.mxu0 %v5161_v2  ;;  %v5245_v2 = vld [vmem:[%s7732_s1 + $0x540] ss:$16 sps:$4 sm:$0xff]  }
  0x4a   : > { %3454 = vmatpush2.bf16.msra.mxu1 %v5162_v3  ;;  %3464 = vmatprep.subr.bf16.mxu0 %v5169_v4  ;;  %v5248_v3 = vld [vmem:[%s7732_s1 + $0x740] ss:$16 sps:$4 sm:$0xff]   ;;  %v5253_v4 = vld [vmem:[%s7732_s1 + $0x524] ss:$16 sps:$4 sm:$0xff]  }
  0x4b   : > { %3505 = vmatprep.subr.bf16.mxu1 %v5172_v5  ;;  %v5256_v5 = vld [vmem:[%s7732_s1 + $0x724] ss:$16 sps:$4 sm:$0xff]  }
  0x4c   : > { %3415 = vmatmul.mubr.bf16.vlgmr.msra.gmra.mxu0 %v6148_v6 }
  0x4d   : > { %3456 = vmatmul.mubr.bf16.vlgmr.msra.gmra.mxu1 %v6150_v7  ;;  %3465 = vmatpush1.bf16.msra.mxu0 %v5167_v8  ;;  %v5251_v8 = vld [vmem:[%s7732_s1 + $0x520] ss:$16 sps:$4 sm:$0xff]  }
  0x4e   : > { %3506 = vmatpush1.bf16.msra.mxu1 %v5170_v9  ;;  %3466 = vmatprep.subr.bf16.mxu0 %v5175_v10  ;;  %v5254_v9 = vld [vmem:[%s7732_s1 + $0x720] ss:$16 sps:$4 sm:$0xff]   ;;  %v5259_v10 = vld [vmem:[%s7732_s1 + $0x504] ss:$16 sps:$4 sm:$0xff]  }
  0x4f   : > { %3507 = vmatprep.subr.bf16.mxu1 %v5178_v11  ;;  %3496 = vmatprep.mubr.bf16.mxu0 %v6240_v36  ;;  %v5262_v11 = vld [vmem:[%s7732_s1 + $0x704] ss:$16 sps:$4 sm:$0xff]  }
  0x50   : > { %3537 = vmatprep.mubr.bf16.mxu1 %v6244_v37 }
  0x51   : > { %3467 = vmatpush1.bf16.msra.mxu0 %v5173_v12  ;;  %v5257_v12 = vld [vmem:[%s7732_s1 + $0x500] ss:$16 sps:$4 sm:$0xff]  }
  0x52   : > { %3508 = vmatpush1.bf16.msra.mxu1 %v5176_v13  ;;  %3468 = vmatprep.subr.bf16.mxu0 %v5181_v14  ;;  %v5260_v13 = vld [vmem:[%s7732_s1 + $0x700] ss:$16 sps:$4 sm:$0xff]   ;;  %v5269_v14 = vld [vmem:[%s7732_s1 + $0x8e4] ss:$16 sps:$4 sm:$0xff]  }
  0x53   : > { %3509 = vmatprep.subr.bf16.mxu1 %v5184_v15  ;;  %v5272_v15 = vld [vmem:[%s7732_s1 + $0xae4] ss:$16 sps:$4 sm:$0xff]  }
  0x55   : > { %3469 = vmatpush1.bf16.msra.mxu0 %v5179_v16  ;;  %v6364_v16 = vcombine.low %v6227_v32, %v6227_v32  ;;  %v5287_v32 = vld [vmem:[%s7732_s1 + $0x884] ss:$16 sps:$4 sm:$0xff]  }
  0x56   : > { %3510 = vmatpush1.bf16.msra.mxu1 %v5182_v17  ;;  %3470 = vmatprep.subr.bf16.mxu0 %v5187_v18  ;;  %v6368_v17 = vcombine.low %v6230_v33, %v6230_v33  ;;  %v5267_v18 = vld [vmem:[%s7732_s1 + $0x8e0] ss:$16 sps:$4 sm:$0xff]   ;;  %v5290_v33 = vld [vmem:[%s7732_s1 + $0xa84] ss:$16 sps:$4 sm:$0xff]  }
  0x57   : > { %3511 = vmatprep.subr.bf16.mxu1 %v5190_v19  ;;  %v5270_v19 = vld [vmem:[%s7732_s1 + $0xae0] ss:$16 sps:$4 sm:$0xff]  }
  0x59   : > { %3471 = vmatpush1.bf16.msra.mxu0 %v5185_v20  ;;  %v5275_v20 = vld [vmem:[%s7732_s1 + $0x8c4] ss:$16 sps:$4 sm:$0xff]  }
  0x5a   : > { %3512 = vmatpush1.bf16.msra.mxu1 %v5188_v21  ;;  %3472 = vmatprep.subr.bf16.mxu0 %v5193_v22  ;;  %v5278_v21 = vld [vmem:[%s7732_s1 + $0xac4] ss:$16 sps:$4 sm:$0xff]  }
  0x5b   : > { %3513 = vmatprep.subr.bf16.mxu1 %v5196_v23  ;;  %v6383_v22 = vld [vmem:[%s6072_s17 + $0x20] sm:$0xff]  ;;  %v6386_v23 = vld [vmem:[%s6072_s17 + $0x28] sm:$0xff] }
  0x5d   : > { %3473 = vmatpush1.bf16.msra.mxu0 %v5191_v24  ;;  %v6390_v24 = vcombine.high %v6383_v22, %v6383_v22 }
  0x5e   : > { %3514 = vmatpush1.bf16.msra.mxu1 %v5194_v25  ;;  %3474 = vmatprep.subr.bf16.mxu0 %v5199_v26  ;;  %v6394_v25 = vcombine.high %v6386_v23, %v6386_v23  ;;  %v5273_v26 = vld [vmem:[%s7732_s1 + $0x8c0] ss:$16 sps:$4 sm:$0xff]  }
  0x5f   : > { %3515 = vmatprep.subr.bf16.mxu1 %v5202_v27  ;;  %v5276_v27 = vld [vmem:[%s7732_s1 + $0xac0] ss:$16 sps:$4 sm:$0xff]  }
  0x61   : > { %3475 = vmatpush1.bf16.msra.mxu0 %v5197_v28  ;;  %v5281_v28 = vld [vmem:[%s7732_s1 + $0x8a4] ss:$16 sps:$4 sm:$0xff]  }
  0x62   : > { %3516 = vmatpush1.bf16.msra.mxu1 %v5200_v29  ;;  %3476 = vmatprep.subr.bf16.mxu0 %v5205_v30  ;;  %v5284_v29 = vld [vmem:[%s7732_s1 + $0xaa4] ss:$16 sps:$4 sm:$0xff]   ;;  %v5279_v30 = vld [vmem:[%s7732_s1 + $0x8a0] ss:$16 sps:$4 sm:$0xff]  }
  0x63   : > { %3517 = vmatprep.subr.bf16.mxu1 %v5208_v31  ;;  %v5282_v31 = vld [vmem:[%s7732_s1 + $0xaa0] ss:$16 sps:$4 sm:$0xff]  }
  0x65   : > { %3477 = vmatpush1.bf16.msra.mxu0 %v5203_v34  ;;  %v5285_v34 = vld [vmem:[%s7732_s1 + $0x880] ss:$16 sps:$4 sm:$0xff]  }
  0x66   : > { %3518 = vmatpush1.bf16.msra.mxu1 %v5206_v35  ;;  %3478 = vmatprep.subr.bf16.mxu0 %v5211_v38  ;;  %v5288_v35 = vld [vmem:[%s7732_s1 + $0xa80] ss:$16 sps:$4 sm:$0xff]   ;;  %v5293_v38 = vld [vmem:[%s7732_s1 + $0x864] ss:$16 sps:$4 sm:$0xff]  }
  0x67   : > { %3519 = vmatprep.subr.bf16.mxu1 %v5214_v39  ;;  %v5296_v39 = vld [vmem:[%s7732_s1 + $0xa64] ss:$16 sps:$4 sm:$0xff]  }
  0x69   : > { %3479 = vmatpush1.bf16.msra.mxu0 %v5209_v40  ;;  %v5291_v40 = vld [vmem:[%s7732_s1 + $0x860] ss:$16 sps:$4 sm:$0xff]  }
  0x6a   : > { %3520 = vmatpush1.bf16.msra.mxu1 %v5212_v41  ;;  %3480 = vmatprep.subr.bf16.mxu0 %v5217_v42  ;;  %v5294_v41 = vld [vmem:[%s7732_s1 + $0xa60] ss:$16 sps:$4 sm:$0xff]   ;;  %v5299_v42 = vld [vmem:[%s7732_s1 + $0x844] ss:$16 sps:$4 sm:$0xff]  }
  0x6b   : > { %3521 = vmatprep.subr.bf16.mxu1 %v5220_v43  ;;  %v5302_v43 = vld [vmem:[%s7732_s1 + $0xa44] ss:$16 sps:$4 sm:$0xff]  }
  0x6d   : > { %3481 = vmatpush2.bf16.msra.mxu0 %v5215_v44  ;;  %v5297_v44 = vld [vmem:[%s7732_s1 + $0x840] ss:$16 sps:$4 sm:$0xff]  }
  0x6e   : > { %3522 = vmatpush2.bf16.msra.mxu1 %v5218_v45  ;;  %3482 = vmatprep.subr.bf16.mxu0 %v5223_v46  ;;  %v5300_v45 = vld [vmem:[%s7732_s1 + $0xa40] ss:$16 sps:$4 sm:$0xff]   ;;  %v5305_v46 = vld [vmem:[%s7732_s1 + $0x824] ss:$16 sps:$4 sm:$0xff]  }
  0x6f   : > { %3523 = vmatprep.subr.bf16.mxu1 %v5226_v48  ;;  %v5308_v48 = vld [vmem:[%s7732_s1 + $0xa24] ss:$16 sps:$4 sm:$0xff]  }
  0x71   : > { %3483 = vmatpush2.bf16.msra.mxu0 %v5221_v49  ;;  %v5303_v49 = vld [vmem:[%s7732_s1 + $0x820] ss:$16 sps:$4 sm:$0xff]  }
  0x72   : > { %3524 = vmatpush2.bf16.msra.mxu1 %v5224_v50  ;;  %3484 = vmatprep.subr.bf16.mxu0 %v5229_v52  ;;  %v5306_v50 = vld [vmem:[%s7732_s1 + $0xa20] ss:$16 sps:$4 sm:$0xff]   ;;  %v5311_v52 = vld [vmem:[%s7732_s1 + $0x804] ss:$16 sps:$4 sm:$0xff]  }
  0x73   : > { %3525 = vmatprep.subr.bf16.mxu1 %v5232_v53  ;;  %v5314_v53 = vld [vmem:[%s7732_s1 + $0xa04] ss:$16 sps:$4 sm:$0xff]  }
  0x75   : > { %3485 = vmatpush2.bf16.msra.mxu0 %v5227_v54  ;;  %v5309_v54 = vld [vmem:[%s7732_s1 + $0x800] ss:$16 sps:$4 sm:$0xff]  }
  0x76   : > { %3526 = vmatpush2.bf16.msra.mxu1 %v5230_v55  ;;  %3486 = vmatprep.subr.bf16.mxu0 %v5235_v56  ;;  %v5312_v55 = vld [vmem:[%s7732_s1 + $0xa00] ss:$16 sps:$4 sm:$0xff]   ;;  %v5317_v56 = vld [vmem:[%s7732_s1 + $0x9e4] ss:$16 sps:$4 sm:$0xff]  }
  0x77   : > { %3527 = vmatprep.subr.bf16.mxu1 %v5238_v57  ;;  %v5320_v57 = vld [vmem:[%s7732_s1 + $0xbe4] ss:$16 sps:$4 sm:$0xff]  }
  0x79   : > { %3487 = vmatpush2.bf16.msra.mxu0 %v5233_v58  ;;  %v5315_v58 = vld [vmem:[%s7732_s1 + $0x9e0] ss:$16 sps:$4 sm:$0xff]  }
  0x7a   : > { %3528 = vmatpush2.bf16.msra.mxu1 %v5236_v59  ;;  %3488 = vmatprep.subr.bf16.mxu0 %v5241_v60  ;;  %v5318_v59 = vld [vmem:[%s7732_s1 + $0xbe0] ss:$16 sps:$4 sm:$0xff]   ;;  %v5323_v60 = vld [vmem:[%s7732_s1 + $0x9c4] ss:$16 sps:$4 sm:$0xff]  }
  0x7b   : > { %3529 = vmatprep.subr.bf16.mxu1 %v5244_v61  ;;  %v5326_v61 = vld [vmem:[%s7732_s1 + $0xbc4] ss:$16 sps:$4 sm:$0xff]  }
  0x7d   : > { %3489 = vmatpush2.bf16.msra.mxu0 %v5239_v62  ;;  %v5321_v62 = vld [vmem:[%s7732_s1 + $0x9c0] ss:$16 sps:$4 sm:$0xff]  }
  0x7e   : > { %3530 = vmatpush2.bf16.msra.mxu1 %v5242_v63  ;;  %3490 = vmatprep.subr.bf16.mxu0 %v5247_v0  ;;  %v5324_v63 = vld [vmem:[%s7732_s1 + $0xbc0] ss:$16 sps:$4 sm:$0xff]   ;;  %v5329_v0 = vld [vmem:[%s7732_s1 + $0x9a4] ss:$16 sps:$4 sm:$0xff]  }
  0x7f   : > { %3531 = vmatprep.subr.bf16.mxu1 %v5250_v1  ;;  %v5332_v1 = vld [vmem:[%s7732_s1 + $0xba4] ss:$16 sps:$4 sm:$0xff]  }
  0x81   : > { %3491 = vmatpush2.bf16.msra.mxu0 %v5245_v2  ;;  %v5327_v2 = vld [vmem:[%s7732_s1 + $0x9a0] ss:$16 sps:$4 sm:$0xff]  }
  0x82   : > { %3532 = vmatpush2.bf16.msra.mxu1 %v5248_v3  ;;  %3492 = vmatprep.subr.bf16.mxu0 %v5253_v4  ;;  %v5330_v3 = vld [vmem:[%s7732_s1 + $0xba0] ss:$16 sps:$4 sm:$0xff]   ;;  %v5335_v4 = vld [vmem:[%s7732_s1 + $0x984] ss:$16 sps:$4 sm:$0xff]  }
  0x83   : > { %3533 = vmatprep.subr.bf16.mxu1 %v5256_v5  ;;  %v5338_v5 = vld [vmem:[%s7732_s1 + $0xb84] ss:$16 sps:$4 sm:$0xff]  }
  0x85   : > { %3493 = vmatpush2.bf16.msra.mxu0 %v5251_v8  ;;  %v5333_v8 = vld [vmem:[%s7732_s1 + $0x980] ss:$16 sps:$4 sm:$0xff]  }
  0x86   : > { %3534 = vmatpush2.bf16.msra.mxu1 %v5254_v9  ;;  %3494 = vmatprep.subr.bf16.mxu0 %v5259_v10  ;;  %v5336_v9 = vld [vmem:[%s7732_s1 + $0xb80] ss:$16 sps:$4 sm:$0xff]   ;;  %v5341_v10 = vld [vmem:[%s7732_s1 + $0x964] ss:$16 sps:$4 sm:$0xff]  }
  0x87   : > { %3535 = vmatprep.subr.bf16.mxu1 %v5262_v11  ;;  %v5344_v11 = vld [vmem:[%s7732_s1 + $0xb64] ss:$16 sps:$4 sm:$0xff]  }
  0x89   : > { %3495 = vmatpush2.bf16.msra.mxu0 %v5257_v12  ;;  %v5339_v12 = vld [vmem:[%s7732_s1 + $0x960] ss:$16 sps:$4 sm:$0xff]  }
  0x8a   : > { %3536 = vmatpush2.bf16.msra.mxu1 %v5260_v13  ;;  %3546 = vmatprep.subr.bf16.mxu0 %v5269_v14  ;;  %v5342_v13 = vld [vmem:[%s7732_s1 + $0xb60] ss:$16 sps:$4 sm:$0xff]   ;;  %v5347_v14 = vld [vmem:[%s7732_s1 + $0x944] ss:$16 sps:$4 sm:$0xff]  }
  0x8b   : > { %3587 = vmatprep.subr.bf16.mxu1 %v5272_v15  ;;  %v5350_v15 = vld [vmem:[%s7732_s1 + $0xb44] ss:$16 sps:$4 sm:$0xff]  }
  0x8c   : > { %3497 = vmatmul.mubr.bf16.vlgmr.msra.gmra.mxu0 %v6364_v16 }
  0x8d   : > { %3538 = vmatmul.mubr.bf16.vlgmr.msra.gmra.mxu1 %v6368_v17  ;;  %3547 = vmatpush1.bf16.msra.mxu0 %v5267_v18  ;;  %v5345_v18 = vld [vmem:[%s7732_s1 + $0x940] ss:$16 sps:$4 sm:$0xff]  }
  0x8e   : > { %3588 = vmatpush1.bf16.msra.mxu1 %v5270_v19  ;;  %3548 = vmatprep.subr.bf16.mxu0 %v5275_v20  ;;  %v5348_v19 = vld [vmem:[%s7732_s1 + $0xb40] ss:$16 sps:$4 sm:$0xff]   ;;  %v5353_v20 = vld [vmem:[%s7732_s1 + $0x924] ss:$16 sps:$4 sm:$0xff]  }
  0x8f   : > { %3589 = vmatprep.subr.bf16.mxu1 %v5278_v21  ;;  %3578 = vmatprep.mubr.bf16.mxu0 %v6390_v24  ;;  %v5356_v21 = vld [vmem:[%s7732_s1 + $0xb24] ss:$16 sps:$4 sm:$0xff]  }
  0x90   : > { %3619 = vmatprep.mubr.bf16.mxu1 %v6394_v25 }
  0x91   : > { %3549 = vmatpush1.bf16.msra.mxu0 %v5273_v26  ;;  %v5351_v26 = vld [vmem:[%s7732_s1 + $0x920] ss:$16 sps:$4 sm:$0xff]  }
  0x92   : > { %3590 = vmatpush1.bf16.msra.mxu1 %v5276_v27  ;;  %3550 = vmatprep.subr.bf16.mxu0 %v5281_v28  ;;  %v5354_v27 = vld [vmem:[%s7732_s1 + $0xb20] ss:$16 sps:$4 sm:$0xff]   ;;  %v5359_v28 = vld [vmem:[%s7732_s1 + $0x904] ss:$16 sps:$4 sm:$0xff]  }
  0x93   : > { %3591 = vmatprep.subr.bf16.mxu1 %v5284_v29  ;;  %v5362_v29 = vld [vmem:[%s7732_s1 + $0xb04] ss:$16 sps:$4 sm:$0xff]  }
  0x95   : > { %3551 = vmatpush1.bf16.msra.mxu0 %v5279_v30  ;;  %v5357_v30 = vld [vmem:[%s7732_s1 + $0x900] ss:$16 sps:$4 sm:$0xff]  }
  0x96   : > { %3592 = vmatpush1.bf16.msra.mxu1 %v5282_v31  ;;  %3552 = vmatprep.subr.bf16.mxu0 %v5287_v32  ;;  %v5360_v31 = vld [vmem:[%s7732_s1 + $0xb00] ss:$16 sps:$4 sm:$0xff]   ;;  %v5369_v32 = vld [vmem:[%s7732_s1 + $0xce4] ss:$16 sps:$4 sm:$0xff]  }
  0x97   : > { %3593 = vmatprep.subr.bf16.mxu1 %v5290_v33  ;;  %v5372_v33 = vld [vmem:[%s7732_s1 + $0xee4] ss:$16 sps:$4 sm:$0xff]  }
  0x99   : > { %3553 = vmatpush1.bf16.msra.mxu0 %v5285_v34  ;;  %v5367_v34 = vld [vmem:[%s7732_s1 + $0xce0] ss:$16 sps:$4 sm:$0xff]  }
  0x9a   : > { %3594 = vmatpush1.bf16.msra.mxu1 %v5288_v35  ;;  %3554 = vmatprep.subr.bf16.mxu0 %v5293_v38  ;;  %v6584_v35 = vld [vmem:[%s6072_s17 + $0x30] sm:$0xff]  ;;  %v6588_v38 = vcombine.low %v6383_v22, %v6383_v22 }
  0x9b   : > { %3595 = vmatprep.subr.bf16.mxu1 %v5296_v39  ;;  %v6592_v39 = vcombine.low %v6386_v23, %v6386_v23  ;;  %v5378_v22 = vld [vmem:[%s7732_s1 + $0xec4] ss:$16 sps:$4 sm:$0xff]   ;;  %v6608_v23 = vcombine.high %v6584_v35, %v6584_v35 }
  0x9d   : > { %3555 = vmatpush1.bf16.msra.mxu0 %v5291_v40  ;;  %v6595_v40 = vld [vmem:[%s6072_s17 + $0x38] sm:$0xff] }
  0x9e   : > { %3596 = vmatpush1.bf16.msra.mxu1 %v5294_v41  ;;  %3556 = vmatprep.subr.bf16.mxu0 %v5299_v42  ;;  %v5370_v41 = vld [vmem:[%s7732_s1 + $0xee0] ss:$16 sps:$4 sm:$0xff]   ;;  %v5375_v42 = vld [vmem:[%s7732_s1 + $0xcc4] ss:$16 sps:$4 sm:$0xff]  }
  0x9f   : > { %3597 = vmatprep.subr.bf16.mxu1 %v5302_v43  ;;  %v6612_v43 = vcombine.high %v6595_v40, %v6595_v40 }
  0xa1   : > { %3557 = vmatpush1.bf16.msra.mxu0 %v5297_v44  ;;  %v5373_v44 = vld [vmem:[%s7732_s1 + $0xcc0] ss:$16 sps:$4 sm:$0xff]  }
  0xa2   : > { %3598 = vmatpush1.bf16.msra.mxu1 %v5300_v45  ;;  %3558 = vmatprep.subr.bf16.mxu0 %v5305_v46  ;;  %v5376_v45 = vld [vmem:[%s7732_s1 + $0xec0] ss:$16 sps:$4 sm:$0xff]   ;;  %v5381_v46 = vld [vmem:[%s7732_s1 + $0xca4] ss:$16 sps:$4 sm:$0xff]  }
  0xa3   : > { %3599 = vmatprep.subr.bf16.mxu1 %v5308_v48  ;;  %v5384_v48 = vld [vmem:[%s7732_s1 + $0xea4] ss:$16 sps:$4 sm:$0xff]  }
  0xa5   : > { %3559 = vmatpush1.bf16.msra.mxu0 %v5303_v49  ;;  %v5379_v49 = vld [vmem:[%s7732_s1 + $0xca0] ss:$16 sps:$4 sm:$0xff]  }
  0xa6   : > { %3600 = vmatpush1.bf16.msra.mxu1 %v5306_v50  ;;  %3560 = vmatprep.subr.bf16.mxu0 %v5311_v52  ;;  %v5382_v50 = vld [vmem:[%s7732_s1 + $0xea0] ss:$16 sps:$4 sm:$0xff]   ;;  %v5387_v52 = vld [vmem:[%s7732_s1 + $0xc84] ss:$16 sps:$4 sm:$0xff]  }
  0xa7   : > { %3601 = vmatprep.subr.bf16.mxu1 %v5314_v53  ;;  %v5390_v53 = vld [vmem:[%s7732_s1 + $0xe84] ss:$16 sps:$4 sm:$0xff]  }
  0xa9   : > { %3561 = vmatpush1.bf16.msra.mxu0 %v5309_v54  ;;  %v5385_v54 = vld [vmem:[%s7732_s1 + $0xc80] ss:$16 sps:$4 sm:$0xff]  }
  0xaa   : > { %3602 = vmatpush1.bf16.msra.mxu1 %v5312_v55  ;;  %3562 = vmatprep.subr.bf16.mxu0 %v5317_v56  ;;  %v5388_v55 = vld [vmem:[%s7732_s1 + $0xe80] ss:$16 sps:$4 sm:$0xff]   ;;  %v5393_v56 = vld [vmem:[%s7732_s1 + $0xc64] ss:$16 sps:$4 sm:$0xff]  }
  0xab   : > { %3603 = vmatprep.subr.bf16.mxu1 %v5320_v57  ;;  %v5396_v57 = vld [vmem:[%s7732_s1 + $0xe64] ss:$16 sps:$4 sm:$0xff]  }
  0xad   : > { %3563 = vmatpush2.bf16.msra.mxu0 %v5315_v58  ;;  %v5391_v58 = vld [vmem:[%s7732_s1 + $0xc60] ss:$16 sps:$4 sm:$0xff]  }
  0xae   : > { %3604 = vmatpush2.bf16.msra.mxu1 %v5318_v59  ;;  %3564 = vmatprep.subr.bf16.mxu0 %v5323_v60  ;;  %v5394_v59 = vld [vmem:[%s7732_s1 + $0xe60] ss:$16 sps:$4 sm:$0xff]   ;;  %v5399_v60 = vld [vmem:[%s7732_s1 + $0xc44] ss:$16 sps:$4 sm:$0xff]  }
  0xaf   : > { %3605 = vmatprep.subr.bf16.mxu1 %v5326_v61  ;;  %v5402_v61 = vld [vmem:[%s7732_s1 + $0xe44] ss:$16 sps:$4 sm:$0xff]  }
  0xb1   : > { %3565 = vmatpush2.bf16.msra.mxu0 %v5321_v62  ;;  %v5397_v62 = vld [vmem:[%s7732_s1 + $0xc40] ss:$16 sps:$4 sm:$0xff]  }
  0xb2   : > { %3606 = vmatpush2.bf16.msra.mxu1 %v5324_v63  ;;  %3566 = vmatprep.subr.bf16.mxu0 %v5329_v0  ;;  %v5400_v63 = vld [vmem:[%s7732_s1 + $0xe40] ss:$16 sps:$4 sm:$0xff]   ;;  %v5405_v0 = vld [vmem:[%s7732_s1 + $0xc24] ss:$16 sps:$4 sm:$0xff]  }
  0xb3   : > { %3607 = vmatprep.subr.bf16.mxu1 %v5332_v1  ;;  %v5408_v1 = vld [vmem:[%s7732_s1 + $0xe24] ss:$16 sps:$4 sm:$0xff]  }
  0xb5   : > { %3567 = vmatpush2.bf16.msra.mxu0 %v5327_v2  ;;  %v5403_v2 = vld [vmem:[%s7732_s1 + $0xc20] ss:$16 sps:$4 sm:$0xff]  }
  0xb6   : > { %3608 = vmatpush2.bf16.msra.mxu1 %v5330_v3  ;;  %3568 = vmatprep.subr.bf16.mxu0 %v5335_v4  ;;  %v5406_v3 = vld [vmem:[%s7732_s1 + $0xe20] ss:$16 sps:$4 sm:$0xff]   ;;  %v5411_v4 = vld [vmem:[%s7732_s1 + $0xc04] ss:$16 sps:$4 sm:$0xff]  }
  0xb7   : > { %3609 = vmatprep.subr.bf16.mxu1 %v5338_v5  ;;  %v5414_v5 = vld [vmem:[%s7732_s1 + $0xe04] ss:$16 sps:$4 sm:$0xff]  }
  0xb9   : > { %3569 = vmatpush2.bf16.msra.mxu0 %v5333_v8  ;;  %v5409_v8 = vld [vmem:[%s7732_s1 + $0xc00] ss:$16 sps:$4 sm:$0xff]  }
  0xba   : > { %3610 = vmatpush2.bf16.msra.mxu1 %v5336_v9  ;;  %3570 = vmatprep.subr.bf16.mxu0 %v5341_v10  ;;  %v5412_v9 = vld [vmem:[%s7732_s1 + $0xe00] ss:$16 sps:$4 sm:$0xff]   ;;  %v5417_v10 = vld [vmem:[%s7732_s1 + $0xde4] ss:$16 sps:$4 sm:$0xff]  }
  0xbb   : > { %3611 = vmatprep.subr.bf16.mxu1 %v5344_v11  ;;  %v5420_v11 = vld [vmem:[%s7732_s1 + $0xfe4] ss:$16 sps:$4 sm:$0xff]  }
  0xbd   : > { %3571 = vmatpush2.bf16.msra.mxu0 %v5339_v12  ;;  %v5415_v12 = vld [vmem:[%s7732_s1 + $0xde0] ss:$16 sps:$4 sm:$0xff]  }
  0xbe   : > { %3612 = vmatpush2.bf16.msra.mxu1 %v5342_v13  ;;  %3572 = vmatprep.subr.bf16.mxu0 %v5347_v14  ;;  %v5418_v13 = vld [vmem:[%s7732_s1 + $0xfe0] ss:$16 sps:$4 sm:$0xff]   ;;  %v5423_v14 = vld [vmem:[%s7732_s1 + $0xdc4] ss:$16 sps:$4 sm:$0xff]  }
  0xbf   : > { %3613 = vmatprep.subr.bf16.mxu1 %v5350_v15  ;;  %v5426_v15 = vld [vmem:[%s7732_s1 + $0xfc4] ss:$16 sps:$4 sm:$0xff]  }
  0xc1   : > { %3573 = vmatpush2.bf16.msra.mxu0 %v5345_v18  ;;  %v5421_v18 = vld [vmem:[%s7732_s1 + $0xdc0] ss:$16 sps:$4 sm:$0xff]  }
  0xc2   : > { %3614 = vmatpush2.bf16.msra.mxu1 %v5348_v19  ;;  %3574 = vmatprep.subr.bf16.mxu0 %v5353_v20  ;;  %v5424_v19 = vld [vmem:[%s7732_s1 + $0xfc0] ss:$16 sps:$4 sm:$0xff]   ;;  %v5429_v20 = vld [vmem:[%s7732_s1 + $0xda4] ss:$16 sps:$4 sm:$0xff]  }
  0xc3   : > { %3615 = vmatprep.subr.bf16.mxu1 %v5356_v21  ;;  %v5432_v21 = vld [vmem:[%s7732_s1 + $0xfa4] ss:$16 sps:$4 sm:$0xff]  }
  0xc5   : > { %3575 = vmatpush2.bf16.msra.mxu0 %v5351_v26  ;;  %v5427_v26 = vld [vmem:[%s7732_s1 + $0xda0] ss:$16 sps:$4 sm:$0xff]  }
  0xc6   : > { %3616 = vmatpush2.bf16.msra.mxu1 %v5354_v27  ;;  %3576 = vmatprep.subr.bf16.mxu0 %v5359_v28  ;;  %v5430_v27 = vld [vmem:[%s7732_s1 + $0xfa0] ss:$16 sps:$4 sm:$0xff]   ;;  %v5435_v28 = vld [vmem:[%s7732_s1 + $0xd84] ss:$16 sps:$4 sm:$0xff]  }
  0xc7   : > { %3617 = vmatprep.subr.bf16.mxu1 %v5362_v29  ;;  %v5438_v29 = vld [vmem:[%s7732_s1 + $0xf84] ss:$16 sps:$4 sm:$0xff]  }
  0xc9   : > { %3577 = vmatpush2.bf16.msra.mxu0 %v5357_v30  ;;  %v5433_v30 = vld [vmem:[%s7732_s1 + $0xd80] ss:$16 sps:$4 sm:$0xff]  }
  0xca   : > { %3618 = vmatpush2.bf16.msra.mxu1 %v5360_v31  ;;  %3628 = vmatprep.subr.bf16.mxu0 %v5369_v32  ;;  %v5436_v31 = vld [vmem:[%s7732_s1 + $0xf80] ss:$16 sps:$4 sm:$0xff]   ;;  %v5441_v32 = vld [vmem:[%s7732_s1 + $0xd64] ss:$16 sps:$4 sm:$0xff]  }
  0xcb   : > { %3669 = vmatprep.subr.bf16.mxu1 %v5372_v33  ;;  %v5444_v33 = vld [vmem:[%s7732_s1 + $0xf64] ss:$16 sps:$4 sm:$0xff]  }
  0xcc   : > { %3579 = vmatmul.mubr.bf16.vlgmr.msra.gmra.mxu0 %v6588_v38 }
  0xcd   : > { %3620 = vmatmul.mubr.bf16.vlgmr.msra.gmra.mxu1 %v6592_v39  ;;  %3629 = vmatpush1.bf16.msra.mxu0 %v5367_v34  ;;  %v5439_v34 = vld [vmem:[%s7732_s1 + $0xd60] ss:$16 sps:$4 sm:$0xff]  }
  0xce   : > { %3670 = vmatpush1.bf16.msra.mxu1 %v5370_v41  ;;  %3630 = vmatprep.subr.bf16.mxu0 %v5375_v42  ;;  %v5442_v41 = vld [vmem:[%s7732_s1 + $0xf60] ss:$16 sps:$4 sm:$0xff]   ;;  %v5447_v42 = vld [vmem:[%s7732_s1 + $0xd44] ss:$16 sps:$4 sm:$0xff]  }
  0xcf   : > { %3671 = vmatprep.subr.bf16.mxu1 %v5378_v22  ;;  %3660 = vmatprep.mubr.bf16.mxu0 %v6608_v23  ;;  %v5450_v22 = vld [vmem:[%s7732_s1 + $0xf44] ss:$16 sps:$4 sm:$0xff]  }
  0xd0   : > { %3701 = vmatprep.mubr.bf16.mxu1 %v6612_v43 }
  0xd1   : > { %3631 = vmatpush1.bf16.msra.mxu0 %v5373_v44  ;;  %v5445_v44 = vld [vmem:[%s7732_s1 + $0xd40] ss:$16 sps:$4 sm:$0xff]  }
  0xd2   : > { %3672 = vmatpush1.bf16.msra.mxu1 %v5376_v45  ;;  %3632 = vmatprep.subr.bf16.mxu0 %v5381_v46  ;;  %v5448_v45 = vld [vmem:[%s7732_s1 + $0xf40] ss:$16 sps:$4 sm:$0xff]   ;;  %v746_v46 = vlaneseq }
  0xd3   : > { %3673 = vmatprep.subr.bf16.mxu1 %v5384_v48  ;;  %v5453_v48 = vld [vmem:[%s7732_s1 + $0xd24] ss:$16 sps:$4 sm:$0xff]  }
  0xd5   : > { %3633 = vmatpush1.bf16.msra.mxu0 %v5379_v49  ;;  %v5456_v49 = vld [vmem:[%s7732_s1 + $0xf24] ss:$16 sps:$4 sm:$0xff]  }
  0xd6   : > { %3674 = vmatpush1.bf16.msra.mxu1 %v5382_v50  ;;  %3634 = vmatprep.subr.bf16.mxu0 %v5387_v52  ;;  %v5451_v50 = vld [vmem:[%s7732_s1 + $0xd20] ss:$16 sps:$4 sm:$0xff]  }
  0xd7   : > { %3675 = vmatprep.subr.bf16.mxu1 %v5390_v53  ;;  %v5454_v52 = vld [vmem:[%s7732_s1 + $0xf20] ss:$16 sps:$4 sm:$0xff]   ;;  %v6780_v53 = vshrl.u32 %v746_v46, 7  ;;  %v5500_v46 = vld [vmem:[%s7732_s1 + $0x248] ss:$16 sps:$4 sm:$0xff]  }
  0xd9   : > { %3635 = vmatpush1.bf16.msra.mxu0 %v5385_v54  ;;  %v5459_v54 = vld [vmem:[%s7732_s1 + $0xd04] ss:$16 sps:$4 sm:$0xff]  }
  0xda   : > { %3676 = vmatpush1.bf16.msra.mxu1 %v5388_v55  ;;  %3636 = vmatprep.subr.bf16.mxu0 %v5393_v56  ;;  %v5462_v55 = vld [vmem:[%s7732_s1 + $0xf04] ss:$16 sps:$4 sm:$0xff]   ;;  %v5457_v56 = vld [vmem:[%s7732_s1 + $0xd00] ss:$16 sps:$4 sm:$0xff]  }
  0xdb   : > { %3677 = vmatprep.subr.bf16.mxu1 %v5396_v57  ;;  %v5460_v57 = vld [vmem:[%s7732_s1 + $0xf00] ss:$16 sps:$4 sm:$0xff]  }
  0xdd   : > { %3637 = vmatpush1.bf16.msra.mxu0 %v5391_v58  ;;  %v744_v58 = vld [vmem:[%s7733_s2] sm:$0xf] }
  0xde   : > { %3678 = vmatpush1.bf16.msra.mxu1 %v5394_v59  ;;  %3638 = vmatprep.subr.bf16.mxu0 %v5399_v60  ;;  %v748_v59 = vsub.s32 0, %v6780_v53  ;;  %v5469_v60 = vld [vmem:[%s7732_s1 + $0xec] ss:$16 sps:$4 sm:$0xff]  }
  0xdf   : > { %3679 = vmatprep.subr.bf16.mxu1 %v5402_v61  ;;  %v5472_v61 = vld [vmem:[%s7732_s1 + $0x2ec] ss:$16 sps:$4 sm:$0xff]  }
  0xe1   : > { %3639 = vmatpush1.bf16.msra.mxu0 %v5397_v62  ;;  %v752_v62 = vsub.s32 1, %v6780_v53 }
  0xe2   : > { %3680 = vmatpush1.bf16.msra.mxu1 %v5400_v63  ;;  %3640 = vmatprep.subr.bf16.mxu0 %v5405_v0  ;;  %v6807_v63 = vcombine.low %v6584_v35, %v6584_v35  ;;  %v6811_v0 = vcombine.low %v6595_v40, %v6595_v40  ;;  %v5475_v35 = vld [vmem:[%s7732_s1 + $0xcc] ss:$16 sps:$4 sm:$0xff]  }
  0xe3   : > { %3681 = vmatprep.subr.bf16.mxu1 %v5408_v1  ;;  %v5467_v1 = vld [vmem:[%s7732_s1 + $0xe8] ss:$16 sps:$4 sm:$0xff]   ;;  %v5478_v40 = vld [vmem:[%s7732_s1 + $0x2cc] ss:$16 sps:$4 sm:$0xff]  }
  0xe5   : > { %3641 = vmatpush1.bf16.msra.mxu0 %v5403_v2  ;;  %v749_v2 = vrot.slane %v744_v58, %v748_v59  ;;  %v5520_v59 = vld [vmem:[%s7732_s1 + $0x3ec] ss:$16 sps:$4 sm:$0xff]  }
  0xe6   : > { %3682 = vmatpush1.bf16.msra.mxu1 %v5406_v3  ;;  %3642 = vmatprep.subr.bf16.mxu0 %v5411_v4  ;;  %v5470_v3 = vld [vmem:[%s7732_s1 + $0x2e8] ss:$16 sps:$4 sm:$0xff]   ;;  %v753_v4 = vrot.slane %v744_v58, %v752_v62  ;;  %v5517_v58 = vld [vmem:[%s7732_s1 + $0x1ec] ss:$16 sps:$4 sm:$0xff]  }
  0xe7   : > { %3683 = vmatprep.subr.bf16.mxu1 %v5414_v5  ;;  %v5523_v62 = vld [vmem:[%s7732_s1 + $0x1cc] ss:$16 sps:$4 sm:$0xff]  }
  0xe9   : > { %3643 = vmatpush1.bf16.msra.mxu0 %v5409_v8 }
  0xea   : > { %3684 = vmatpush1.bf16.msra.mxu1 %v5412_v9  ;;  %3644 = vmatprep.subr.bf16.mxu0 %v5417_v10  ;;  %v5473_v9 = vld [vmem:[%s7732_s1 + $0xc8] ss:$16 sps:$4 sm:$0xff]  }
  0xeb   : > { %3685 = vmatprep.subr.bf16.mxu1 %v5420_v11  ;;  %v5476_v11 = vld [vmem:[%s7732_s1 + $0x2c8] ss:$16 sps:$4 sm:$0xff]  }
  0xed   : > { %3645 = vmatpush2.bf16.msra.mxu0 %v5415_v12 }
  0xee   : > { %3686 = vmatpush2.bf16.msra.mxu1 %v5418_v13  ;;  %3646 = vmatprep.subr.bf16.mxu0 %v5423_v14  ;;  %v5481_v14 = vld [vmem:[%s7732_s1 + $0xac] ss:$16 sps:$4 sm:$0xff]  }
  0xef   : > { %3687 = vmatprep.subr.bf16.mxu1 %v5426_v15  ;;  %v5484_v15 = vld [vmem:[%s7732_s1 + $0x2ac] ss:$16 sps:$4 sm:$0xff]  }
  0xf1   : > { %3647 = vmatpush2.bf16.msra.mxu0 %v5421_v18 }
  0xf2   : > { %3688 = vmatpush2.bf16.msra.mxu1 %v5424_v19  ;;  %3648 = vmatprep.subr.bf16.mxu0 %v5429_v20 }
  0xf3   : > { %3689 = vmatprep.subr.bf16.mxu1 %v5432_v21 }
  0xf5   : > { %3649 = vmatpush2.bf16.msra.mxu0 %v5427_v26  ;;  %v5479_v26 = vld [vmem:[%s7732_s1 + $0xa8] ss:$16 sps:$4 sm:$0xff]  }
  0xf6   : > { %3690 = vmatpush2.bf16.msra.mxu1 %v5430_v27  ;;  %3650 = vmatprep.subr.bf16.mxu0 %v5435_v28  ;;  %v5482_v28 = vld [vmem:[%s7732_s1 + $0x2a8] ss:$16 sps:$4 sm:$0xff]  }
  0xf7   : > { %3691 = vmatprep.subr.bf16.mxu1 %v5438_v29 }
  0xf9   : > { %3651 = vmatpush2.bf16.msra.mxu0 %v5433_v30 }
  0xfa   : > { %3692 = vmatpush2.bf16.msra.mxu1 %v5436_v31  ;;  %3652 = vmatprep.subr.bf16.mxu0 %v5441_v32  ;;  %v5485_v31 = vld [vmem:[%s7732_s1 + $0x88] ss:$16 sps:$4 sm:$0xff]  }
  0xfb   : > { %3693 = vmatprep.subr.bf16.mxu1 %v5444_v33  ;;  %v5488_v32 = vld [vmem:[%s7732_s1 + $0x288] ss:$16 sps:$4 sm:$0xff]   ;;  %v5493_v33 = vld [vmem:[%s7732_s1 + $0x6c] ss:$16 sps:$4 sm:$0xff]  }
  0xfd   : > { %3653 = vmatpush2.bf16.msra.mxu0 %v5439_v34  ;;  %v5496_v34 = vld [vmem:[%s7732_s1 + $0x26c] ss:$16 sps:$4 sm:$0xff]  }
  0xfe   : > { %3694 = vmatpush2.bf16.msra.mxu1 %v5442_v41  ;;  %3654 = vmatprep.subr.bf16.mxu0 %v5447_v42  ;;  %v5491_v41 = vld [vmem:[%s7732_s1 + $0x68] ss:$16 sps:$4 sm:$0xff]  }
  0xff   : > { %3695 = vmatprep.subr.bf16.mxu1 %v5450_v22  ;;  %v5494_v42 = vld [vmem:[%s7732_s1 + $0x268] ss:$16 sps:$4 sm:$0xff]   ;;  %v5499_v22 = vld [vmem:[%s7732_s1 + $0x4c] ss:$16 sps:$4 sm:$0xff]  }
 0x101   : > { %3655 = vmatpush2.bf16.msra.mxu0 %v5445_v44  ;;  %v5502_v44 = vld [vmem:[%s7732_s1 + $0x24c] ss:$16 sps:$4 sm:$0xff]  }
 0x102   : > { %3696 = vmatpush2.bf16.msra.mxu1 %v5448_v45  ;;  %3656 = vmatprep.subr.bf16.mxu0 %v5453_v48  ;;  %v5497_v45 = vld [vmem:[%s7732_s1 + $0x48] ss:$16 sps:$4 sm:$0xff]   ;;  %v5505_v48 = vld [vmem:[%s7732_s1 + $0x2c] ss:$16 sps:$4 sm:$0xff]  }
 0x103   : > { %3697 = vmatprep.subr.bf16.mxu1 %v5456_v49  ;;  %v5508_v49 = vld [vmem:[%s7732_s1 + $0x22c] ss:$16 sps:$4 sm:$0xff]  }
 0x105   : > { %3657 = vmatpush2.bf16.msra.mxu0 %v5451_v50  ;;  %v5503_v50 = vld [vmem:[%s7732_s1 + $0x28] ss:$16 sps:$4 sm:$0xff]  }
 0x106   : > { %3698 = vmatpush2.bf16.msra.mxu1 %v5454_v52  ;;  %3658 = vmatprep.subr.bf16.mxu0 %v5459_v54  ;;  %v5506_v52 = vld [vmem:[%s7732_s1 + $0x228] ss:$16 sps:$4 sm:$0xff]   ;;  %v5511_v54 = vld [vmem:[%s7732_s1 + $0xc] ss:$16 sps:$4 sm:$0xff]  }
 0x107   : > { %3699 = vmatprep.subr.bf16.mxu1 %v5462_v55  ;;  %v5514_v55 = vld [vmem:[%s7732_s1 + $0x20c] ss:$16 sps:$4 sm:$0xff]  }
 0x109   : > { %3659 = vmatpush2.bf16.msra.mxu0 %v5457_v56  ;;  %v5509_v56 = vld [vmem:[%s7732_s1 + $0x8] ss:$16 sps:$4 sm:$0xff]  }
 0x10a   : > { %3700 = vmatpush2.bf16.msra.mxu1 %v5460_v57  ;;  %3710 = vmatprep.subr.bf16.mxu0 %v5469_v60  ;;  %v5512_v57 = vld [vmem:[%s7732_s1 + $0x208] ss:$16 sps:$4 sm:$0xff]  }
 0x10b   : > { %3751 = vmatprep.subr.bf16.mxu1 %v5472_v61  ;;  %v5515_v60 = vld [vmem:[%s7732_s1 + $0x1e8] ss:$16 sps:$4 sm:$0xff]  }
 0x10c   : > { %v3416_v5 = vpop.f32.mrf.mxu0  ;;  %3661 = vmatmul.mubr.bf16.vlgmr.msra.gmra.mxu0 %v6807_v63  ;;  %v5518_v61 = vld [vmem:[%s7732_s1 + $0x3e8] ss:$16 sps:$4 sm:$0xff]  }
 0x10d   : > { %v3457_v8 = vpop.f32.mrf.mxu1  ;;  %3702 = vmatmul.mubr.bf16.vlgmr.msra.gmra.mxu1 %v6811_v0  ;;  %v3417_v10 = vadd.f32 %v3416_v5, %v749_v2  ;;  %3711 = vmatpush1.bf16.msra.mxu0 %v5467_v1  ;;  %v5526_v1 = vld [vmem:[%s7732_s1 + $0x3cc] ss:$16 sps:$4 sm:$0xff]   ;;  %v5521_v2 = vld [vmem:[%s7732_s1 + $0x1c8] ss:$16 sps:$4 sm:$0xff]  }
 0x10e   : > { %3752 = vmatpush1.bf16.msra.mxu1 %v5470_v3  ;;  %v3418_v12 = vpop.f32.mrf.mxu0  ;;  %3712 = vmatprep.subr.bf16.mxu0 %v5475_v35  ;;  %v5524_v3 = vld [vmem:[%s7732_s1 + $0x3c8] ss:$16 sps:$4 sm:$0xff]   ;;  %v5529_v35 = vld [vmem:[%s7732_s1 + $0x1ac] ss:$16 sps:$4 sm:$0xff]  }
 0x10f   : > { %v3459_v13 = vpop.f32.mrf.mxu1  ;;  %3753 = vmatprep.subr.bf16.mxu1 %v5478_v40  ;;  %v6839_v18 = vadd.f32 %v3457_v8, %v3417_v10  ;;  %v3419_v19 = vadd.f32 %v3418_v12, %v753_v4  ;;  %3742 = vmatprep.mubr.bf16.mxu0 %v6081_v47  ;;  %v5487_v47 = vld [vmem:[%s7732_s1 + $0x8c] ss:$16 sps:$4 sm:$0xff]   ;;  %v5527_v4 = vld [vmem:[%s7732_s1 + $0x1a8] ss:$16 sps:$4 sm:$0xff]  }
 0x110   : > { %3783 = vmatprep.mubr.bf16.mxu1 %v6090_v51  ;;  %v3420_v20 = vpop.f32.mrf.mxu0  ;;  %v5490_v51 = vld [vmem:[%s7732_s1 + $0x28c] ss:$16 sps:$4 sm:$0xff]   ;;  %v5530_v5 = vld [vmem:[%s7732_s1 + $0x3a8] ss:$16 sps:$4 sm:$0xff]  }
 0x111   : > { %v3461_v21 = vpop.f32.mrf.mxu1  ;;  %v6846_v27 = vadd.f32 %v3459_v13, %v3419_v19  ;;  %3713 = vmatpush1.bf16.msra.mxu0 %v5473_v9  ;;  %v5532_v40 = vld [vmem:[%s7732_s1 + $0x3ac] ss:$16 sps:$4 sm:$0xff]   ;;  %v5533_v10 = vld [vmem:[%s7732_s1 + $0x188] ss:$16 sps:$4 sm:$0xff]  }
 0x112   : > { %3754 = vmatpush1.bf16.msra.mxu1 %v5476_v11  ;;  %v3421_v29 = vpop.f32.mrf.mxu0  ;;  %3714 = vmatprep.subr.bf16.mxu0 %v5481_v14  ;;  %v5535_v8 = vld [vmem:[%s7732_s1 + $0x18c] ss:$16 sps:$4 sm:$0xff]   ;;  %v5536_v11 = vld [vmem:[%s7732_s1 + $0x388] ss:$16 sps:$4 sm:$0xff]  }
 0x113   : > { %v3462_v30 = vpop.f32.mrf.mxu1  ;;  %3755 = vmatprep.subr.bf16.mxu1 %v5484_v15  ;;  %v5538_v9 = vld [vmem:[%s7732_s1 + $0x38c] ss:$16 sps:$4 sm:$0xff]   ;;  %v5539_v14 = vld [vmem:[%s7732_s1 + $0x168] ss:$16 sps:$4 sm:$0xff]  }
 0x114   : > { %v5541_v12 = vld [vmem:[%s7732_s1 + $0x16c] ss:$16 sps:$4 sm:$0xff]   ;;  %v5542_v15 = vld [vmem:[%s7732_s1 + $0x368] ss:$16 sps:$4 sm:$0xff]  }
 0x115   : > { %3715 = vmatpush1.bf16.msra.mxu0 %v5479_v26  ;;  %v5544_v13 = vld [vmem:[%s7732_s1 + $0x36c] ss:$16 sps:$4 sm:$0xff]   ;;  %v5545_v21 = vld [vmem:[%s7732_s1 + $0x148] ss:$16 sps:$4 sm:$0xff]  }
 0x116   : > { %3756 = vmatpush1.bf16.msra.mxu1 %v5482_v28  ;;  %3716 = vmatprep.subr.bf16.mxu0 %v5487_v47  ;;  %v5547_v19 = vld [vmem:[%s7732_s1 + $0x14c] ss:$16 sps:$4 sm:$0xff]   ;;  %v5548_v26 = vld [vmem:[%s7732_s1 + $0x348] ss:$16 sps:$4 sm:$0xff]  }
 0x117   : > { %3757 = vmatprep.subr.bf16.mxu1 %v5490_v51  ;;  %v5550_v20 = vld [vmem:[%s7732_s1 + $0x34c] ss:$16 sps:$4 sm:$0xff]   ;;  %v5551_v30 = vld [vmem:[%s7732_s1 + $0x128] ss:$16 sps:$4 sm:$0xff]  }
 0x118   : > { %v5553_v28 = vld [vmem:[%s7732_s1 + $0x12c] ss:$16 sps:$4 sm:$0xff]   ;;  %v5554_v47 = vld [vmem:[%s7732_s1 + $0x328] ss:$16 sps:$4 sm:$0xff]  }
 0x119   : > { %3717 = vmatpush1.bf16.msra.mxu0 %v5485_v31  ;;  %v5556_v29 = vld [vmem:[%s7732_s1 + $0x32c] ss:$16 sps:$4 sm:$0xff]  }
 0x11a   : > { %3758 = vmatpush1.bf16.msra.mxu1 %v5488_v32  ;;  %3718 = vmatprep.subr.bf16.mxu0 %v5493_v33  ;;  %v5559_v51 = vld [vmem:[%s7732_s1 + $0x10c] ss:$16 sps:$4 sm:$0xff]   ;;  %v5557_v32 = vld [vmem:[%s7732_s1 + $0x108] ss:$16 sps:$4 sm:$0xff]  }
 0x11b   : > { %3759 = vmatprep.subr.bf16.mxu1 %v5496_v34  ;;  %v5562_v31 = vld [vmem:[%s7732_s1 + $0x30c] ss:$16 sps:$4 sm:$0xff]   ;;  %v5560_v33 = vld [vmem:[%s7732_s1 + $0x308] ss:$16 sps:$4 sm:$0xff]  }
 0x11c   : > { %v5565_v34 = vld [vmem:[%s7732_s1 + $0x4ec] ss:$16 sps:$4 sm:$0xff]  }
 0x11d   : > { %3719 = vmatpush1.bf16.msra.mxu0 %v5491_v41  ;;  %v5568_v41 = vld [vmem:[%s7732_s1 + $0x6ec] ss:$16 sps:$4 sm:$0xff]  }
 0x11e   : > { %3760 = vmatpush1.bf16.msra.mxu1 %v5494_v42  ;;  %3720 = vmatprep.subr.bf16.mxu0 %v5499_v22  ;;  %v5563_v42 = vld [vmem:[%s7732_s1 + $0x4e8] ss:$16 sps:$4 sm:$0xff]  }
 0x11f   : > { %3761 = vmatprep.subr.bf16.mxu1 %v5502_v44  ;;  %v5566_v22 = vld [vmem:[%s7732_s1 + $0x6e8] ss:$16 sps:$4 sm:$0xff]   ;;  %v5571_v44 = vld [vmem:[%s7732_s1 + $0x4cc] ss:$16 sps:$4 sm:$0xff]  }
 0x121   : > { %3721 = vmatpush1.bf16.msra.mxu0 %v5497_v45  ;;  %v5574_v45 = vld [vmem:[%s7732_s1 + $0x6cc] ss:$16 sps:$4 sm:$0xff]  }
 0x122   : > { %3762 = vmatpush1.bf16.msra.mxu1 %v5500_v46  ;;  %3722 = vmatprep.subr.bf16.mxu0 %v5505_v48  ;;  %v5569_v46 = vld [vmem:[%s7732_s1 + $0x4c8] ss:$16 sps:$4 sm:$0xff]  }
 0x123   : > { %3763 = vmatprep.subr.bf16.mxu1 %v5508_v49  ;;  %v5572_v48 = vld [vmem:[%s7732_s1 + $0x6c8] ss:$16 sps:$4 sm:$0xff]  }
 0x125   : > { %3723 = vmatpush1.bf16.msra.mxu0 %v5503_v50 }
 0x126   : > { %3764 = vmatpush1.bf16.msra.mxu1 %v5506_v52  ;;  %3724 = vmatprep.subr.bf16.mxu0 %v5511_v54 }
 0x127   : > { %3765 = vmatprep.subr.bf16.mxu1 %v5514_v55 }
 0x129   : > { %3725 = vmatpush1.bf16.msra.mxu0 %v5509_v56  ;;  %v5577_v56 = vld [vmem:[%s7732_s1 + $0x4ac] ss:$16 sps:$4 sm:$0xff]  }
 0x12a   : > { %3766 = vmatpush1.bf16.msra.mxu1 %v5512_v57  ;;  %3726 = vmatprep.subr.bf16.mxu0 %v5517_v58  ;;  %v5580_v57 = vld [vmem:[%s7732_s1 + $0x6ac] ss:$16 sps:$4 sm:$0xff]  }
 0x12b   : > { %3767 = vmatprep.subr.bf16.mxu1 %v5520_v59 }
 0x12d   : > { %3727 = vmatpush2.bf16.msra.mxu0 %v5515_v60 }
 0x12e   : > { %3768 = vmatpush2.bf16.msra.mxu1 %v5518_v61  ;;  %3728 = vmatprep.subr.bf16.mxu0 %v5523_v62 }
 0x12f   : > { %3769 = vmatprep.subr.bf16.mxu1 %v5526_v1  ;;  %v5583_v1 = vld [vmem:[%s7732_s1 + $0x48c] ss:$16 sps:$4 sm:$0xff]  }
 0x131   : > { %3729 = vmatpush2.bf16.msra.mxu0 %v5521_v2  ;;  %v5584_v2 = vld [vmem:[%s7732_s1 + $0x688] ss:$16 sps:$4 sm:$0xff]  }
 0x132   : > { %3770 = vmatpush2.bf16.msra.mxu1 %v5524_v3  ;;  %3730 = vmatprep.subr.bf16.mxu0 %v5529_v35  ;;  %v5589_v3 = vld [vmem:[%s7732_s1 + $0x46c] ss:$16 sps:$4 sm:$0xff]  }
 0x133   : > { %3771 = vmatprep.subr.bf16.mxu1 %v5532_v40  ;;  %v5592_v35 = vld [vmem:[%s7732_s1 + $0x66c] ss:$16 sps:$4 sm:$0xff]   ;;  %v5587_v40 = vld [vmem:[%s7732_s1 + $0x468] ss:$16 sps:$4 sm:$0xff]  }
 0x135   : > { %3731 = vmatpush2.bf16.msra.mxu0 %v5527_v4  ;;  %v5590_v4 = vld [vmem:[%s7732_s1 + $0x668] ss:$16 sps:$4 sm:$0xff]  }
 0x136   : > { %3772 = vmatpush2.bf16.msra.mxu1 %v5530_v5  ;;  %3732 = vmatprep.subr.bf16.mxu0 %v5535_v8  ;;  %v5595_v5 = vld [vmem:[%s7732_s1 + $0x44c] ss:$16 sps:$4 sm:$0xff]  }
 0x137   : > { %3773 = vmatprep.subr.bf16.mxu1 %v5538_v9  ;;  %v5598_v8 = vld [vmem:[%s7732_s1 + $0x64c] ss:$16 sps:$4 sm:$0xff]   ;;  %v5593_v9 = vld [vmem:[%s7732_s1 + $0x448] ss:$16 sps:$4 sm:$0xff]  }
 0x139   : > { %3733 = vmatpush2.bf16.msra.mxu0 %v5533_v10  ;;  %v5596_v10 = vld [vmem:[%s7732_s1 + $0x648] ss:$16 sps:$4 sm:$0xff]  }
 0x13a   : > { %3774 = vmatpush2.bf16.msra.mxu1 %v5536_v11  ;;  %3734 = vmatprep.subr.bf16.mxu0 %v5541_v12  ;;  %v5601_v11 = vld [vmem:[%s7732_s1 + $0x42c] ss:$16 sps:$4 sm:$0xff]  }
 0x13b   : > { %3775 = vmatprep.subr.bf16.mxu1 %v5544_v13  ;;  %v5604_v12 = vld [vmem:[%s7732_s1 + $0x62c] ss:$16 sps:$4 sm:$0xff]   ;;  %v5599_v13 = vld [vmem:[%s7732_s1 + $0x428] ss:$16 sps:$4 sm:$0xff]  }
 0x13d   : > { %3735 = vmatpush2.bf16.msra.mxu0 %v5539_v14  ;;  %v5602_v14 = vld [vmem:[%s7732_s1 + $0x628] ss:$16 sps:$4 sm:$0xff]  }
 0x13e   : > { %3776 = vmatpush2.bf16.msra.mxu1 %v5542_v15  ;;  %3736 = vmatprep.subr.bf16.mxu0 %v5547_v19  ;;  %v5607_v15 = vld [vmem:[%s7732_s1 + $0x40c] ss:$16 sps:$4 sm:$0xff]  }
 0x13f   : > { %3777 = vmatprep.subr.bf16.mxu1 %v5550_v20  ;;  %v5610_v19 = vld [vmem:[%s7732_s1 + $0x60c] ss:$16 sps:$4 sm:$0xff]   ;;  %v5605_v20 = vld [vmem:[%s7732_s1 + $0x408] ss:$16 sps:$4 sm:$0xff]  }
 0x141   : > { %3737 = vmatpush2.bf16.msra.mxu0 %v5545_v21  ;;  %v5608_v21 = vld [vmem:[%s7732_s1 + $0x608] ss:$16 sps:$4 sm:$0xff]  }
 0x142   : > { %3778 = vmatpush2.bf16.msra.mxu1 %v5548_v26  ;;  %3738 = vmatprep.subr.bf16.mxu0 %v5553_v28  ;;  %v5613_v26 = vld [vmem:[%s7732_s1 + $0x5ec] ss:$16 sps:$4 sm:$0xff]  }
 0x143   : > { %3779 = vmatprep.subr.bf16.mxu1 %v5556_v29  ;;  %v5616_v28 = vld [vmem:[%s7732_s1 + $0x7ec] ss:$16 sps:$4 sm:$0xff]   ;;  %v5611_v29 = vld [vmem:[%s7732_s1 + $0x5e8] ss:$16 sps:$4 sm:$0xff]  }
 0x145   : > { %3739 = vmatpush2.bf16.msra.mxu0 %v5551_v30  ;;  %v5614_v30 = vld [vmem:[%s7732_s1 + $0x7e8] ss:$16 sps:$4 sm:$0xff]  }
 0x146   : > { %3780 = vmatpush2.bf16.msra.mxu1 %v5554_v47  ;;  %3740 = vmatprep.subr.bf16.mxu0 %v5559_v51  ;;  %v5619_v47 = vld [vmem:[%s7732_s1 + $0x5cc] ss:$16 sps:$4 sm:$0xff]  }
 0x147   : > { %3781 = vmatprep.subr.bf16.mxu1 %v5562_v31  ;;  %v5622_v51 = vld [vmem:[%s7732_s1 + $0x7cc] ss:$16 sps:$4 sm:$0xff]   ;;  %v5617_v31 = vld [vmem:[%s7732_s1 + $0x5c8] ss:$16 sps:$4 sm:$0xff]  }
 0x149   : > { %3741 = vmatpush2.bf16.msra.mxu0 %v5557_v32  ;;  %v5620_v32 = vld [vmem:[%s7732_s1 + $0x7c8] ss:$16 sps:$4 sm:$0xff]  }
 0x14a   : > { %3782 = vmatpush2.bf16.msra.mxu1 %v5560_v33  ;;  %3792 = vmatprep.subr.bf16.mxu0 %v5565_v34  ;;  %v5625_v33 = vld [vmem:[%s7732_s1 + $0x5ac] ss:$16 sps:$4 sm:$0xff]  }
 0x14b   : > { %3833 = vmatprep.subr.bf16.mxu1 %v5568_v41  ;;  %v5628_v34 = vld [vmem:[%s7732_s1 + $0x7ac] ss:$16 sps:$4 sm:$0xff]   ;;  %v5623_v41 = vld [vmem:[%s7732_s1 + $0x5a8] ss:$16 sps:$4 sm:$0xff]  }
 0x14c   : > { %v3498_v49 = vpop.f32.mrf.mxu0  ;;  %3743 = vmatmul.mubr.bf16.vlgmr.msra.gmra.mxu0 %v6148_v6 }
 0x14d   : > { %v3539_v50 = vpop.f32.mrf.mxu1  ;;  %3784 = vmatmul.mubr.bf16.vlgmr.msra.gmra.mxu1 %v6150_v7  ;;  %v3499_v52 = vadd.f32 %v3498_v49, %v6839_v18  ;;  %3793 = vmatpush1.bf16.msra.mxu0 %v5563_v42  ;;  %v5575_v7 = vld [vmem:[%s7732_s1 + $0x4a8] ss:$16 sps:$4 sm:$0xff]   ;;  %v5640_v49 = vld [vmem:[%s7732_s1 + $0x76c] ss:$16 sps:$4 sm:$0xff]  }
 0x14e   : > { %3834 = vmatpush1.bf16.msra.mxu1 %v5566_v22  ;;  %v3500_v54 = vpop.f32.mrf.mxu0  ;;  %3794 = vmatprep.subr.bf16.mxu0 %v5571_v44  ;;  %v5578_v18 = vld [vmem:[%s7732_s1 + $0x6a8] ss:$16 sps:$4 sm:$0xff]   ;;  %v5631_v22 = vld [vmem:[%s7732_s1 + $0x58c] ss:$16 sps:$4 sm:$0xff]  }
 0x14f   : > { %v3541_v55 = vpop.f32.mrf.mxu1  ;;  %3835 = vmatprep.subr.bf16.mxu1 %v5574_v45  ;;  %v7040_v58 = vadd.f32 %v3539_v50, %v3499_v52  ;;  %v3501_v6 = vadd.f32 %v3500_v54, %v6846_v27  ;;  %3824 = vmatprep.mubr.bf16.mxu0 %v6240_v36  ;;  %v5586_v36 = vld [vmem:[%s7732_s1 + $0x68c] ss:$16 sps:$4 sm:$0xff]   ;;  %v5626_v42 = vld [vmem:[%s7732_s1 + $0x7a8] ss:$16 sps:$4 sm:$0xff]  }
 0x150   : > { %3865 = vmatprep.mubr.bf16.mxu1 %v6244_v37  ;;  %v3502_v59 = vpop.f32.mrf.mxu0  ;;  %v5581_v37 = vld [vmem:[%s7732_s1 + $0x488] ss:$16 sps:$4 sm:$0xff]   ;;  %v5634_v44 = vld [vmem:[%s7732_s1 + $0x78c] ss:$16 sps:$4 sm:$0xff]  }
 0x151   : > { %v3543_v60 = vpop.f32.mrf.mxu1  ;;  %v7051_v61 = vadd.f32 %v3541_v55, %v3501_v6  ;;  %3795 = vmatpush1.bf16.msra.mxu0 %v5569_v46  ;;  %v5629_v45 = vld [vmem:[%s7732_s1 + $0x588] ss:$16 sps:$4 sm:$0xff]   ;;  %v5643_v54 = vld [vmem:[%s7732_s1 + $0x54c] ss:$16 sps:$4 sm:$0xff]  }
 0x152   : > { %3836 = vmatpush1.bf16.msra.mxu1 %v5572_v48  ;;  %v3503_v62 = vpop.f32.mrf.mxu0  ;;  %3796 = vmatprep.subr.bf16.mxu0 %v5577_v56  ;;  %v5632_v46 = vld [vmem:[%s7732_s1 + $0x788] ss:$16 sps:$4 sm:$0xff]   ;;  %v5637_v48 = vld [vmem:[%s7732_s1 + $0x56c] ss:$16 sps:$4 sm:$0xff]  }
 0x153   : > { %v3544_v27 = vpop.f32.mrf.mxu1  ;;  %3837 = vmatprep.subr.bf16.mxu1 %v5580_v57  ;;  %v5635_v50 = vld [vmem:[%s7732_s1 + $0x568] ss:$16 sps:$4 sm:$0xff]   ;;  %v5646_v55 = vld [vmem:[%s7732_s1 + $0x74c] ss:$16 sps:$4 sm:$0xff]  }
 0x154   : > { %v5638_v52 = vld [vmem:[%s7732_s1 + $0x768] ss:$16 sps:$4 sm:$0xff]   ;;  %v5649_v6 = vld [vmem:[%s7732_s1 + $0x52c] ss:$16 sps:$4 sm:$0xff]  }
 0x155   : > { %3797 = vmatpush1.bf16.msra.mxu0 %v5575_v7  ;;  %v5641_v56 = vld [vmem:[%s7732_s1 + $0x548] ss:$16 sps:$4 sm:$0xff]   ;;  %v5652_v7 = vld [vmem:[%s7732_s1 + $0x72c] ss:$16 sps:$4 sm:$0xff]  }
 0x156   : > { %3838 = vmatpush1.bf16.msra.mxu1 %v5578_v18  ;;  %3798 = vmatprep.subr.bf16.mxu0 %v5583_v1  ;;  %v5644_v57 = vld [vmem:[%s7732_s1 + $0x748] ss:$16 sps:$4 sm:$0xff]   ;;  %v5655_v60 = vld [vmem:[%s7732_s1 + $0x50c] ss:$16 sps:$4 sm:$0xff]  }
 0x157   : > { %3839 = vmatprep.subr.bf16.mxu1 %v5586_v36  ;;  %v5647_v18 = vld [vmem:[%s7732_s1 + $0x528] ss:$16 sps:$4 sm:$0xff]   ;;  %v5658_v62 = vld [vmem:[%s7732_s1 + $0x70c] ss:$16 sps:$4 sm:$0xff]  }
 0x158   : > { %v5650_v59 = vld [vmem:[%s7732_s1 + $0x728] ss:$16 sps:$4 sm:$0xff]   ;;  %v5661_v36 = vld [vmem:[%s7732_s1 + $0x8ec] ss:$16 sps:$4 sm:$0xff]  }
 0x159   : > { %3799 = vmatpush1.bf16.msra.mxu0 %v5581_v37  ;;  %v5653_v27 = vld [vmem:[%s7732_s1 + $0x508] ss:$16 sps:$4 sm:$0xff]   ;;  %v5664_v37 = vld [vmem:[%s7732_s1 + $0xaec] ss:$16 sps:$4 sm:$0xff]  }
 0x15a   : > { %3840 = vmatpush1.bf16.msra.mxu1 %v5584_v2  ;;  %3800 = vmatprep.subr.bf16.mxu0 %v5589_v3  ;;  %v5656_v1 = vld [vmem:[%s7732_s1 + $0x708] ss:$16 sps:$4 sm:$0xff]  }
 0x15b   : > { %3841 = vmatprep.subr.bf16.mxu1 %v5592_v35  ;;  %v5659_v2 = vld [vmem:[%s7732_s1 + $0x8e8] ss:$16 sps:$4 sm:$0xff]   ;;  %v5667_v35 = vld [vmem:[%s7732_s1 + $0x8cc] ss:$16 sps:$4 sm:$0xff]  }
 0x15c   : > { %v5662_v3 = vld [vmem:[%s7732_s1 + $0xae8] ss:$16 sps:$4 sm:$0xff]  }
 0x15d   : > { %3801 = vmatpush1.bf16.msra.mxu0 %v5587_v40  ;;  %v5670_v40 = vld [vmem:[%s7732_s1 + $0xacc] ss:$16 sps:$4 sm:$0xff]  }
 0x15e   : > { %3842 = vmatpush1.bf16.msra.mxu1 %v5590_v4  ;;  %3802 = vmatprep.subr.bf16.mxu0 %v5595_v5 }
 0x15f   : > { %3843 = vmatprep.subr.bf16.mxu1 %v5598_v8 }
 0x161   : > { %3803 = vmatpush1.bf16.msra.mxu0 %v5593_v9  ;;  %v5665_v9 = vld [vmem:[%s7732_s1 + $0x8c8] ss:$16 sps:$4 sm:$0xff]  }
 0x162   : > { %3844 = vmatpush1.bf16.msra.mxu1 %v5596_v10  ;;  %3804 = vmatprep.subr.bf16.mxu0 %v5601_v11  ;;  %v5668_v10 = vld [vmem:[%s7732_s1 + $0xac8] ss:$16 sps:$4 sm:$0xff]  }
 0x163   : > { %3845 = vmatprep.subr.bf16.mxu1 %v5604_v12 }
 0x165   : > { %3805 = vmatpush1.bf16.msra.mxu0 %v5599_v13 }
 0x166   : > { %3846 = vmatpush1.bf16.msra.mxu1 %v5602_v14  ;;  %3806 = vmatprep.subr.bf16.mxu0 %v5607_v15 }
 0x167   : > { %3847 = vmatprep.subr.bf16.mxu1 %v5610_v19 }
 0x169   : > { %3807 = vmatpush1.bf16.msra.mxu0 %v5605_v20  ;;  %v5671_v20 = vld [vmem:[%s7732_s1 + $0x8a8] ss:$16 sps:$4 sm:$0xff]  }
 0x16a   : > { %3848 = vmatpush1.bf16.msra.mxu1 %v5608_v21  ;;  %3808 = vmatprep.subr.bf16.mxu0 %v5613_v26  ;;  %v5674_v21 = vld [vmem:[%s7732_s1 + $0xaa8] ss:$16 sps:$4 sm:$0xff]  }
 0x16b   : > { %3849 = vmatprep.subr.bf16.mxu1 %v5616_v28  ;;  %v5677_v28 = vld [vmem:[%s7732_s1 + $0x888] ss:$16 sps:$4 sm:$0xff]  }
 0x16d   : > { %3809 = vmatpush2.bf16.msra.mxu0 %v5611_v29  ;;  %v5680_v29 = vld [vmem:[%s7732_s1 + $0xa88] ss:$16 sps:$4 sm:$0xff]  }
 0x16e   : > { %3850 = vmatpush2.bf16.msra.mxu1 %v5614_v30  ;;  %3810 = vmatprep.subr.bf16.mxu0 %v5619_v47  ;;  %v5685_v30 = vld [vmem:[%s7732_s1 + $0x86c] ss:$16 sps:$4 sm:$0xff]  }
 0x16f   : > { %3851 = vmatprep.subr.bf16.mxu1 %v5622_v51  ;;  %v5688_v47 = vld [vmem:[%s7732_s1 + $0xa6c] ss:$16 sps:$4 sm:$0xff]   ;;  %v5683_v51 = vld [vmem:[%s7732_s1 + $0x868] ss:$16 sps:$4 sm:$0xff]  }
 0x171   : > { %3811 = vmatpush2.bf16.msra.mxu0 %v5617_v31  ;;  %v5686_v31 = vld [vmem:[%s7732_s1 + $0xa68] ss:$16 sps:$4 sm:$0xff]  }
 0x172   : > { %3852 = vmatpush2.bf16.msra.mxu1 %v5620_v32  ;;  %3812 = vmatprep.subr.bf16.mxu0 %v5625_v33  ;;  %v5691_v32 = vld [vmem:[%s7732_s1 + $0x84c] ss:$16 sps:$4 sm:$0xff]  }
 0x173   : > { %3853 = vmatprep.subr.bf16.mxu1 %v5628_v34  ;;  %v5694_v33 = vld [vmem:[%s7732_s1 + $0xa4c] ss:$16 sps:$4 sm:$0xff]   ;;  %v5689_v34 = vld [vmem:[%s7732_s1 + $0x848] ss:$16 sps:$4 sm:$0xff]  }
 0x175   : > { %3813 = vmatpush2.bf16.msra.mxu0 %v5623_v41  ;;  %v5692_v41 = vld [vmem:[%s7732_s1 + $0xa48] ss:$16 sps:$4 sm:$0xff]  }
 0x176   : > { %3854 = vmatpush2.bf16.msra.mxu1 %v5626_v42  ;;  %3814 = vmatprep.subr.bf16.mxu0 %v5631_v22  ;;  %v5697_v42 = vld [vmem:[%s7732_s1 + $0x82c] ss:$16 sps:$4 sm:$0xff]  }
 0x177   : > { %3855 = vmatprep.subr.bf16.mxu1 %v5634_v44  ;;  %v5700_v22 = vld [vmem:[%s7732_s1 + $0xa2c] ss:$16 sps:$4 sm:$0xff]   ;;  %v5695_v44 = vld [vmem:[%s7732_s1 + $0x828] ss:$16 sps:$4 sm:$0xff]  }
 0x179   : > { %3815 = vmatpush2.bf16.msra.mxu0 %v5629_v45  ;;  %v5698_v45 = vld [vmem:[%s7732_s1 + $0xa28] ss:$16 sps:$4 sm:$0xff]  }
 0x17a   : > { %3856 = vmatpush2.bf16.msra.mxu1 %v5632_v46  ;;  %3816 = vmatprep.subr.bf16.mxu0 %v5637_v48  ;;  %v5703_v46 = vld [vmem:[%s7732_s1 + $0x80c] ss:$16 sps:$4 sm:$0xff]  }
 0x17b   : > { %3857 = vmatprep.subr.bf16.mxu1 %v5640_v49  ;;  %v5706_v48 = vld [vmem:[%s7732_s1 + $0xa0c] ss:$16 sps:$4 sm:$0xff]   ;;  %v5701_v49 = vld [vmem:[%s7732_s1 + $0x808] ss:$16 sps:$4 sm:$0xff]  }
 0x17d   : > { %3817 = vmatpush2.bf16.msra.mxu0 %v5635_v50  ;;  %v5704_v50 = vld [vmem:[%s7732_s1 + $0xa08] ss:$16 sps:$4 sm:$0xff]  }
 0x17e   : > { %3858 = vmatpush2.bf16.msra.mxu1 %v5638_v52  ;;  %3818 = vmatprep.subr.bf16.mxu0 %v5643_v54  ;;  %v5709_v52 = vld [vmem:[%s7732_s1 + $0x9ec] ss:$16 sps:$4 sm:$0xff]  }
 0x17f   : > { %3859 = vmatprep.subr.bf16.mxu1 %v5646_v55  ;;  %v5712_v54 = vld [vmem:[%s7732_s1 + $0xbec] ss:$16 sps:$4 sm:$0xff]   ;;  %v5707_v55 = vld [vmem:[%s7732_s1 + $0x9e8] ss:$16 sps:$4 sm:$0xff]  }
 0x181   : > { %3819 = vmatpush2.bf16.msra.mxu0 %v5641_v56  ;;  %v5710_v56 = vld [vmem:[%s7732_s1 + $0xbe8] ss:$16 sps:$4 sm:$0xff]  }
 0x182   : > { %3860 = vmatpush2.bf16.msra.mxu1 %v5644_v57  ;;  %3820 = vmatprep.subr.bf16.mxu0 %v5649_v6  ;;  %v5715_v57 = vld [vmem:[%s7732_s1 + $0x9cc] ss:$16 sps:$4 sm:$0xff]  }
 0x183   : > { %3861 = vmatprep.subr.bf16.mxu1 %v5652_v7  ;;  %v5718_v6 = vld [vmem:[%s7732_s1 + $0xbcc] ss:$16 sps:$4 sm:$0xff]   ;;  %v5713_v7 = vld [vmem:[%s7732_s1 + $0x9c8] ss:$16 sps:$4 sm:$0xff]  }
 0x185   : > { %3821 = vmatpush2.bf16.msra.mxu0 %v5647_v18  ;;  %v5716_v18 = vld [vmem:[%s7732_s1 + $0xbc8] ss:$16 sps:$4 sm:$0xff]  }
 0x186   : > { %3862 = vmatpush2.bf16.msra.mxu1 %v5650_v59  ;;  %3822 = vmatprep.subr.bf16.mxu0 %v5655_v60  ;;  %v5721_v59 = vld [vmem:[%s7732_s1 + $0x9ac] ss:$16 sps:$4 sm:$0xff]  }
 0x187   : > { %3863 = vmatprep.subr.bf16.mxu1 %v5658_v62  ;;  %v5724_v60 = vld [vmem:[%s7732_s1 + $0xbac] ss:$16 sps:$4 sm:$0xff]   ;;  %v5719_v62 = vld [vmem:[%s7732_s1 + $0x9a8] ss:$16 sps:$4 sm:$0xff]  }
 0x189   : > { %3823 = vmatpush2.bf16.msra.mxu0 %v5653_v27  ;;  %v5722_v27 = vld [vmem:[%s7732_s1 + $0xba8] ss:$16 sps:$4 sm:$0xff]  }
 0x18a   : > { %3864 = vmatpush2.bf16.msra.mxu1 %v5656_v1  ;;  %3874 = vmatprep.subr.bf16.mxu0 %v5661_v36  ;;  %v5727_v1 = vld [vmem:[%s7732_s1 + $0x98c] ss:$16 sps:$4 sm:$0xff]  }
 0x18b   : > { %3915 = vmatprep.subr.bf16.mxu1 %v5664_v37  ;;  %v5730_v36 = vld [vmem:[%s7732_s1 + $0xb8c] ss:$16 sps:$4 sm:$0xff]   ;;  %v5725_v37 = vld [vmem:[%s7732_s1 + $0x988] ss:$16 sps:$4 sm:$0xff]  }
 0x18c   : > { %v3580_v4 = vpop.f32.mrf.mxu0  ;;  %3825 = vmatmul.mubr.bf16.vlgmr.msra.gmra.mxu0 %v6364_v16  ;;  %v5673_v16 = vld [vmem:[%s7732_s1 + $0x8ac] ss:$16 sps:$4 sm:$0xff]  }
 0x18d   : > { %v3621_v5 = vpop.f32.mrf.mxu1  ;;  %3866 = vmatmul.mubr.bf16.vlgmr.msra.gmra.mxu1 %v6368_v17  ;;  %v3581_v8 = vadd.f32 %v3580_v4, %v7040_v58  ;;  %3875 = vmatpush1.bf16.msra.mxu0 %v5659_v2  ;;  %v5676_v17 = vld [vmem:[%s7732_s1 + $0xaac] ss:$16 sps:$4 sm:$0xff]   ;;  %v5728_v2 = vld [vmem:[%s7732_s1 + $0xb88] ss:$16 sps:$4 sm:$0xff]  }
 0x18e   : > { %3916 = vmatpush1.bf16.msra.mxu1 %v5662_v3  ;;  %v3582_v11 = vpop.f32.mrf.mxu0  ;;  %3876 = vmatprep.subr.bf16.mxu0 %v5667_v35  ;;  %v5733_v3 = vld [vmem:[%s7732_s1 + $0x96c] ss:$16 sps:$4 sm:$0xff]   ;;  %v5734_v4 = vld [vmem:[%s7732_s1 + $0xb68] ss:$16 sps:$4 sm:$0xff]  }
 0x18f   : > { %v3623_v12 = vpop.f32.mrf.mxu1  ;;  %3917 = vmatprep.subr.bf16.mxu1 %v5670_v40  ;;  %v7242_v58 = vadd.f32 %v3621_v5, %v3581_v8  ;;  %v3583_v13 = vadd.f32 %v3582_v11, %v7051_v61  ;;  %3906 = vmatprep.mubr.bf16.mxu0 %v6390_v24  ;;  %v5679_v24 = vld [vmem:[%s7732_s1 + $0x88c] ss:$16 sps:$4 sm:$0xff]   ;;  %v5731_v40 = vld [vmem:[%s7732_s1 + $0x968] ss:$16 sps:$4 sm:$0xff]  }
 0x190   : > { %3947 = vmatprep.mubr.bf16.mxu1 %v6394_v25  ;;  %v3584_v14 = vpop.f32.mrf.mxu0  ;;  %v5682_v25 = vld [vmem:[%s7732_s1 + $0xa8c] ss:$16 sps:$4 sm:$0xff]  }
 0x191   : > { %v3625_v15 = vpop.f32.mrf.mxu1  ;;  %v7247_v19 = vadd.f32 %v3623_v12, %v3583_v13  ;;  %3877 = vmatpush1.bf16.msra.mxu0 %v5665_v9  ;;  %v5736_v35 = vld [vmem:[%s7732_s1 + $0xb6c] ss:$16 sps:$4 sm:$0xff]   ;;  %v5737_v9 = vld [vmem:[%s7732_s1 + $0x948] ss:$16 sps:$4 sm:$0xff]  }
 0x192   : > { %3918 = vmatpush1.bf16.msra.mxu1 %v5668_v10  ;;  %v3585_v26 = vpop.f32.mrf.mxu0  ;;  %3878 = vmatprep.subr.bf16.mxu0 %v5673_v16  ;;  %v5739_v5 = vld [vmem:[%s7732_s1 + $0x94c] ss:$16 sps:$4 sm:$0xff]   ;;  %v5740_v10 = vld [vmem:[%s7732_s1 + $0xb48] ss:$16 sps:$4 sm:$0xff]  }
 0x193   : > { %v3626_v61 = vpop.f32.mrf.mxu1  ;;  %3919 = vmatprep.subr.bf16.mxu1 %v5676_v17  ;;  %v5742_v8 = vld [vmem:[%s7732_s1 + $0xb4c] ss:$16 sps:$4 sm:$0xff]   ;;  %v5743_v16 = vld [vmem:[%s7732_s1 + $0x928] ss:$16 sps:$4 sm:$0xff]  }
 0x194   : > { %v5745_v11 = vld [vmem:[%s7732_s1 + $0x92c] ss:$16 sps:$4 sm:$0xff]   ;;  %v5746_v17 = vld [vmem:[%s7732_s1 + $0xb28] ss:$16 sps:$4 sm:$0xff]  }
 0x195   : > { %3879 = vmatpush1.bf16.msra.mxu0 %v5671_v20  ;;  %v5748_v12 = vld [vmem:[%s7732_s1 + $0xb2c] ss:$16 sps:$4 sm:$0xff]   ;;  %v5749_v15 = vld [vmem:[%s7732_s1 + $0x908] ss:$16 sps:$4 sm:$0xff]  }
 0x196   : > { %3920 = vmatpush1.bf16.msra.mxu1 %v5674_v21  ;;  %3880 = vmatprep.subr.bf16.mxu0 %v5679_v24  ;;  %v5751_v13 = vld [vmem:[%s7732_s1 + $0x90c] ss:$16 sps:$4 sm:$0xff]   ;;  %v5752_v20 = vld [vmem:[%s7732_s1 + $0xb08] ss:$16 sps:$4 sm:$0xff]  }
 0x197   : > { %3921 = vmatprep.subr.bf16.mxu1 %v5682_v25  ;;  %v5754_v14 = vld [vmem:[%s7732_s1 + $0xb0c] ss:$16 sps:$4 sm:$0xff]   ;;  %v5755_v61 = vld [vmem:[%s7732_s1 + $0xce8] ss:$16 sps:$4 sm:$0xff]  }
 0x198   : > { %v5757_v21 = vld [vmem:[%s7732_s1 + $0xcec] ss:$16 sps:$4 sm:$0xff]   ;;  %v5758_v24 = vld [vmem:[%s7732_s1 + $0xee8] ss:$16 sps:$4 sm:$0xff]  }
 0x199   : > { %3881 = vmatpush1.bf16.msra.mxu0 %v5677_v28  ;;  %v5760_v26 = vld [vmem:[%s7732_s1 + $0xeec] ss:$16 sps:$4 sm:$0xff]  }
 0x19a   : > { %3922 = vmatpush1.bf16.msra.mxu1 %v5680_v29  ;;  %3882 = vmatprep.subr.bf16.mxu0 %v5685_v30  ;;  %v5763_v25 = vld [vmem:[%s7732_s1 + $0xccc] ss:$16 sps:$4 sm:$0xff]  }
 0x19b   : > { %3923 = vmatprep.subr.bf16.mxu1 %v5688_v47  ;;  %v5766_v28 = vld [vmem:[%s7732_s1 + $0xecc] ss:$16 sps:$4 sm:$0xff]  }
 0x19d   : > { %3883 = vmatpush1.bf16.msra.mxu0 %v5683_v51  ;;  %v5761_v51 = vld [vmem:[%s7732_s1 + $0xcc8] ss:$16 sps:$4 sm:$0xff]  }
 0x19e   : > { %3924 = vmatpush1.bf16.msra.mxu1 %v5686_v31  ;;  %3884 = vmatprep.subr.bf16.mxu0 %v5691_v32  ;;  %v5764_v31 = vld [vmem:[%s7732_s1 + $0xec8] ss:$16 sps:$4 sm:$0xff]  }
 0x19f   : > { %3925 = vmatprep.subr.bf16.mxu1 %v5694_v33 }
 0x1a1   : > { %3885 = vmatpush1.bf16.msra.mxu0 %v5689_v34 }
 0x1a2   : > { %3926 = vmatpush1.bf16.msra.mxu1 %v5692_v41  ;;  %3886 = vmatprep.subr.bf16.mxu0 %v5697_v42  ;;  %v5767_v42 = vld [vmem:[%s7732_s1 + $0xca8] ss:$16 sps:$4 sm:$0xff]  }
 0x1a3   : > { %3927 = vmatprep.subr.bf16.mxu1 %v5700_v22  ;;  %v5770_v22 = vld [vmem:[%s7732_s1 + $0xea8] ss:$16 sps:$4 sm:$0xff]  }
 0x1a5   : > { %3887 = vmatpush1.bf16.msra.mxu0 %v5695_v44 }
 0x1a6   : > { %3928 = vmatpush1.bf16.msra.mxu1 %v5698_v45  ;;  %3888 = vmatprep.subr.bf16.mxu0 %v5703_v46  ;;  %v5773_v46 = vld [vmem:[%s7732_s1 + $0xc88] ss:$16 sps:$4 sm:$0xff]  }
 0x1a7   : > { %3929 = vmatprep.subr.bf16.mxu1 %v5706_v48  ;;  %v5776_v48 = vld [vmem:[%s7732_s1 + $0xe88] ss:$16 sps:$4 sm:$0xff]  }
 0x1a9   : > { %3889 = vmatpush1.bf16.msra.mxu0 %v5701_v49  ;;  %v5781_v49 = vld [vmem:[%s7732_s1 + $0xc6c] ss:$16 sps:$4 sm:$0xff]  }
 0x1aa   : > { %3930 = vmatpush1.bf16.msra.mxu1 %v5704_v50  ;;  %3890 = vmatprep.subr.bf16.mxu0 %v5709_v52  ;;  %v5784_v50 = vld [vmem:[%s7732_s1 + $0xe6c] ss:$16 sps:$4 sm:$0xff]   ;;  %v5779_v52 = vld [vmem:[%s7732_s1 + $0xc68] ss:$16 sps:$4 sm:$0xff]  }
 0x1ab   : > { %3931 = vmatprep.subr.bf16.mxu1 %v5712_v54  ;;  %v5782_v54 = vld [vmem:[%s7732_s1 + $0xe68] ss:$16 sps:$4 sm:$0xff]  }
 0x1ad   : > { %3891 = vmatpush2.bf16.msra.mxu0 %v5707_v55  ;;  %v5787_v55 = vld [vmem:[%s7732_s1 + $0xc4c] ss:$16 sps:$4 sm:$0xff]  }
 0x1ae   : > { %3932 = vmatpush2.bf16.msra.mxu1 %v5710_v56  ;;  %3892 = vmatprep.subr.bf16.mxu0 %v5715_v57  ;;  %v5790_v56 = vld [vmem:[%s7732_s1 + $0xe4c] ss:$16 sps:$4 sm:$0xff]   ;;  %v5785_v57 = vld [vmem:[%s7732_s1 + $0xc48] ss:$16 sps:$4 sm:$0xff]  }
 0x1af   : > { %3933 = vmatprep.subr.bf16.mxu1 %v5718_v6  ;;  %v5788_v6 = vld [vmem:[%s7732_s1 + $0xe48] ss:$16 sps:$4 sm:$0xff]  }
 0x1b1   : > { %3893 = vmatpush2.bf16.msra.mxu0 %v5713_v7  ;;  %v5793_v7 = vld [vmem:[%s7732_s1 + $0xc2c] ss:$16 sps:$4 sm:$0xff]  }
 0x1b2   : > { %3934 = vmatpush2.bf16.msra.mxu1 %v5716_v18  ;;  %3894 = vmatprep.subr.bf16.mxu0 %v5721_v59  ;;  %v5796_v18 = vld [vmem:[%s7732_s1 + $0xe2c] ss:$16 sps:$4 sm:$0xff]   ;;  %v5791_v59 = vld [vmem:[%s7732_s1 + $0xc28] ss:$16 sps:$4 sm:$0xff]  }
 0x1b3   : > { %3935 = vmatprep.subr.bf16.mxu1 %v5724_v60  ;;  %v5794_v60 = vld [vmem:[%s7732_s1 + $0xe28] ss:$16 sps:$4 sm:$0xff]  }
 0x1b5   : > { %3895 = vmatpush2.bf16.msra.mxu0 %v5719_v62  ;;  %v5799_v62 = vld [vmem:[%s7732_s1 + $0xc0c] ss:$16 sps:$4 sm:$0xff]  }
 0x1b6   : > { %3936 = vmatpush2.bf16.msra.mxu1 %v5722_v27  ;;  %3896 = vmatprep.subr.bf16.mxu0 %v5727_v1  ;;  %v5802_v27 = vld [vmem:[%s7732_s1 + $0xe0c] ss:$16 sps:$4 sm:$0xff]   ;;  %v5797_v1 = vld [vmem:[%s7732_s1 + $0xc08] ss:$16 sps:$4 sm:$0xff]  }
 0x1b7   : > { %3937 = vmatprep.subr.bf16.mxu1 %v5730_v36  ;;  %v5800_v36 = vld [vmem:[%s7732_s1 + $0xe08] ss:$16 sps:$4 sm:$0xff]  }
 0x1b9   : > { %3897 = vmatpush2.bf16.msra.mxu0 %v5725_v37  ;;  %v5805_v37 = vld [vmem:[%s7732_s1 + $0xdec] ss:$16 sps:$4 sm:$0xff]  }
 0x1ba   : > { %3938 = vmatpush2.bf16.msra.mxu1 %v5728_v2  ;;  %3898 = vmatprep.subr.bf16.mxu0 %v5733_v3  ;;  %v5808_v2 = vld [vmem:[%s7732_s1 + $0xfec] ss:$16 sps:$4 sm:$0xff]   ;;  %v5803_v3 = vld [vmem:[%s7732_s1 + $0xde8] ss:$16 sps:$4 sm:$0xff]  }
 0x1bb   : > { %3939 = vmatprep.subr.bf16.mxu1 %v5736_v35  ;;  %v5806_v35 = vld [vmem:[%s7732_s1 + $0xfe8] ss:$16 sps:$4 sm:$0xff]  }
 0x1bd   : > { %3899 = vmatpush2.bf16.msra.mxu0 %v5731_v40  ;;  %v5811_v40 = vld [vmem:[%s7732_s1 + $0xdcc] ss:$16 sps:$4 sm:$0xff]  }
 0x1be   : > { %3940 = vmatpush2.bf16.msra.mxu1 %v5734_v4  ;;  %3900 = vmatprep.subr.bf16.mxu0 %v5739_v5  ;;  %v5814_v4 = vld [vmem:[%s7732_s1 + $0xfcc] ss:$16 sps:$4 sm:$0xff]   ;;  %v5809_v5 = vld [vmem:[%s7732_s1 + $0xdc8] ss:$16 sps:$4 sm:$0xff]  }
 0x1bf   : > { %3941 = vmatprep.subr.bf16.mxu1 %v5742_v8  ;;  %v5812_v8 = vld [vmem:[%s7732_s1 + $0xfc8] ss:$16 sps:$4 sm:$0xff]  }
 0x1c1   : > { %3901 = vmatpush2.bf16.msra.mxu0 %v5737_v9  ;;  %v5817_v9 = vld [vmem:[%s7732_s1 + $0xdac] ss:$16 sps:$4 sm:$0xff]  }
 0x1c2   : > { %3942 = vmatpush2.bf16.msra.mxu1 %v5740_v10  ;;  %3902 = vmatprep.subr.bf16.mxu0 %v5745_v11  ;;  %v5820_v10 = vld [vmem:[%s7732_s1 + $0xfac] ss:$16 sps:$4 sm:$0xff]   ;;  %v5815_v11 = vld [vmem:[%s7732_s1 + $0xda8] ss:$16 sps:$4 sm:$0xff]  }
 0x1c3   : > { %3943 = vmatprep.subr.bf16.mxu1 %v5748_v12  ;;  %v5818_v12 = vld [vmem:[%s7732_s1 + $0xfa8] ss:$16 sps:$4 sm:$0xff]  }
 0x1c5   : > { %3903 = vmatpush2.bf16.msra.mxu0 %v5743_v16  ;;  %v5823_v16 = vld [vmem:[%s7732_s1 + $0xd8c] ss:$16 sps:$4 sm:$0xff]  }
 0x1c6   : > { %3944 = vmatpush2.bf16.msra.mxu1 %v5746_v17  ;;  %3904 = vmatprep.subr.bf16.mxu0 %v5751_v13  ;;  %v5826_v17 = vld [vmem:[%s7732_s1 + $0xf8c] ss:$16 sps:$4 sm:$0xff]   ;;  %v5821_v13 = vld [vmem:[%s7732_s1 + $0xd88] ss:$16 sps:$4 sm:$0xff]  }
 0x1c7   : > { %3945 = vmatprep.subr.bf16.mxu1 %v5754_v14  ;;  %v5824_v14 = vld [vmem:[%s7732_s1 + $0xf88] ss:$16 sps:$4 sm:$0xff]  }
 0x1c9   : > { %3905 = vmatpush2.bf16.msra.mxu0 %v5749_v15  ;;  %v5829_v15 = vld [vmem:[%s7732_s1 + $0xd6c] ss:$16 sps:$4 sm:$0xff]  }
 0x1ca   : > { %3946 = vmatpush2.bf16.msra.mxu1 %v5752_v20  ;;  %3956 = vmatprep.subr.bf16.mxu0 %v5757_v21  ;;  %v5832_v20 = vld [vmem:[%s7732_s1 + $0xf6c] ss:$16 sps:$4 sm:$0xff]   ;;  %v5827_v21 = vld [vmem:[%s7732_s1 + $0xd68] ss:$16 sps:$4 sm:$0xff]  }
 0x1cb   : > { %3997 = vmatprep.subr.bf16.mxu1 %v5760_v26  ;;  %v5830_v26 = vld [vmem:[%s7732_s1 + $0xf68] ss:$16 sps:$4 sm:$0xff]  }
 0x1cc   : > { %v3662_v29 = vpop.f32.mrf.mxu0  ;;  %3907 = vmatmul.mubr.bf16.vlgmr.msra.gmra.mxu0 %v6588_v38  ;;  %v5769_v38 = vld [vmem:[%s7732_s1 + $0xcac] ss:$16 sps:$4 sm:$0xff]  }
 0x1cd   : > { %v3703_v30 = vpop.f32.mrf.mxu1  ;;  %3948 = vmatmul.mubr.bf16.vlgmr.msra.gmra.mxu1 %v6592_v39  ;;  %v3663_v47 = vadd.f32 %v3662_v29, %v7242_v58  ;;  %3957 = vmatpush1.bf16.msra.mxu0 %v5755_v61  ;;  %v5772_v39 = vld [vmem:[%s7732_s1 + $0xeac] ss:$16 sps:$4 sm:$0xff]  }
 0x1ce   : > { %3998 = vmatpush1.bf16.msra.mxu1 %v5758_v24  ;;  %v7438_v32 = vpop.f32.mrf.mxu0  ;;  %3958 = vmatprep.subr.bf16.mxu0 %v5763_v25  ;;  %v5835_v61 = vld [vmem:[%s7732_s1 + $0xd4c] ss:$16 sps:$4 sm:$0xff]   ;;  %v5833_v25 = vld [vmem:[%s7732_s1 + $0xd48] ss:$16 sps:$4 sm:$0xff]  }
 0x1cf   : > { %v7440_v33 = vpop.f32.mrf.mxu1  ;;  %3999 = vmatprep.subr.bf16.mxu1 %v5766_v28  ;;  %v7448_v58 = vadd.f32 %v3703_v30, %v3663_v47  ;;  %3988 = vmatprep.mubr.bf16.mxu0 %v6608_v23  ;;  %v5775_v23 = vld [vmem:[%s7732_s1 + $0xc8c] ss:$16 sps:$4 sm:$0xff]   ;;  %v5836_v28 = vld [vmem:[%s7732_s1 + $0xf48] ss:$16 sps:$4 sm:$0xff]   ;;  %v3665_v47 = vadd.f32 %v7438_v32, %v7247_v19 }
 0x1d0   : > { %4029 = vmatprep.mubr.bf16.mxu1 %v6612_v43  ;;  %v3666_v34 = vpop.f32.mrf.mxu0  ;;  %v5778_v43 = vld [vmem:[%s7732_s1 + $0xe8c] ss:$16 sps:$4 sm:$0xff]  }
 0x1d1   : > { %v3707_v41 = vpop.f32.mrf.mxu1  ;;  %3959 = vmatpush1.bf16.msra.mxu0 %v5761_v51  ;;  %v5838_v24 = vld [vmem:[%s7732_s1 + $0xf4c] ss:$16 sps:$4 sm:$0xff]   ;;  %v5839_v51 = vld [vmem:[%s7732_s1 + $0xd28] ss:$16 sps:$4 sm:$0xff]   ;;  %v3706_v32 = vadd.f32 %v7440_v33, %v3665_v47  ;;  %v760_v33 = vsub.s32 3, %v6780_v53 }
 0x1d2   : > { %4000 = vmatpush1.bf16.msra.mxu1 %v5764_v31  ;;  %v3667_v44 = vpop.f32.mrf.mxu0  ;;  %3960 = vmatprep.subr.bf16.mxu0 %v5769_v38  ;;  %v5841_v29 = vld [vmem:[%s7732_s1 + $0xd2c] ss:$16 sps:$4 sm:$0xff]   ;;  %v5842_v31 = vld [vmem:[%s7732_s1 + $0xf28] ss:$16 sps:$4 sm:$0xff]   ;;  %v756_v41 = vsub.s32 2, %v6780_v53 }
 0x1d3   : > { %v3708_v45 = vpop.f32.mrf.mxu1  ;;  %4001 = vmatprep.subr.bf16.mxu1 %v5772_v39  ;;  %v5844_v30 = vld [vmem:[%s7732_s1 + $0xf2c] ss:$16 sps:$4 sm:$0xff]   ;;  %v5845_v39 = vld [vmem:[%s7732_s1 + $0xd08] ss:$16 sps:$4 sm:$0xff]   ;;  %v5883_v44 = vld [vmem:[%s7733_s2] sm:$0xf] }
 0x1d4   : > { %v5847_v38 = vld [vmem:[%s7732_s1 + $0xd0c] ss:$16 sps:$4 sm:$0xff]   ;;  %v5848_v34 = vld [vmem:[%s7732_s1 + $0xf08] ss:$16 sps:$4 sm:$0xff]   ;;  %v757_v45 = vrot.slane %v5883_v44, %v756_v41  ;;  %v5882_v41 = vld [vmem:[%s7734_s3 + $0x80] sm:$0xff]  }
 0x1d5   : > { %3961 = vmatpush1.bf16.msra.mxu0 %v5767_v42  ;;  %v5850_v19 = vld [vmem:[%s7732_s1 + $0xf0c] ss:$16 sps:$4 sm:$0xff]  }
 0x1d6   : > { %4002 = vmatpush1.bf16.msra.mxu1 %v5770_v22  ;;  %3962 = vmatprep.subr.bf16.mxu0 %v5775_v23  ;;  %v5851_v42 = vld [vmem:[%s7734_s3 + $0x78] sm:$0xff]   ;;  %v4039_v22 = vmax.f32 %v3706_v32, 0.0 }
 0x1d7   : > { %4003 = vmatprep.subr.bf16.mxu1 %v5778_v43  ;;  %v5852_v23 = vld [vmem:[%s7734_s3 + $0x38] sm:$0xff]   ;;  %v5853_v43 = vld [vmem:[%s7734_s3 + $0x70] sm:$0xff]  }
 0x1d9   : > { %3963 = vmatpush1.bf16.msra.mxu0 %v5773_v46  ;;  %v4043_v46 = vpack.c.bf16 %v4039_v22, %v4039_v22 }
 0x1da   : > { %4004 = vmatpush1.bf16.msra.mxu1 %v5776_v48  ;;  %3964 = vmatprep.subr.bf16.mxu0 %v5781_v49  ;;  %v761_v48 = vrot.slane %v5883_v44, %v760_v33 }
 0x1db   : > { %4005 = vmatprep.subr.bf16.mxu1 %v5784_v50 }
 0x1dd   : > { %3965 = vmatpush1.bf16.msra.mxu0 %v5779_v52  ;;  %v5854_v52 = vld [vmem:[%s7734_s3 + $0x30] sm:$0xff]  }
 0x1de   : > { %4006 = vmatpush1.bf16.msra.mxu1 %v5782_v54  ;;  %3966 = vmatprep.subr.bf16.mxu0 %v5787_v55 }
 0x1df   : > { %4007 = vmatprep.subr.bf16.mxu1 %v5790_v56  ;;  %v5855_v56 = vld [vmem:[%s7734_s3 + $0x68] sm:$0xff]  }
 0x1e1   : > { %3967 = vmatpush1.bf16.msra.mxu0 %v5785_v57 }
 0x1e2   : > { %4008 = vmatpush1.bf16.msra.mxu1 %v5788_v6  ;;  %3968 = vmatprep.subr.bf16.mxu0 %v5793_v7 }
 0x1e3   : > { %4009 = vmatprep.subr.bf16.mxu1 %v5796_v18 }
 0x1e5   : > { %3969 = vmatpush1.bf16.msra.mxu0 %v5791_v59  ;;  %v5857_v59 = vld [vmem:[%s7734_s3 + $0x60] sm:$0xff]  }
 0x1e6   : > { %4010 = vmatpush1.bf16.msra.mxu1 %v5794_v60  ;;  %3970 = vmatprep.subr.bf16.mxu0 %v5799_v62 }
 0x1e7   : > { %4011 = vmatprep.subr.bf16.mxu1 %v5802_v27  ;;  %v5867_v27 = vld [vmem:[%s7734_s3 + $0xf8] sm:$0xff]  }
 0x1e9   : > { %3971 = vmatpush1.bf16.msra.mxu0 %v5797_v1  ;;  %v5868_v1 = vld [vmem:[%s7734_s3 + $0xb8] sm:$0xff]  }
 0x1ea   : > { %4012 = vmatpush1.bf16.msra.mxu1 %v5800_v36  ;;  %3972 = vmatprep.subr.bf16.mxu0 %v5805_v37  ;;  %v5869_v36 = vld [vmem:[%s7734_s3 + $0xf0] sm:$0xff]   ;;  %v5858_v37 = vld [vmem:[%s7734_s3 + $0x20] sm:$0xff]  }
 0x1eb   : > { %4013 = vmatprep.subr.bf16.mxu1 %v5808_v2  ;;  %v5870_v2 = vld [vmem:[%s7734_s3 + $0xb0] sm:$0xff]  }
 0x1ed   : > { %3973 = vmatpush2.bf16.msra.mxu0 %v5803_v3  ;;  %v5859_v3 = vld [vmem:[%s7734_s3 + $0x58] sm:$0xff]  }
 0x1ee   : > { %4014 = vmatpush2.bf16.msra.mxu1 %v5806_v35  ;;  %3974 = vmatprep.subr.bf16.mxu0 %v5811_v40  ;;  %v5871_v35 = vld [vmem:[%s7734_s3 + $0xe8] sm:$0xff]   ;;  %v5860_v40 = vld [vmem:[%s7734_s3 + $0x18] sm:$0xff]  }
 0x1ef   : > { %4015 = vmatprep.subr.bf16.mxu1 %v5814_v4  ;;  %v5872_v4 = vld [vmem:[%s7734_s3 + $0xa8] sm:$0xff]  }
 0x1f1   : > { %3975 = vmatpush2.bf16.msra.mxu0 %v5809_v5  ;;  %v5861_v5 = vld [vmem:[%s7734_s3 + $0x50] sm:$0xff]  }
 0x1f2   : > { %4016 = vmatpush2.bf16.msra.mxu1 %v5812_v8  ;;  %3976 = vmatprep.subr.bf16.mxu0 %v5817_v9  ;;  %v5873_v8 = vld [vmem:[%s7734_s3 + $0xe0] sm:$0xff]   ;;  %v5862_v9 = vld [vmem:[%s7734_s3 + $0x10] sm:$0xff]  }
 0x1f3   : > { %4017 = vmatprep.subr.bf16.mxu1 %v5820_v10  ;;  %v5874_v10 = vld [vmem:[%s7734_s3 + $0xa0] sm:$0xff]  }
 0x1f5   : > { %3977 = vmatpush2.bf16.msra.mxu0 %v5815_v11  ;;  %v5863_v11 = vld [vmem:[%s7734_s3 + $0x48] sm:$0xff]  }
 0x1f6   : > { %4018 = vmatpush2.bf16.msra.mxu1 %v5818_v12  ;;  %3978 = vmatprep.subr.bf16.mxu0 %v5823_v16  ;;  %v5875_v12 = vld [vmem:[%s7734_s3 + $0xd8] sm:$0xff]   ;;  %v5864_v16 = vld [vmem:[%s7734_s3 + $0x8] sm:$0xff]  }
 0x1f7   : > { %4019 = vmatprep.subr.bf16.mxu1 %v5826_v17  ;;  %v5876_v17 = vld [vmem:[%s7734_s3 + $0x98] sm:$0xff]  }
 0x1f9   : > { %3979 = vmatpush2.bf16.msra.mxu0 %v5821_v13  ;;  %v5865_v13 = vld [vmem:[%s7734_s3 + $0x40] sm:$0xff]  }
 0x1fa   : > { %4020 = vmatpush2.bf16.msra.mxu1 %v5824_v14  ;;  %3980 = vmatprep.subr.bf16.mxu0 %v5829_v15  ;;  %v5866_v14 = vld [vmem:[%s7734_s3] sm:$0xff]   ;;  %v4038_v15 = vmax.f32 %v7448_v58, 0.0  ;;  %v5879_v58 = vld [vmem:[%s7734_s3 + $0xc8] sm:$0xff]  }
 0x1fb   : > { %4021 = vmatprep.subr.bf16.mxu1 %v5832_v20 }
 0x1fc   : > { %v4042_v20 = vpack.c.bf16 %v4038_v15, %v4038_v15 }
 0x1fd   : > { %3981 = vmatpush2.bf16.msra.mxu0 %v5827_v21  ;;  %v5877_v21 = vld [vmem:[%s7734_s3 + $0xd0] sm:$0xff]  }
 0x1fe   : > { %4022 = vmatpush2.bf16.msra.mxu1 %v5830_v26  ;;  %3982 = vmatprep.subr.bf16.mxu0 %v5835_v61  ;;  %v5878_v26 = vld [vmem:[%s7734_s3 + $0x90] sm:$0xff]  }
 0x1ff   : > { %4023 = vmatprep.subr.bf16.mxu1 %v5838_v24 }
 0x201   : > { %3983 = vmatpush2.bf16.msra.mxu0 %v5833_v25 }
 0x202   : > { %4024 = vmatpush2.bf16.msra.mxu1 %v5836_v28  ;;  %3984 = vmatprep.subr.bf16.mxu0 %v5841_v29 }
 0x203   : > { %4025 = vmatprep.subr.bf16.mxu1 %v5844_v30 }
 0x205   : > { %3985 = vmatpush2.bf16.msra.mxu0 %v5839_v51  ;;  %v5880_v51 = vld [vmem:[%s7734_s3 + $0x88] sm:$0xff]  }
 0x206   : > { %4026 = vmatpush2.bf16.msra.mxu1 %v5842_v31  ;;  %3986 = vmatprep.subr.bf16.mxu0 %v5847_v38 }
 0x207   : > { %4027 = vmatprep.subr.bf16.mxu1 %v5850_v19 }
 0x209   : > { %3987 = vmatpush2.bf16.msra.mxu0 %v5845_v39 }
 0x20a   : > { %4028 = vmatpush2.bf16.msra.mxu1 %v5848_v34  ;;  %5015 = vmatprep.subr.bf16.mxu0 %v5851_v42  ;;  %v5881_v34 = vld [vmem:[%s7734_s3 + $0xc0] sm:$0xff]  }
 0x20b   : > { %5037 = vmatprep.subr.bf16.mxu1 %v5867_v27 }
 0x20c   : > { %v3744_v49 = vpop.f32.mrf.mxu0  ;;  %3989 = vmatmul.mubr.bf16.vlgmr.msra.gmra.mxu0 %v6807_v63 }
 0x20d   : > { %v3785_v53 = vpop.f32.mrf.mxu1  ;;  %4030 = vmatmul.mubr.bf16.vlgmr.msra.gmra.mxu1 %v6811_v0  ;;  %v3745_v50 = vadd.f32 %v3744_v49, %v757_v45  ;;  %5016 = vmatpush3.bf16.msra.mxu0 %v5852_v23  ;;  %v5856_v0 = vld [vmem:[%s7734_s3 + $0x28] sm:$0xff]  }
 0x20e   : > { %4341 = vmatprep.mubr.bf16.mxu0 %v4043_v46  ;;  %v3746_v54 = vpop.f32.mrf.mxu0  ;;  %5017 = vmatprep.subr.bf16.mxu0 %v5853_v43 }
 0x20f   : > { %v3787_v55 = vpop.f32.mrf.mxu1  ;;  %v3786_v57 = vadd.f32 %v3785_v53, %v3745_v50  ;;  %v3747_v6 = vadd.f32 %v3746_v54, %v761_v48  ;;  %5038 = vmatpush3.bf16.msra.mxu1 %v5868_v1 }
 0x210   : > { %v3748_v7 = vpop.f32.mrf.mxu0  ;;  %5039 = vmatprep.subr.bf16.mxu1 %v5869_v36 }
 0x211   : > { %v3789_v63 = vpop.f32.mrf.mxu1  ;;  %v3788_v18 = vadd.f32 %v3787_v55, %v3747_v6  ;;  %5018 = vmatpush3.bf16.msra.mxu0 %v5854_v52 }
 0x212   : > { %v3749_v60 = vpop.f32.mrf.mxu0  ;;  %5019 = vmatprep.subr.bf16.mxu0 %v5855_v56 }
 0x213   : > { %v3790_v62 = vpop.f32.mrf.mxu1  ;;  %5040 = vmatpush3.bf16.msra.mxu1 %v5870_v2 }
 0x214   : > { %5041 = vmatprep.subr.bf16.mxu1 %v5871_v35 }
 0x215   : > { %5020 = vmatpush3.bf16.msra.mxu0 %v5856_v0 }
 0x216   : > { %5021 = vmatprep.subr.bf16.mxu0 %v5857_v59 }
 0x217   : > { %5042 = vmatpush3.bf16.msra.mxu1 %v5872_v4  ;;  %v4979_v4 = vld [vmem:[%s7735_s4] ss:$0 sm:$0xff] }
 0x218   : > { %5043 = vmatprep.subr.bf16.mxu1 %v5873_v8 }
 0x219   : > { %5022 = vmatpush3.bf16.msra.mxu0 %v5858_v37 }
 0x21a   : > { %5023 = vmatprep.subr.bf16.mxu0 %v5859_v3 }
 0x21b   : > { %5044 = vmatpush3.bf16.msra.mxu1 %v5874_v10 }
 0x21c   : > { %5045 = vmatprep.subr.bf16.mxu1 %v5875_v12 }
 0x21d   : > { %5024 = vmatpush3.bf16.msra.mxu0 %v5860_v40 }
 0x21e   : > { %5025 = vmatprep.subr.bf16.mxu0 %v5861_v5 }
 0x21f   : > { %5046 = vmatpush3.bf16.msra.mxu1 %v5876_v17 }
 0x220   : > { %5047 = vmatprep.subr.bf16.mxu1 %v5877_v21 }
 0x221   : > { %5026 = vmatpush3.bf16.msra.mxu0 %v5862_v9 }
 0x222   : > { %5027 = vmatprep.subr.bf16.mxu0 %v5863_v11 }
 0x223   : > { %5048 = vmatpush3.bf16.msra.mxu1 %v5878_v26 }
 0x224   : > { %5049 = vmatprep.subr.bf16.mxu1 %v5879_v58 }
 0x225   : > { %5028 = vmatpush3.bf16.msra.mxu0 %v5864_v16 }
 0x226   : > { %5029 = vmatprep.subr.bf16.mxu0 %v5865_v13 }
 0x227   : > { %5050 = vmatpush3.bf16.msra.mxu1 %v5880_v51 }
 0x228   : > { %5051 = vmatprep.subr.bf16.mxu1 %v5881_v34 }
 0x229   : > { %5030 = vmatpush3.bf16.msra.mxu0 %v5866_v14 }
 0x22b   : > { %5052 = vmatpush3.bf16.msra.mxu1 %v5882_v41 }
 0x22c   : > { %4342 = vmatmul.mubr.bf16.vlgmr.msra.gmra.mxu0 %v4042_v20 }
 0x24c   : > { %v3826_v61 = vpop.f32.mrf.mxu0 }
 0x24d   : > { %v3867_v24 = vpop.f32.mrf.mxu1  ;;  %v3827_v25 = vadd.f32 %v3826_v61, %v3786_v57 }
 0x24e   : > { %v3828_v28 = vpop.f32.mrf.mxu0 }
 0x24f   : > { %v3869_v29 = vpop.f32.mrf.mxu1  ;;  %v3868_v30 = vadd.f32 %v3867_v24, %v3827_v25  ;;  %v3829_v47 = vadd.f32 %v3828_v28, %v3788_v18 }
 0x250   : > { %v3830_v31 = vpop.f32.mrf.mxu0 }
 0x251   : > { %v3871_v38 = vpop.f32.mrf.mxu1  ;;  %v3870_v19 = vadd.f32 %v3869_v29, %v3829_v47 }
 0x252   : > { %v3831_v32 = vpop.f32.mrf.mxu0 }
 0x253   : > { %v3872_v39 = vpop.f32.mrf.mxu1 }
 0x28c   : > { %v3908_v42 = vpop.f32.mrf.mxu0 }
 0x28d   : > { %v3949_v22 = vpop.f32.mrf.mxu1  ;;  %v3909_v33 = vadd.f32 %v3908_v42, %v3868_v30 }
 0x28e   : > { %v3910_v44 = vpop.f32.mrf.mxu0 }
 0x28f   : > { %v3951_v45 = vpop.f32.mrf.mxu1  ;;  %v3950_v23 = vadd.f32 %v3949_v22, %v3909_v33  ;;  %v3911_v53 = vadd.f32 %v3910_v44, %v3870_v19 }
 0x290   : > { %v3912_v43 = vpop.f32.mrf.mxu0 }
 0x291   : > { %v3953_v46 = vpop.f32.mrf.mxu1  ;;  %v3952_v54 = vadd.f32 %v3951_v45, %v3911_v53 }
 0x292   : > { %v3913_v48 = vpop.f32.mrf.mxu0 }
 0x293   : > { %v3954_v49 = vpop.f32.mrf.mxu1 }
 0x2cc   : > { %v3990_v50 = vpop.f32.mrf.mxu0 }
 0x2cd   : > { %v4031_v52 = vpop.f32.mrf.mxu1  ;;  %v3991_v55 = vadd.f32 %v3990_v50, %v3950_v23 }
 0x2ce   : > { %v3992_v56 = vpop.f32.mrf.mxu0 }
 0x2cf   : > { %v4033_v57 = vpop.f32.mrf.mxu1  ;;  %v4032_v6 = vadd.f32 %v4031_v52, %v3991_v55  ;;  %v3993_v7 = vadd.f32 %v3992_v56, %v3952_v54 }
 0x2d0   : > { %v3994_v63 = vpop.f32.mrf.mxu0 }
 0x2d1   : > { %v4035_v18 = vpop.f32.mrf.mxu1  ;;  %v4034_v0 = vadd.f32 %v4033_v57, %v3993_v7  ;;  %v4040_v59 = vmax.f32 %v4032_v6, 0.0 }
 0x2d2   : > { %v3995_v60 = vpop.f32.mrf.mxu0 }
 0x2d3   : > { %v4036_v62 = vpop.f32.mrf.mxu1  ;;  %v4041_v27 = vmax.f32 %v4034_v0, 0.0  ;;  %v4044_v36 = vpack.c.bf16 %v4040_v59, %v4040_v59 }
 0x2d5   : > { %v4045_v1 = vpack.c.bf16 %v4041_v27, %v4041_v27 }
 0x2d7   : > { %4381 = vmatprep.mubr.bf16.mxu1 %v4045_v1 }
 0x2d8   : > { %4382 = vmatmul.mubr.bf16.vlgmr.msra.gmra.mxu1 %v4044_v36 }
 0x2ec   : > { %v5031_v37 = vpop.f32.mrf.mxu0 }
 0x2ee   : > { %v5032_v2 = vpop.f32.mrf.mxu0 }
 0x2ef   : > { %v5033_v3 = vadd.f32 %v5032_v2, %v5031_v37 }
 0x2f0   : > { %v5034_v35 = vpop.f32.mrf.mxu0 }
 0x2f1   : > { %v4344_v9 = vadd.f32 %v5033_v3, %v4979_v4 }
 0x2f2   : > { %v5035_v40 = vpop.f32.mrf.mxu0 }
 0x398   : > { %v5053_v5 = vpop.f32.mrf.mxu1 }
 0x39a   : > { %v5054_v8 = vpop.f32.mrf.mxu1 }
 0x39b   : > { %v5055_v10 = vadd.f32 %v5054_v8, %v5053_v5 }
 0x39c   : > { %v5056_v11 = vpop.f32.mrf.mxu1 }
 0x39d   : > { %v4384_v12 = vadd.f32 %v5055_v10, %v4344_v9 }
 0x39e   : > { %v5057_v16 = vpop.f32.mrf.mxu1 }
 0x39f   : > { %4389 = vst [vmem:[%s222_s30] sm:$0xff] %v4384_v12 }
 0x3a0 PF: > { %s15_s18 = sadd.s32 1, %s5890_s18  }
 0x3a1   : > { %p12_p4 = scmp.ge.s32.totalorder %s15_s18, 4  }
 0x3a3   :  { %14 = sbr.rel (!%p12_p4) target bundleno = 1 (0x1), region = 70 }

</bundles_post_ra>
